<compile_context>
chip_gen: v7x
topology: tpu7x:2x2x1
jax: 0.10.0
libtpu: 0.0.40
codegen_flags: <defaults>
</compile_context>

<pallas_src>
import functools

import jax
import jax.numpy as jnp
from jax.experimental import pallas as pl
from jax.experimental.pallas import tpu as pltpu


def _conv3x3_acc(x_ref, w_ref, xp_ref, *, H, W, Cin):
    """Zero-pad the (H, W, Cin) bf16 input block into the VMEM scratch and
    return the f32 (H*W, Cout) conv accumulator from 9 statically unrolled
    MXU matmuls (one per (kh, kw) tap) — no im2col concatenate."""
    xp_ref[...] = jnp.zeros(xp_ref.shape, dtype=xp_ref.dtype)
    xp_ref[1:H + 1, 1:W + 1, :] = x_ref[0]
    acc = None
    for k in range(9):
        kh, kw = k // 3, k % 3
        patch = xp_ref[kh:kh + H, kw:kw + W, :].reshape(H * W, Cin)   # bf16
        term = jnp.dot(patch, w_ref[k], preferred_element_type=jnp.float32)
        acc = term if acc is None else acc + term
    return acc                                                        # (H*W, Cout) f32


def _conv_stats_kernel(x_ref, w_ref, stats_ref, xp_ref, *, H, W, Cin, Cout):
    # x_ref:     (1, H, W, Cin)   bf16  (unpadded image)
    # w_ref:     (9, Cin, Cout)   bf16  (tap-major weights)
    # stats_ref: (1, 2, Cout)     f32   row 0 = sum over (H, W), row 1 = sum of squares
    # xp_ref:    (H+2, W+2, Cin)  bf16  VMEM scratch (zero-padded input)
    acc = _conv3x3_acc(x_ref, w_ref, xp_ref, H=H, W=W, Cin=Cin)
    s = jnp.sum(acc, axis=0, keepdims=True)                           # (1, Cout)
    q = jnp.sum(acc * acc, axis=0, keepdims=True)                     # (1, Cout)
    stats_ref[...] = jnp.concatenate([s, q], axis=0).reshape(1, 2, Cout)


def _conv_bn_relu_pool_kernel(x_ref, w_ref, ss_ref, o_ref, xp_ref, *, H, W, Cin, Cout):
    # ss_ref: (2, Cout) f32 — row 0 = BN scale, row 1 = BN shift
    # o_ref:  (1, H2, W2*Cout) f32 — pooled output, lane-dense (Cout < 128 here)
    H2, W2 = H // 2, W // 2
    acc = _conv3x3_acc(x_ref, w_ref, xp_ref, H=H, W=W, Cin=Cin)       # recompute (no conv_ld)
    y = jnp.maximum(acc * ss_ref[0:1, :] + ss_ref[1:2, :], 0.0)       # BN affine + ReLU, (H*W, Cout)
    # 2x2 max pool on values only (no scratch copies):
    #   rows: (H*W, Cout) -> (H2, 2*W, Cout); first W entries are row 2*h2, next W are row 2*h2+1.
    y3 = y.reshape(H2, 2 * W, Cout)
    yr = jnp.maximum(y3[:, :W, :], y3[:, W:, :])                      # (H2, W, Cout)
    #   cols: adjacent w pairs packed onto lanes, then a lane-slice max.
    y4 = yr.reshape(H2, W2, 2 * Cout)
    p = jnp.maximum(y4[..., :Cout], y4[..., Cout:])                   # (H2, W2, Cout)
    o_ref[...] = p.reshape(1, H2, W2 * Cout)


def conv_block(x_nchw, w_oihw, gamma, beta, eps=1e-5):
    N, Cin, H, W = x_nchw.shape
    Cout = w_oihw.shape[0]
    assert H % 2 == 0 and W % 2 == 0
    H2, W2 = H // 2, W // 2

    # ---- glue (plain JAX): layout + dtype only (bf16 operands, f32 accumulation) ----
    x_nhwc = jnp.transpose(x_nchw, (0, 2, 3, 1)).astype(jnp.bfloat16)          # no HBM pad copy
    w9 = (jnp.transpose(w_oihw, (2, 3, 1, 0))                                  # (kh, kw, Cin, Cout)
          .reshape(9, Cin, Cout).astype(jnp.bfloat16))

    x_spec = pl.BlockSpec((1, H, W, Cin), lambda n: (n, 0, 0, 0))
    w_spec = pl.BlockSpec((9, Cin, Cout), lambda n: (0, 0, 0))                 # constant block -> resident
    scratch = [pltpu.VMEM((H + 2, W + 2, Cin), jnp.bfloat16)]

    # Scoped-VMEM limit sized from the actual double-buffered block set (+ margin),
    # floored at 32 MiB (safe default everywhere), capped at v7x's 64 MiB physical.
    blk_bytes = 2 * (H * W * Cin * 2
                     + 9 * Cin * Cout * 2
                     + max(2 * Cout, H2 * W2 * Cout) * 4) \
                + (H + 2) * (W + 2) * Cin * 2
    vmem_limit = int(min(max(blk_bytes + (4 << 20), 32 << 20), 64 << 20))
    cparams = pltpu.CompilerParams(dimension_semantics=("parallel",),
                                   vmem_limit_bytes=vmem_limit)

    # ---- pass 1: conv (unrolled 9-tap matmuls) -> per-image BN partials only ----
    stats = pl.pallas_call(
        functools.partial(_conv_stats_kernel, H=H, W=W, Cin=Cin, Cout=Cout),
        out_shape=jax.ShapeDtypeStruct((N, 2, Cout), jnp.float32),
        grid=(N,),
        in_specs=[x_spec, w_spec],
        out_specs=pl.BlockSpec((1, 2, Cout), lambda n: (n, 0, 0)),
        scratch_shapes=scratch,
        compiler_params=cparams,
    )(x_nhwc, w9)

    # ---- fold batch statistics + gamma/beta into per-channel scale / shift ----
    cnt = float(N * H * W)
    mean = jnp.sum(stats[:, 0, :], axis=0) / cnt
    # E[x^2] - E[x]^2 in f32 (clamped); fine at post-conv magnitudes (|mean| ~ std).
    var = jnp.maximum(jnp.sum(stats[:, 1, :], axis=0) / cnt - mean * mean, 0.0)
    inv = jax.lax.rsqrt(var + eps)
    scale = gamma.astype(jnp.float32) * inv
    shift = beta.astype(jnp.float32) - mean * scale
    scale_shift = jnp.stack([scale, shift], axis=0)                            # (2, Cout) f32

    # ---- pass 2: recompute conv + BN affine + ReLU + 2x2 max pool (fused) ----
    out_ld = pl.pallas_call(
        functools.partial(_conv_bn_relu_pool_kernel, H=H, W=W, Cin=Cin, Cout=Cout),
        out_shape=jax.ShapeDtypeStruct((N, H2, W2 * Cout), jnp.float32),
        grid=(N,),
        in_specs=[x_spec, w_spec, pl.BlockSpec((2, Cout), lambda n: (0, 0))],
        out_specs=pl.BlockSpec((1, H2, W2 * Cout), lambda n: (n, 0, 0)),
        scratch_shapes=scratch,
        compiler_params=cparams,
    )(x_nhwc, w9, scale_shift)

    # Lane-dense (N, H2, W2*Cout) -> NCHW.
    return jnp.transpose(out_ld.reshape(N, H2, W2, Cout), (0, 3, 1, 2))


def conv_block_reference(x_nchw, w_oihw, gamma, beta, eps=1e-5):
    """Pure-JAX reference with the same precision policy (bf16 operands, f32 math)."""
    xq = x_nchw.astype(jnp.bfloat16).astype(jnp.float32)
    wq = w_oihw.astype(jnp.bfloat16).astype(jnp.float32)
    y = jax.lax.conv_general_dilated(
        xq, wq, window_strides=(1, 1), padding=((1, 1), (1, 1)),
        dimension_numbers=("NCHW", "OIHW", "NCHW"),
        precision=jax.lax.Precision.HIGHEST)
    mean = jnp.mean(y, axis=(0, 2, 3), keepdims=True)
    var = jnp.mean((y - mean) ** 2, axis=(0, 2, 3), keepdims=True)
    y = (y - mean) * jax.lax.rsqrt(var + eps)
    y = y * gamma.reshape(1, -1, 1, 1) + beta.reshape(1, -1, 1, 1)
    y = jnp.maximum(y, 0.0)
    y = jax.lax.reduce_window(y, -jnp.inf, jax.lax.max,
                              (1, 1, 2, 2), (1, 1, 2, 2), "VALID")
    return y


if __name__ == "__main__":
    key = jax.random.PRNGKey(0)
    kx, kw, kg, kb = jax.random.split(key, 4)

    N, Cin, H, W = 2, 4, 16, 16
    Cout = 2 * Cin                      # out_channels defaults to in_channels * 2

    x = jax.random.normal(kx, (N, Cin, H, W), jnp.float32)
    w = 0.1 * jax.random.normal(kw, (Cout, Cin, 3, 3), jnp.float32)      # conv weight
    gamma = 1.0 + 0.1 * jax.random.normal(kg, (Cout,), jnp.float32)      # BN weight
    beta = 0.1 * jax.random.normal(kb, (Cout,), jnp.float32)             # BN bias

    out = jax.block_until_ready(conv_block(x, w, gamma, beta))
    assert out.shape == (N, Cout, H // 2, W // 2), out.shape

    ref = conv_block_reference(x, w, gamma, beta)
    if not jnp.allclose(out, ref, atol=2e-3, rtol=2e-3):
        raise AssertionError(
            f"mismatch vs reference, max abs err = {jnp.max(jnp.abs(out - ref))}")

    print("KERNEL_OK")
</pallas_src>

<mosaic_0001>
module attributes {stable_mosaic.version = 11 : i64} {
  func.func @_conv_stats_kernel(%arg0: i32, %arg1: memref<1x16x16x4xbf16, #tpu.memory_space<vmem>>, %arg2: memref<9x4x8xbf16, #tpu.memory_space<vmem>>, %arg3: memref<1x2x8xf32, #tpu.memory_space<vmem>>, %arg4: memref<18x18x4xbf16, #tpu.memory_space<vmem>>) attributes {dimension_semantics = [#tpu.dimension_semantics<parallel>], iteration_bounds = array<i64: 2>, scalar_prefetch = 0 : i64, scratch_operands = 1 : i64, tpu.core_type = #tpu.core_type<tc>, window_params = [{transform_indices = @transform_0, window_bounds = array<i64: 1, 16, 16, 4>}, {pipeline_mode = #tpu.pipeline_mode<synchronous>, transform_indices = @transform_1, window_bounds = array<i64: 9, 4, 8>}, {transform_indices = @transform_2, window_bounds = array<i64: 1, 2, 8>}]} {
    %cst = arith.constant 0.000000e+00 : bf16
    %0 = vector.broadcast %cst : bf16 to vector<18x18x4xbf16>
    %c0 = arith.constant 0 : index
    %c0_0 = arith.constant 0 : index
    %c0_1 = arith.constant 0 : index
    %1 = vector.load %arg4[%c0, %c0_0, %c0_1] : memref<18x18x4xbf16, #tpu.memory_space<vmem>>, vector<18x18x4xbf16>
    tpu.vector_store %arg4[%c0, %c0_0, %c0_1], %0 {strides = array<i32>} : memref<18x18x4xbf16, #tpu.memory_space<vmem>>, vector<18x18x4xbf16>,
    %c0_2 = arith.constant 0 : index
    %c0_3 = arith.constant 0 : index
    %c0_4 = arith.constant 0 : index
    %c0_5 = arith.constant 0 : index
    %2 = vector.load %arg1[%c0_2, %c0_3, %c0_4, %c0_5] : memref<1x16x16x4xbf16, #tpu.memory_space<vmem>>, vector<1x16x16x4xbf16>
    %3 = vector.shape_cast %2 : vector<1x16x16x4xbf16> to vector<16x16x4xbf16>
    %c1 = arith.constant 1 : index
    %c1_6 = arith.constant 1 : index
    %c0_7 = arith.constant 0 : index
    %4 = vector.load %arg4[%c1, %c1_6, %c0_7] : memref<18x18x4xbf16, #tpu.memory_space<vmem>>, vector<16x16x4xbf16>
    tpu.vector_store %arg4[%c1, %c1_6, %c0_7], %3 {strides = array<i32>} : memref<18x18x4xbf16, #tpu.memory_space<vmem>>, vector<16x16x4xbf16>,
    %c0_8 = arith.constant 0 : index
    %c0_9 = arith.constant 0 : index
    %c0_10 = arith.constant 0 : index
    %5 = vector.load %arg4[%c0_8, %c0_9, %c0_10] : memref<18x18x4xbf16, #tpu.memory_space<vmem>>, vector<16x16x4xbf16>
    %6 = vector.shape_cast %5 : vector<16x16x4xbf16> to vector<256x4xbf16>
    %c0_11 = arith.constant 0 : index
    %c0_12 = arith.constant 0 : index
    %c0_13 = arith.constant 0 : index
    %7 = vector.load %arg2[%c0_11, %c0_12, %c0_13] : memref<9x4x8xbf16, #tpu.memory_space<vmem>>, vector<1x4x8xbf16>
    %8 = vector.shape_cast %7 : vector<1x4x8xbf16> to vector<4x8xbf16>
    %cst_14 = arith.constant dense<0.000000e+00> : vector<256x8xf32>
    %9 = tpu.matmul %6, %8, %cst_14 {dimension_numbers = #tpu.dot_dimension_numbers<[1], [0], [0], [1], [0, 0, 1, 1], [], []>} : vector<256x4xbf16>, vector<4x8xbf16>, vector<256x8xf32> -> vector<256x8xf32>
    %c0_15 = arith.constant 0 : index
    %c1_16 = arith.constant 1 : index
    %c0_17 = arith.constant 0 : index
    %10 = vector.load %arg4[%c0_15, %c1_16, %c0_17] : memref<18x18x4xbf16, #tpu.memory_space<vmem>>, vector<16x16x4xbf16>
    %11 = vector.shape_cast %10 : vector<16x16x4xbf16> to vector<256x4xbf16>
    %c1_18 = arith.constant 1 : index
    %c0_19 = arith.constant 0 : index
    %c0_20 = arith.constant 0 : index
    %12 = vector.load %arg2[%c1_18, %c0_19, %c0_20] : memref<9x4x8xbf16, #tpu.memory_space<vmem>>, vector<1x4x8xbf16>
    %13 = vector.shape_cast %12 : vector<1x4x8xbf16> to vector<4x8xbf16>
    %cst_21 = arith.constant dense<0.000000e+00> : vector<256x8xf32>
    %14 = tpu.matmul %11, %13, %cst_21 {dimension_numbers = #tpu.dot_dimension_numbers<[1], [0], [0], [1], [0, 0, 1, 1], [], []>} : vector<256x4xbf16>, vector<4x8xbf16>, vector<256x8xf32> -> vector<256x8xf32>
    %15 = arith.addf %9, %14 : vector<256x8xf32>
    %c0_22 = arith.constant 0 : index
    %c2 = arith.constant 2 : index
    %c0_23 = arith.constant 0 : index
    %16 = vector.load %arg4[%c0_22, %c2, %c0_23] : memref<18x18x4xbf16, #tpu.memory_space<vmem>>, vector<16x16x4xbf16>
    %17 = vector.shape_cast %16 : vector<16x16x4xbf16> to vector<256x4xbf16>
    %c2_24 = arith.constant 2 : index
    %c0_25 = arith.constant 0 : index
    %c0_26 = arith.constant 0 : index
    %18 = vector.load %arg2[%c2_24, %c0_25, %c0_26] : memref<9x4x8xbf16, #tpu.memory_space<vmem>>, vector<1x4x8xbf16>
    %19 = vector.shape_cast %18 : vector<1x4x8xbf16> to vector<4x8xbf16>
    %cst_27 = arith.constant dense<0.000000e+00> : vector<256x8xf32>
    %20 = tpu.matmul %17, %19, %cst_27 {dimension_numbers = #tpu.dot_dimension_numbers<[1], [0], [0], [1], [0, 0, 1, 1], [], []>} : vector<256x4xbf16>, vector<4x8xbf16>, vector<256x8xf32> -> vector<256x8xf32>
    %21 = arith.addf %15, %20 : vector<256x8xf32>
    %c1_28 = arith.constant 1 : index
    %c0_29 = arith.constant 0 : index
    %c0_30 = arith.constant 0 : index
    %22 = vector.load %arg4[%c1_28, %c0_29, %c0_30] : memref<18x18x4xbf16, #tpu.memory_space<vmem>>, vector<16x16x4xbf16>
    %23 = vector.shape_cast %22 : vector<16x16x4xbf16> to vector<256x4xbf16>
    %c3 = arith.constant 3 : index
    %c0_31 = arith.constant 0 : index
    %c0_32 = arith.constant 0 : index
    %24 = vector.load %arg2[%c3, %c0_31, %c0_32] : memref<9x4x8xbf16, #tpu.memory_space<vmem>>, vector<1x4x8xbf16>
    %25 = vector.shape_cast %24 : vector<1x4x8xbf16> to vector<4x8xbf16>
    %cst_33 = arith.constant dense<0.000000e+00> : vector<256x8xf32>
    %26 = tpu.matmul %23, %25, %cst_33 {dimension_numbers = #tpu.dot_dimension_numbers<[1], [0], [0], [1], [0, 0, 1, 1], [], []>} : vector<256x4xbf16>, vector<4x8xbf16>, vector<256x8xf32> -> vector<256x8xf32>
    %27 = arith.addf %21, %26 : vector<256x8xf32>
    %c1_34 = arith.constant 1 : index
    %c1_35 = arith.constant 1 : index
    %c0_36 = arith.constant 0 : index
    %28 = vector.load %arg4[%c1_34, %c1_35, %c0_36] : memref<18x18x4xbf16, #tpu.memory_space<vmem>>, vector<16x16x4xbf16>
    %29 = vector.shape_cast %28 : vector<16x16x4xbf16> to vector<256x4xbf16>
    %c4 = arith.constant 4 : index
    %c0_37 = arith.constant 0 : index
    %c0_38 = arith.constant 0 : index
    %30 = vector.load %arg2[%c4, %c0_37, %c0_38] : memref<9x4x8xbf16, #tpu.memory_space<vmem>>, vector<1x4x8xbf16>
    %31 = vector.shape_cast %30 : vector<1x4x8xbf16> to vector<4x8xbf16>
    %cst_39 = arith.constant dense<0.000000e+00> : vector<256x8xf32>
    %32 = tpu.matmul %29, %31, %cst_39 {dimension_numbers = #tpu.dot_dimension_numbers<[1], [0], [0], [1], [0, 0, 1, 1], [], []>} : vector<256x4xbf16>, vector<4x8xbf16>, vector<256x8xf32> -> vector<256x8xf32>
    %33 = arith.addf %27, %32 : vector<256x8xf32>
    %c1_40 = arith.constant 1 : index
    %c2_41 = arith.constant 2 : index
    %c0_42 = arith.constant 0 : index
    %34 = vector.load %arg4[%c1_40, %c2_41, %c0_42] : memref<18x18x4xbf16, #tpu.memory_space<vmem>>, vector<16x16x4xbf16>
    %35 = vector.shape_cast %34 : vector<16x16x4xbf16> to vector<256x4xbf16>
    %c5 = arith.constant 5 : index
    %c0_43 = arith.constant 0 : index
    %c0_44 = arith.constant 0 : index
    %36 = vector.load %arg2[%c5, %c0_43, %c0_44] : memref<9x4x8xbf16, #tpu.memory_space<vmem>>, vector<1x4x8xbf16>
    %37 = vector.shape_cast %36 : vector<1x4x8xbf16> to vector<4x8xbf16>
    %cst_45 = arith.constant dense<0.000000e+00> : vector<256x8xf32>
    %38 = tpu.matmul %35, %37, %cst_45 {dimension_numbers = #tpu.dot_dimension_numbers<[1], [0], [0], [1], [0, 0, 1, 1], [], []>} : vector<256x4xbf16>, vector<4x8xbf16>, vector<256x8xf32> -> vector<256x8xf32>
    %39 = arith.addf %33, %38 : vector<256x8xf32>
    %c2_46 = arith.constant 2 : index
    %c0_47 = arith.constant 0 : index
    %c0_48 = arith.constant 0 : index
    %40 = vector.load %arg4[%c2_46, %c0_47, %c0_48] : memref<18x18x4xbf16, #tpu.memory_space<vmem>>, vector<16x16x4xbf16>
    %41 = vector.shape_cast %40 : vector<16x16x4xbf16> to vector<256x4xbf16>
    %c6 = arith.constant 6 : index
    %c0_49 = arith.constant 0 : index
    %c0_50 = arith.constant 0 : index
    %42 = vector.load %arg2[%c6, %c0_49, %c0_50] : memref<9x4x8xbf16, #tpu.memory_space<vmem>>, vector<1x4x8xbf16>
    %43 = vector.shape_cast %42 : vector<1x4x8xbf16> to vector<4x8xbf16>
    %cst_51 = arith.constant dense<0.000000e+00> : vector<256x8xf32>
    %44 = tpu.matmul %41, %43, %cst_51 {dimension_numbers = #tpu.dot_dimension_numbers<[1], [0], [0], [1], [0, 0, 1, 1], [], []>} : vector<256x4xbf16>, vector<4x8xbf16>, vector<256x8xf32> -> vector<256x8xf32>
    %45 = arith.addf %39, %44 : vector<256x8xf32>
    %c2_52 = arith.constant 2 : index
    %c1_53 = arith.constant 1 : index
    %c0_54 = arith.constant 0 : index
    %46 = vector.load %arg4[%c2_52, %c1_53, %c0_54] : memref<18x18x4xbf16, #tpu.memory_space<vmem>>, vector<16x16x4xbf16>
    %47 = vector.shape_cast %46 : vector<16x16x4xbf16> to vector<256x4xbf16>
    %c7 = arith.constant 7 : index
    %c0_55 = arith.constant 0 : index
    %c0_56 = arith.constant 0 : index
    %48 = vector.load %arg2[%c7, %c0_55, %c0_56] : memref<9x4x8xbf16, #tpu.memory_space<vmem>>, vector<1x4x8xbf16>
    %49 = vector.shape_cast %48 : vector<1x4x8xbf16> to vector<4x8xbf16>
    %cst_57 = arith.constant dense<0.000000e+00> : vector<256x8xf32>
    %50 = tpu.matmul %47, %49, %cst_57 {dimension_numbers = #tpu.dot_dimension_numbers<[1], [0], [0], [1], [0, 0, 1, 1], [], []>} : vector<256x4xbf16>, vector<4x8xbf16>, vector<256x8xf32> -> vector<256x8xf32>
    %51 = arith.addf %45, %50 : vector<256x8xf32>
    %c2_58 = arith.constant 2 : index
    %c2_59 = arith.constant 2 : index
    %c0_60 = arith.constant 0 : index
    %52 = vector.load %arg4[%c2_58, %c2_59, %c0_60] : memref<18x18x4xbf16, #tpu.memory_space<vmem>>, vector<16x16x4xbf16>
    %53 = vector.shape_cast %52 : vector<16x16x4xbf16> to vector<256x4xbf16>
    %c8 = arith.constant 8 : index
    %c0_61 = arith.constant 0 : index
    %c0_62 = arith.constant 0 : index
    %54 = vector.load %arg2[%c8, %c0_61, %c0_62] : memref<9x4x8xbf16, #tpu.memory_space<vmem>>, vector<1x4x8xbf16>
    %55 = vector.shape_cast %54 : vector<1x4x8xbf16> to vector<4x8xbf16>
    %cst_63 = arith.constant dense<0.000000e+00> : vector<256x8xf32>
    %56 = tpu.matmul %53, %55, %cst_63 {dimension_numbers = #tpu.dot_dimension_numbers<[1], [0], [0], [1], [0, 0, 1, 1], [], []>} : vector<256x4xbf16>, vector<4x8xbf16>, vector<256x8xf32> -> vector<256x8xf32>
    %57 = arith.addf %51, %56 : vector<256x8xf32>
    %cst_64 = arith.constant dense<0.000000e+00> : vector<8xf32>
    %58 = vector.multi_reduction <add>, %57, %cst_64 [0] : vector<256x8xf32> to vector<8xf32>
    %59 = vector.shape_cast %58 : vector<8xf32> to vector<1x8xf32>
    %60 = arith.mulf %57, %57 : vector<256x8xf32>
    %cst_65 = arith.constant dense<0.000000e+00> : vector<8xf32>
    %61 = vector.multi_reduction <add>, %60, %cst_65 [0] : vector<256x8xf32> to vector<8xf32>
    %62 = vector.shape_cast %61 : vector<8xf32> to vector<1x8xf32>
    %63 = tpu.concatenate %59, %62 in 0 : vector<1x8xf32>, vector<1x8xf32> -> vector<2x8xf32>
    %64 = vector.shape_cast %63 : vector<2x8xf32> to vector<1x2x8xf32>
    %c0_66 = arith.constant 0 : index
    %c0_67 = arith.constant 0 : index
    %c0_68 = arith.constant 0 : index
    %65 = vector.load %arg3[%c0_66, %c0_67, %c0_68] : memref<1x2x8xf32, #tpu.memory_space<vmem>>, vector<1x2x8xf32>
    tpu.vector_store %arg3[%c0_66, %c0_67, %c0_68], %64 {strides = array<i32>} : memref<1x2x8xf32, #tpu.memory_space<vmem>>, vector<1x2x8xf32>,
    return
  }
  func.func @transform_0(%arg0: i32) -> (i32, i32, i32, i32) {
    %c0_i32 = arith.constant 0 : i32
    %c0_i32_0 = arith.constant 0 : i32
    %c0_i32_1 = arith.constant 0 : i32
    %c0_i32_2 = arith.constant 0 : i32
    return %arg0, %c0_i32, %c0_i32_0, %c0_i32_1 : i32, i32, i32, i32
  }
  func.func @transform_1(%arg0: i32) -> (i32, i32, i32) {
    %c0_i32 = arith.constant 0 : i32
    %c0_i32_0 = arith.constant 0 : i32
    %c0_i32_1 = arith.constant 0 : i32
    %c0_i32_2 = arith.constant 0 : i32
    return %c0_i32, %c0_i32_0, %c0_i32_1 : i32, i32, i32
  }
  func.func @transform_2(%arg0: i32) -> (i32, i32, i32) {
    %c0_i32 = arith.constant 0 : i32
    %c0_i32_0 = arith.constant 0 : i32
    %c0_i32_1 = arith.constant 0 : i32
    return %arg0, %c0_i32, %c0_i32_0 : i32, i32, i32
  }
}

</mosaic_0001>

<bundles_post_ra>
// kernel: tpu_custom_call.1
= control target key start
LH: loop header
LB: loop body
LE: loop exit
PB: predicated region body
PF: predicated region fallthrough
CT: control target
= control target key end

     0   :  { %7 = vsyncpa [#allocation4], 0  ;;  %s8672_s0 = inlined_call_operand.vmem [shape: bf16[2,16,16,4], index: 0, kind: input, shape index: {}]   ;;  %s8673_s1 = inlined_call_operand.vmem [shape: bf16[9,4,8], index: 1, kind: input, shape index: {}]   ;;  %s8674_s2 = inlined_call_operand.hbm [shape: f32[2,2,8], index: 2, kind: output, shape index: {}]  }
   0x1   :  { %9 = vsyncpa [#allocation4 + $0x1], 0  ;;  %s6767_s9 = smov 0   ;;  %s6769_s10 = smov 0  }
   0x2   :  { %s6771_s11 = smov 0   ;;  %s6773_s12 = smov 0  }
   0x3 LB: > { %s6788_s13 = sadd.s32 4294967295, %s6748_s12   ;;  %s5478_s14 = sadd.s32 4294967294, %s6748_s12   ;;  %s6748_s12 = sphi %s6773_s12, %s8780_s12   ;;  %s6744_s11 = sphi %s6771_s11, %s8779_s11   ;;  %s6740_s10 = sphi %s6769_s10, %s8778_s10   ;;  %s6736_s9 = sphi %s6767_s9, %s8777_s9  }
   0x4   : > { %s6792_s15 = sadd.s32 1, %s6748_s12   ;;  %s69_s16 = sadd.s32 1, %s6744_s11 }
   0x5   : > { %s66_s17 = ssub.s32 %s6748_s12, %s6792_s15  ;;  %p79_p0 = scmp.ne.s32.totalorder %s6744_s11, %s6740_s10 }
   0x6   : > { %p67_p1 = scmp.eq.s32.totalorder %s66_s17, 0  ;;  %p80_p2 = scmp.eq.s32.totalorder %s6788_s13, 1 }
   0x7   : > { %p85_p3 = scmp.ne.s32.totalorder %s6740_s10, %s6736_s9  ;;  %p86_p4 = scmp.eq.s32.totalorder %s5478_s14, 1 }
   0x8   : > { %s6803_s18 = scalar_select %p67_p1, %s6744_s11, %s69_s16  }
   0x9   : > { %p6805_p5 = por %p80_p2, %p79_p0  ;;  %p6809_p6 = por %p86_p4, %p85_p3 }
   0xa   : > { %p5481_p7 = scmp.ge.s32.totalorder %s6748_s12, 1  ;;  %p115_p8 = scmp.lt.s32.totalorder %s6748_s12, 3 }
   0xc   : > { %p116_p9 = pnand %p5481_p7, %p115_p8 }
   0xe   : > { %119 = sbr.rel (%p116_p9) target bundleno = 703 (0x2bf), region = 28 }
  0x15   : > { %v5485_v0 = vld [vmem:[%s8673_s1 + $0x2] sm:$0x3]  ;;  %vm1207_vm0 = vcmask 1041408   ;;  %v5632_v1 = vld [vmem:[%s8673_s1 + $0x8] sm:$0x3]  ;;  %vm143_vm1 = vcmask 27648  }
  0x16   : > { %6551 = vmatprep.subr.msk.bf16.mxu1 %vm1207_vm0, %v5485_v0  ;;  %6555 = vmatprep.subr.msk.bf16.mxu0 %vm1207_vm0, %v5632_v1  ;;  %v1209_v2 = vsel %vm1207_vm0, %v5485_v0, 0  ;;  %v6825_v3 = vsel %vm1207_vm0, %v5632_v1, 0  ;;  %vm146_vm2 = vcmask 24576   ;;  %p137_p10 = scmp.lt.s32.totalorder %s6788_s13, 1  ;;  %v6750_v4 = vmov 0   ;;  %s134_s29 = sand.u32 1, %s6740_s10  }
  0x17   : > { %8698 = vst [vmem:[#allocation6_spill] sm:$0xff] %v6825_v3  ;;  %5988 = vmatpush3.bf16.msra.mxu1 %v1209_v2  ;;  %6124 = vmatpush3.bf16.msra.mxu0 %v6825_v3  ;;  %144 = vst.msk [vmem:[#allocation2] sm:$0xf] %vm143_vm1, %v6750_v4  ;;  %v6889_v5 = vld [vmem:[%s8673_s1] sm:$0x3]  ;;  %vm1158_vm8 = vcmask 31744  }
  0x18   : > { %145 = vst.msk [vmem:[#allocation2 + $0x4] sm:$0xf] %vm143_vm1, %v6750_v4  ;;  %148 = vst.msk [vmem:[#allocation2 + $0xc] sm:$0xf] %vm143_vm1, %v6750_v4  ;;  %s138_s25 = scalar_select %p137_p10, %s6788_s13, 1  ;;  %6552 = vmatprep.subr.msk.bf16.mxu1 %vm1207_vm0, %v6889_v5  ;;  %vm1712_vm13 = vcmask 1042432  }
  0x19   : > { %147 = vst.msk [vmem:[#allocation2 + $0x8] sm:$0x1] %vm146_vm2, %v6750_v4  ;;  %150 = vst.msk [vmem:[#allocation2 + $0x14] sm:$0x1] %vm146_vm2, %v6750_v4  ;;  %v6894_v6 = vld [vmem:[%s8673_s1 + $0xa] sm:$0x3] }
  0x1a   : > { %149 = vst.msk [vmem:[#allocation2 + $0x10] sm:$0xf] %vm143_vm1, %v6750_v4  ;;  %151 = vst.msk [vmem:[#allocation2 + $0x18] sm:$0xf] %vm143_vm1, %v6750_v4  ;;  %vm721_vm3 = vsmask.f32 3328  ;;  %6557 = vmatprep.subr.msk.bf16.mxu0 %vm1207_vm0, %v6894_v6 }
  0x1b   : > { %152 = vst.msk [vmem:[#allocation2 + $0x1c] sm:$0xf] %vm143_vm1, %v6750_v4  ;;  %154 = vst.msk [vmem:[#allocation2 + $0x24] sm:$0xf] %vm143_vm1, %v6750_v4  ;;  %s5833_s30 = sshll.u32 %s138_s25, 7  ;;  %vm1713_vm14 = vcmask 1046532  }
  0x1c   : > { %153 = vst.msk [vmem:[#allocation2 + $0x20] sm:$0x1] %vm146_vm2, %v6750_v4  ;;  %156 = vst.msk [vmem:[#allocation2 + $0x2c] sm:$0x1] %vm146_vm2, %v6750_v4  ;;  %vm722_vm4 = vsmask.f32 7440  ;;  %s6903_s5 = scalar_lea.vmem %s8672_s0, %s5833_s30 }
  0x1d   : > { %155 = vst.msk [vmem:[#allocation2 + $0x28] sm:$0xf] %vm143_vm1, %v6750_v4  ;;  %157 = vst.msk [vmem:[#allocation2 + $0x30] sm:$0xf] %vm143_vm1, %v6750_v4  ;;  %vm231_vm5 = vsmask.f32 256 }
  0x1e   : > { %158 = vst.msk [vmem:[#allocation2 + $0x34] sm:$0xf] %vm143_vm1, %v6750_v4  ;;  %160 = vst.msk [vmem:[#allocation2 + $0x3c] sm:$0xf] %vm143_vm1, %v6750_v4  ;;  %vm232_vm6 = vsmask.f32 4368 }
  0x1f   : > { %159 = vst.msk [vmem:[#allocation2 + $0x38] sm:$0x1] %vm146_vm2, %v6750_v4  ;;  %162 = vst.msk [vmem:[#allocation2 + $0x44] sm:$0x1] %vm146_vm2, %v6750_v4  ;;  %v199_v7 = vld [vmem:[%s6903_s5] sm:$0xf] }
  0x20   : > { %161 = vst.msk [vmem:[#allocation2 + $0x40] sm:$0xf] %vm143_vm1, %v6750_v4  ;;  %163 = vst.msk [vmem:[#allocation2 + $0x48] sm:$0xf] %vm143_vm1, %v6750_v4  ;;  %v200_v8 = vld [vmem:[%s6903_s5 + $0x4] sm:$0xf] }
  0x21   : > { %164 = vst.msk [vmem:[#allocation2 + $0x4c] sm:$0xf] %vm143_vm1, %v6750_v4  ;;  %166 = vst.msk [vmem:[#allocation2 + $0x54] sm:$0xf] %vm143_vm1, %v6750_v4  ;;  %vm556_vm7 = vsmask.f32 7938 }
  0x22   : > { %165 = vst.msk [vmem:[#allocation2 + $0x50] sm:$0x1] %vm146_vm2, %v6750_v4  ;;  %168 = vst.msk [vmem:[#allocation2 + $0x5c] sm:$0x1] %vm146_vm2, %v6750_v4  ;;  %v235_v9 = vshrl.u32 %v199_v7, 16  ;;  %v238_v10 = vshll.u32 %v199_v7, 16 }
  0x23   : > { %167 = vst.msk [vmem:[#allocation2 + $0x58] sm:$0xf] %vm143_vm1, %v6750_v4  ;;  %169 = vst.msk [vmem:[#allocation2 + $0x60] sm:$0xf] %vm143_vm1, %v6750_v4  ;;  %v243_v11 = vshrl.u32 %v200_v8, 16  ;;  %v246_v12 = vshll.u32 %v200_v8, 16 }
  0x24   : > { %170 = vst.msk [vmem:[#allocation2 + $0x64] sm:$0xf] %vm143_vm1, %v6750_v4  ;;  %172 = vst.msk [vmem:[#allocation2 + $0x6c] sm:$0xf] %vm143_vm1, %v6750_v4  ;;  %v672_v13 = vld [vmem:[#allocation2] sm:$0xf] }
  0x25   : > { %171 = vst.msk [vmem:[#allocation2 + $0x68] sm:$0x1] %vm146_vm2, %v6750_v4  ;;  %174 = vst.msk [vmem:[#allocation2 + $0x74] sm:$0x1] %vm146_vm2, %v6750_v4  ;;  %v673_v14 = vld [vmem:[#allocation2 + $0x4] sm:$0xf] }
  0x26   : > { %173 = vst.msk [vmem:[#allocation2 + $0x70] sm:$0xf] %vm143_vm1, %v6750_v4  ;;  %175 = vst.msk [vmem:[#allocation2 + $0x78] sm:$0xf] %vm143_vm1, %v6750_v4  ;;  %v705_v15 = vld [vmem:[#allocation2 + $0x8] sm:$0x1] }
  0x27   : > { %176 = vst.msk [vmem:[#allocation2 + $0x7c] sm:$0xf] %vm143_vm1, %v6750_v4  ;;  %178 = vst.msk [vmem:[#allocation2 + $0x84] sm:$0xf] %vm143_vm1, %v6750_v4  ;;  %v725_v16 = vshrl.u32 %v672_v13, 16  ;;  %v728_v17 = vshll.u32 %v672_v13, 16 }
  0x28   : > { %177 = vst.msk [vmem:[#allocation2 + $0x80] sm:$0x1] %vm146_vm2, %v6750_v4  ;;  %180 = vst.msk [vmem:[#allocation2 + $0x8c] sm:$0x1] %vm146_vm2, %v6750_v4  ;;  %v734_v18 = vshll.u32 %v673_v14, 16  ;;  %v738_v19 = vshrl.u32 %v673_v14, 16 }
  0x29   : > { %179 = vst.msk [vmem:[#allocation2 + $0x88] sm:$0xf] %vm143_vm1, %v6750_v4  ;;  %181 = vst.msk [vmem:[#allocation2 + $0x90] sm:$0xf] %vm143_vm1, %v6750_v4  ;;  %v201_v20 = vld [vmem:[%s6903_s5 + $0x8] sm:$0xf] }
  0x2a   : > { %182 = vst.msk [vmem:[#allocation2 + $0x94] sm:$0xf] %vm143_vm1, %v6750_v4  ;;  %184 = vst.msk [vmem:[#allocation2 + $0x9c] sm:$0xf] %vm143_vm1, %v6750_v4  ;;  %v744_v21 = vshll.u32 %v705_v15, 16  ;;  %v237_v23 = vrot.slane %v235_v9, 7 }
  0x2b   : > { %183 = vst.msk [vmem:[#allocation2 + $0x98] sm:$0x1] %vm146_vm2, %v6750_v4  ;;  %186 = vst.msk [vmem:[#allocation2 + $0xa4] sm:$0x1] %vm146_vm2, %v6750_v4  ;;  %v245_v24 = vrot.slane %v243_v11, 7  ;;  %v727_v26 = vrot.slane %v725_v16, 4 }
  0x2c   : > { %185 = vst.msk [vmem:[#allocation2 + $0xa0] sm:$0xf] %vm143_vm1, %v6750_v4  ;;  %187 = vst.msk [vmem:[#allocation2 + $0xa8] sm:$0xf] %vm143_vm1, %v6750_v4  ;;  %v202_v25 = vld [vmem:[%s6903_s5 + $0xc] sm:$0xf]  ;;  %v240_v33 = vor.u32 %v238_v10, %v237_v23 }
  0x2d   : > { %188 = vst.msk [vmem:[#allocation2 + $0xac] sm:$0xf] %vm143_vm1, %v6750_v4  ;;  %190 = vst.msk [vmem:[#allocation2 + $0xb4] sm:$0xf] %vm143_vm1, %v6750_v4  ;;  %v730_v27 = vrot.slane %v728_v17, 5  ;;  %v736_v28 = vrot.slane %v734_v18, 5  ;;  %v248_v35 = vor.u32 %v246_v12, %v245_v24 }
  0x2e   : > { %189 = vst.msk [vmem:[#allocation2 + $0xb0] sm:$0x1] %vm146_vm2, %v6750_v4  ;;  %192 = vst.msk [vmem:[#allocation2 + $0xbc] sm:$0x1] %vm146_vm2, %v6750_v4  ;;  %v740_v29 = vrot.slane %v738_v19, 4  ;;  %v746_v32 = vrot.slane %v744_v21, 5 }
  0x2f   : > { %191 = vst.msk [vmem:[#allocation2 + $0xb8] sm:$0xf] %vm143_vm1, %v6750_v4  ;;  %193 = vst.msk [vmem:[#allocation2 + $0xc0] sm:$0xf] %vm143_vm1, %v6750_v4  ;;  %v558_v31 = vld [vmem:[#allocation2 + $0xc] sm:$0xf]  ;;  %v731_v38 = vor.u32 %v730_v27, %v727_v26 }
  0x30   : > { %194 = vst.msk [vmem:[#allocation2 + $0xc4] sm:$0xf] %vm143_vm1, %v6750_v4  ;;  %196 = vst.msk [vmem:[#allocation2 + $0xcc] sm:$0xf] %vm143_vm1, %v6750_v4  ;;  %v241_v34 = vrot.slane %v237_v23, 4  ;;  %v741_v39 = vor.u32 %v740_v29, %v736_v28  ;;  %v250_v40 = vrot.slane %v245_v24, 4 }
  0x31   : > { %195 = vst.msk [vmem:[#allocation2 + $0xc8] sm:$0x1] %vm146_vm2, %v6750_v4  ;;  %198 = vst.msk [vmem:[#allocation2 + $0xd4] sm:$0x1] %vm146_vm2, %v6750_v4  ;;  %v564_v37 = vld [vmem:[#allocation2 + $0x14] sm:$0x1] }
  0x32   : > { %197 = vst.msk [vmem:[#allocation2 + $0xd0] sm:$0xf] %vm143_vm1, %v6750_v4  ;;  %vm6910_vm9 = vmor %vm231_vm5, %vm232_vm6  ;;  %v252_v41 = vshrl.u32 %v201_v20, 16  ;;  %v203_v42 = vld [vmem:[%s6903_s5 + $0x10] sm:$0xf]  ;;  %v255_v46 = vshll.u32 %v201_v20, 16 }
  0x33   : > { %vm6917_vm10 = vmand %vm143_vm1, %vm556_vm7  ;;  %v249_v44 = vsel %vm6910_vm9, %v241_v34, %v248_v35  ;;  %v260_v47 = vshrl.u32 %v202_v25, 16  ;;  %v732_v48 = vrot.slane %v731_v38, 4  ;;  %v742_v49 = vrot.slane %v741_v39, 4  ;;  %v567_v52 = vld [vmem:[#allocation2 + $0x18] sm:$0xf]  ;;  %s5482_s30 = sshll.u32 %s134_s29, 1 }
  0x34   : > { %vm6923_vm11 = vmand %vm146_vm2, %vm231_vm5  ;;  %v559_v45 = vsel %vm6917_vm10, %v240_v33, %v558_v31  ;;  %561 = vst.msk [vmem:[#allocation2 + $0x10] sm:$0xf] %vm143_vm1, %v249_v44  ;;  %v254_v51 = vrot.slane %v252_v41, 7  ;;  %v263_v54 = vshll.u32 %v202_v25, 16  ;;  %v6942_v55 = vld [vmem:[%s6903_s5 + $0x14] sm:$0xf] }
  0x35   : > { %vm6930_vm12 = vmor %vm721_vm3, %vm722_vm4  ;;  %560 = vst [vmem:[#allocation2 + $0xc] sm:$0xf] %v559_v45  ;;  %v565_v50 = vsel %vm6923_vm11, %v250_v40, %v564_v37  ;;  %v262_v53 = vrot.slane %v260_v47, 7  ;;  %v269_v56 = vshrl.u32 %v203_v42, 16  ;;  %v272_v57 = vshll.u32 %v203_v42, 16  ;;  %s5830_s3 = sshll.u32 %s6788_s13, 5 }
  0x36   : > { %566 = vst [vmem:[#allocation2 + $0x14] sm:$0x1] %v565_v50  ;;  %v737_v58 = vsel %vm6930_vm12, %v732_v48, %v736_v28  ;;  %v747_v59 = vsel %vm6930_vm12, %v742_v49, %v746_v32  ;;  %v257_v60 = vor.u32 %v255_v46, %v254_v51  ;;  %v258_v61 = vrot.slane %v254_v51, 4  ;;  %v571_v62 = vld [vmem:[#allocation2 + $0x20] sm:$0x1]  ;;  %vm7065_vm15 = vmor %vm1712_vm13, %vm1713_vm14  ;;  %s136_s4 = scalar_lea.vmem [#allocation3], %s5482_s30  ;;  %s8630_s8 = scalar_lea.hbm %s8674_s2, %s5830_s3 }
  0x37   : > { %v6949_v63 = vld [vmem:[%s6903_s5 + $0x18] sm:$0xf]  ;;  %v5486_v0 = vcombine.low %v737_v58, %v747_v59  ;;  %v265_v1 = vor.u32 %v263_v54, %v262_v53  ;;  %v267_v2 = vrot.slane %v262_v53, 4  ;;  %v6951_v4 = vrot.slane %v269_v56, 7  ;;  %v574_v9 = vld [vmem:[#allocation2 + $0x24] sm:$0xf] }
  0x38   : > { %v568_v7 = vsel %vm6917_vm10, %v257_v60, %v567_v52  ;;  %v277_v8 = vshrl.u32 %v6942_v55, 16  ;;  %v286_v13 = vshrl.u32 %v6949_v63, 16  ;;  %v6965_v14 = vsel %vm1207_vm0, %v6889_v5, 0  ;;  %v6985_v26 = vld [vmem:[%s6903_s5 + $0x1c] sm:$0xf]  ;;  %s5406_s14 = scalar_lea.sflag [#allocation4], %s134_s29 }
  0x39   : > { %5989 = vmatprep.mubr.msk.bf16.mxu1 %vm1158_vm8, %v5486_v0  ;;  %v266_v10 = vsel %vm6910_vm9, %v258_v61, %v265_v1  ;;  %569 = vst [vmem:[#allocation2 + $0x18] sm:$0xf] %v568_v7  ;;  %v572_v11 = vsel %vm6923_vm11, %v267_v2, %v571_v62  ;;  %v274_v12 = vor.u32 %v272_v57, %v6951_v4  ;;  %v6970_v15 = vsel %vm1207_vm0, %v6894_v6, 0  ;;  %s6751_s16 = smov [#allocation3]  }
  0x3a   : > { %570 = vst.msk [vmem:[#allocation2 + $0x1c] sm:$0xf] %vm143_vm1, %v266_v10  ;;  %573 = vst [vmem:[#allocation2 + $0x20] sm:$0x1] %v572_v11  ;;  %v275_v16 = vrot.slane %v6951_v4, 4  ;;  %v280_v17 = vshll.u32 %v6942_v55, 16 }
  0x3b   : > { %v6976_v19 = vld [vmem:[#allocation2 + $0x10] sm:$0xf]  ;;  %v575_v5 = vsel %vm6917_vm10, %v274_v12, %v574_v9  ;;  %v6989_v31 = vrot.slane %v277_v8, 7  ;;  %v6991_v32 = vrot.slane %v286_v13, 7  ;;  %v289_v52 = vshll.u32 %v6949_v63, 16  ;;  %s6690_s17 = sshll.u32 %s6751_s16, 4  ;;  %s6691_s17 = int_to_ptr.vmem [resolvable:$false] %s6690_s17 }
  0x3c   : > { %v6974_v18 = vld [vmem:[#allocation2 + $0xc] sm:$0xf]  ;;  %v758_v6 = vshll.u32 %v6976_v19, 16  ;;  %v762_v25 = vshrl.u32 %v6976_v19, 16  ;;  %576 = vst [vmem:[#allocation2 + $0x24] sm:$0xf] %v575_v5 }
  0x3d   : > { %v2479_v20 = vld [vmem:[#allocation2 + $0xc] sm:$0xf]  ;;  %v706_v21 = vld [vmem:[#allocation2 + $0x14] sm:$0x1]  ;;  %v749_v23 = vshrl.u32 %v6974_v18, 16  ;;  %v752_v24 = vshll.u32 %v6974_v18, 16 }
  0x3e   : > { %v768_v27 = vshll.u32 %v706_v21, 16  ;;  %v6987_v28 = vld [vmem:[#allocation2 + $0x10] sm:$0xf]  ;;  %v2528_v29 = vshrl.u32 %v2479_v20, 16  ;;  %v760_v35 = vrot.slane %v758_v6, 5  ;;  %v764_v37 = vrot.slane %v762_v25, 4 }
  0x3f   : > { %v751_v33 = vrot.slane %v749_v23, 4  ;;  %v754_v34 = vrot.slane %v752_v24, 5  ;;  %v6993_v38 = vld [vmem:[#allocation2 + $0x14] sm:$0x1]  ;;  %v2531_v41 = vshll.u32 %v2479_v20, 16  ;;  %v2537_v42 = vshll.u32 %v6987_v28, 16 }
  0x40   : > { %v770_v39 = vrot.slane %v768_v27, 5  ;;  %v2530_v40 = vrot.slane %v2528_v29, 4  ;;  %v765_v45 = vor.u32 %v764_v37, %v760_v35  ;;  %v2541_v46 = vshrl.u32 %v6987_v28, 16  ;;  %v2482_v48 = vld [vmem:[#allocation2 + $0x18] sm:$0xf]  ;;  %s6692_s21 = scalar_lea.vmem %s6691_s17, 64 }
  0x41   : > { %v755_v44 = vor.u32 %v754_v34, %v751_v33  ;;  %v2547_v47 = vshll.u32 %v6993_v38, 16  ;;  %v2533_v49 = vrot.slane %v2531_v41, 5  ;;  %v2539_v50 = vrot.slane %v2537_v42, 5  ;;  %v6998_v51 = vld [vmem:[#allocation2 + $0x1c] sm:$0xf] }
  0x42   : > { %v294_v53 = vshrl.u32 %v6985_v26, 16  ;;  %v766_v56 = vrot.slane %v765_v45, 4  ;;  %v2543_v57 = vrot.slane %v2541_v46, 4  ;;  %v7002_v60 = vld [vmem:[#allocation2 + $0x20] sm:$0x1]  ;;  %v2552_v61 = vshrl.u32 %v2482_v48, 16 }
  0x43   : > { %v756_v54 = vrot.slane %v755_v44, 4  ;;  %v2549_v58 = vrot.slane %v2547_v47, 5  ;;  %v2534_v59 = vor.u32 %v2533_v49, %v2530_v40  ;;  %v2555_v62 = vshll.u32 %v2482_v48, 16  ;;  %v676_v13 = vld [vmem:[#allocation2 + $0x18] sm:$0xf] }
  0x44   : > { %v2561_v0 = vshll.u32 %v6998_v51, 16  ;;  %v771_v2 = vsel %vm6930_vm12, %v766_v56, %v770_v39  ;;  %v2544_v7 = vor.u32 %v2543_v57, %v2539_v50  ;;  %v2565_v8 = vshrl.u32 %v6998_v51, 16  ;;  %v677_v29 = vld [vmem:[#allocation2 + $0x1c] sm:$0xf]  ;;  %v707_v37 = vld [vmem:[#allocation2 + $0x20] sm:$0x1] }
  0x45   : > { %v761_v1 = vsel %vm6930_vm12, %v756_v54, %v760_v35  ;;  %v2535_v10 = vrot.slane %v2534_v59, 4  ;;  %v2554_v11 = vrot.slane %v2552_v61, 4  ;;  %v2557_v12 = vrot.slane %v2555_v62, 5  ;;  %v578_v56 = vld [vmem:[#allocation2 + $0x2c] sm:$0x1] }
  0x46   : > { %v5487_v9 = vcombine.low %v761_v1, %v771_v2  ;;  %v2545_v20 = vrot.slane %v2544_v7, 4  ;;  %v2563_v5 = vrot.slane %v2561_v0, 5  ;;  %v2567_v21 = vrot.slane %v2565_v8, 4  ;;  %v678_v57 = vld [vmem:[#allocation2 + $0x24] sm:$0xf] }
  0x47   : > { %v2571_v23 = vshll.u32 %v7002_v60, 16  ;;  %v2540_v24 = vsel %vm6930_vm12, %v2535_v10, %v2539_v50  ;;  %v2558_v6 = vor.u32 %v2557_v12, %v2554_v11  ;;  %v3278_v25 = vrot.slane %v6998_v51, 5  ;;  %v2485_v0 = vld [vmem:[#allocation2 + $0x24] sm:$0xf]  ;;  %v623_v51 = vld [vmem:[#allocation2 + $0x78] sm:$0xf] }
  0x48   : > { %5990 = vmatmul.mubr.msk.bf16.vlgmr.msra.gmra.mrb[0].mxu1 %vm1158_vm8, %v5487_v9  ;;  %v3281_v27 = vrot.slane %v7002_v60, 5  ;;  %v2550_v33 = vsel %vm6930_vm12, %v2545_v20, %v2549_v58  ;;  %v2568_v34 = vor.u32 %v2567_v21, %v2563_v5  ;;  %v773_v39 = vshrl.u32 %v676_v13, 16 }
  0x49   : > { %6022 = vmatpush3.bf16.msra.mxu1 %v6965_v14  ;;  %v2573_v35 = vrot.slane %v2571_v23, 5  ;;  %v5633_v40 = vcombine.low %v2540_v24, %v2550_v33  ;;  %v2559_v41 = vrot.slane %v2558_v6, 4  ;;  %v7021_v42 = vrot.slane %v3278_v25, 4  ;;  %v207_v24 = vld [vmem:[%s6903_s5 + $0x20] sm:$0xf] }
  0x4a   : > { %v776_v44 = vshll.u32 %v676_v13, 16  ;;  %v2569_v45 = vrot.slane %v2568_v34, 4  ;;  %v775_v46 = vrot.slane %v773_v39, 4  ;;  %v782_v47 = vshll.u32 %v677_v29, 16  ;;  %v581_v13 = vld [vmem:[#allocation2 + $0x30] sm:$0xf] }
  0x4b   : > { %v786_v48 = vshrl.u32 %v677_v29, 16  ;;  %6125 = vmatprep.mubr.msk.bf16.mxu0 %vm1158_vm8, %v5633_v40  ;;  %v2564_v14 = vsel %vm6930_vm12, %v2559_v41, %v2563_v5  ;;  %v792_v50 = vshll.u32 %v707_v37, 16  ;;  %v282_v54 = vor.u32 %v280_v17, %v6989_v31  ;;  %v585_v37 = vld [vmem:[#allocation2 + $0x38] sm:$0x1] }
  0x4c   : > { %v778_v49 = vrot.slane %v776_v44, 5  ;;  %v2574_v58 = vsel %vm6930_vm12, %v2569_v45, %v2573_v35  ;;  %v784_v59 = vrot.slane %v782_v47, 5  ;;  %v284_v62 = vrot.slane %v6989_v31, 4  ;;  %v7042_v31 = vld [vmem:[%s8673_s1 + $0xc] sm:$0x3] }
  0x4d   : > { %v788_v61 = vrot.slane %v786_v48, 4  ;;  %v5634_v1 = vcombine.low %v2564_v14, %v2574_v58  ;;  %v794_v7 = vrot.slane %v792_v50, 5  ;;  %v283_v8 = vsel %vm6910_vm9, %v275_v16, %v282_v54  ;;  %v208_v35 = vld [vmem:[%s6903_s5 + $0x24] sm:$0xf] }
  0x4e   : > { %v779_v2 = vor.u32 %v778_v49, %v775_v46  ;;  %577 = vst.msk [vmem:[#allocation2 + $0x28] sm:$0xf] %vm143_vm1, %v283_v8  ;;  %v579_v17 = vsel %vm6923_vm11, %v284_v62, %v578_v56  ;;  %v797_v9 = vshrl.u32 %v678_v57, 16  ;;  %v800_v10 = vshll.u32 %v678_v57, 16 }
  0x4f   : > { %v789_v55 = vor.u32 %v788_v61, %v784_v59  ;;  %6126 = vmatmul.mubr.msk.bf16.vlgmr.msra.gmra.mrb[0].mxu0 %vm1158_vm8, %v5634_v1  ;;  %580 = vst [vmem:[#allocation2 + $0x2c] sm:$0x1] %v579_v17  ;;  %v2576_v16 = vshrl.u32 %v2485_v0, 16  ;;  %v2579_v11 = vshll.u32 %v2485_v0, 16  ;;  %v291_v12 = vor.u32 %v289_v52, %v6991_v32 }
  0x50   : > { %v780_v4 = vrot.slane %v779_v2, 4  ;;  %6158 = vmatpush3.bf16.msra.mxu0 %v6970_v15  ;;  %v799_v5 = vrot.slane %v797_v9, 4  ;;  %v802_v21 = vrot.slane %v800_v10, 5  ;;  %v292_v23 = vrot.slane %v6991_v32, 4 }
  0x51   : > { %v790_v20 = vrot.slane %v789_v55, 4  ;;  %v2578_v29 = vrot.slane %v2576_v16, 4  ;;  %v2581_v33 = vrot.slane %v2579_v11, 5  ;;  %v296_v34 = vrot.slane %v294_v53, 7  ;;  %6558 = vmatprep.subr.msk.bf16.mxu0 %vm1207_vm0, %v7042_v31 }
  0x52   : > { %v785_v6 = vsel %vm6930_vm12, %v780_v4, %v784_v59  ;;  %v803_v15 = vor.u32 %v802_v21, %v799_v5  ;;  %v297_v52 = vshll.u32 %v6985_v26, 16  ;;  %v582_v32 = vsel %vm6917_vm10, %v291_v12, %v581_v13 }
  0x53   : > { %v795_v63 = vsel %vm6930_vm12, %v790_v20, %v794_v7  ;;  %v2582_v40 = vor.u32 %v2581_v33, %v2578_v29  ;;  %v301_v41 = vrot.slane %v296_v34, 4  ;;  %583 = vst [vmem:[#allocation2 + $0x30] sm:$0xf] %v582_v32  ;;  %v303_v44 = vshrl.u32 %v207_v24, 16 }
  0x54   : > { %v5488_v53 = vcombine.low %v785_v6, %v795_v63  ;;  %v804_v45 = vrot.slane %v803_v15, 4  ;;  %v299_v46 = vor.u32 %v297_v52, %v296_v34  ;;  %v306_v47 = vshll.u32 %v207_v24, 16 }
  0x55   : > { %v311_v48 = vshrl.u32 %v208_v35, 16  ;;  %v679_v26 = vld [vmem:[#allocation2 + $0x28] sm:$0xf]  ;;  %v2583_v49 = vrot.slane %v2582_v40, 4  ;;  %v586_v50 = vsel %vm6923_vm11, %v301_v41, %v585_v37  ;;  %v305_v54 = vrot.slane %v303_v44, 7 }
  0x56   : > { %5993 = vmatprep.mubr.msk.bf16.mxu1 %vm1158_vm8, %v5488_v53  ;;  %v7070_v14 = vld [vmem:[#allocation2 + $0x28] sm:$0xf]  ;;  %v7079_v56 = vsel %vm7065_vm15, %v7021_v42, %v3281_v27  ;;  %v708_v57 = vld [vmem:[#allocation2 + $0x2c] sm:$0x1]  ;;  %v806_v58 = vshll.u32 %v679_v26, 16  ;;  %v810_v59 = vshrl.u32 %v679_v26, 16  ;;  %v300_v62 = vsel %vm6910_vm9, %v292_v23, %v299_v46 }
  0x57   : > { %v7081_v61 = vld [vmem:[#allocation2 + $0x2c] sm:$0x1]  ;;  %587 = vst [vmem:[#allocation2 + $0x38] sm:$0x1] %v586_v50  ;;  %v816_v0 = vshll.u32 %v708_v57, 16  ;;  %v2585_v1 = vshll.u32 %v7070_v14, 16  ;;  %v308_v7 = vor.u32 %v306_v47, %v305_v54 }
  0x58   : > { %v2589_v2 = vshrl.u32 %v7070_v14, 16  ;;  %v2595_v60 = vshll.u32 %v7081_v61, 16  ;;  %584 = vst.msk [vmem:[#allocation2 + $0x34] sm:$0xf] %vm143_vm1, %v300_v62  ;;  %v808_v27 = vrot.slane %v806_v58, 5  ;;  %v812_v42 = vrot.slane %v810_v59, 4 }
  0x59   : > { %v309_v8 = vrot.slane %v305_v54, 4  ;;  %v818_v55 = vrot.slane %v816_v0, 5  ;;  %v2587_v17 = vrot.slane %v2585_v1, 5  ;;  %v313_v13 = vrot.slane %v311_v48, 7  ;;  %v588_v50 = vld [vmem:[#allocation2 + $0x3c] sm:$0xf] }
  0x5a   : > { %v2591_v9 = vrot.slane %v2589_v2, 4  ;;  %v2597_v10 = vrot.slane %v2595_v60, 5  ;;  %v809_v4 = vsel %vm6930_vm12, %v804_v45, %v808_v27  ;;  %v813_v16 = vor.u32 %v812_v42, %v808_v27  ;;  %v2488_v11 = vld [vmem:[#allocation2 + $0x30] sm:$0xf]  ;;  %v592_v62 = vld [vmem:[#allocation2 + $0x44] sm:$0x1] }
  0x5b   : > { %v680_v12 = vld [vmem:[#allocation2 + $0x30] sm:$0xf]  ;;  %v314_v20 = vshll.u32 %v208_v35, 16  ;;  %v2588_v5 = vsel %vm6930_vm12, %v2583_v49, %v2587_v17  ;;  %v2600_v23 = vshrl.u32 %v2488_v11, 16  ;;  %v2603_v24 = vshll.u32 %v2488_v11, 16 }
  0x5c   : > { %v2592_v21 = vor.u32 %v2591_v9, %v2587_v17  ;;  %v814_v6 = vrot.slane %v813_v16, 4  ;;  %v821_v29 = vshrl.u32 %v680_v12, 16  ;;  %v824_v33 = vshll.u32 %v680_v12, 16  ;;  %v209_v27 = vld [vmem:[%s6903_s5 + $0x28] sm:$0xf] }
  0x5d   : > { %v316_v34 = vor.u32 %v314_v20, %v313_v13  ;;  %v2602_v52 = vrot.slane %v2600_v23, 4  ;;  %v2605_v32 = vrot.slane %v2603_v24, 5  ;;  %v318_v37 = vrot.slane %v313_v13, 4  ;;  %v7114_v9 = vld [vmem:[%s6903_s5 + $0x2c] sm:$0xf] }
  0x5e   : > { %v2593_v63 = vrot.slane %v2592_v21, 4  ;;  %v7093_v15 = vld [vmem:[#allocation2 + $0x38] sm:$0x1]  ;;  %v819_v53 = vsel %vm6930_vm12, %v814_v6, %v818_v55  ;;  %v823_v44 = vrot.slane %v821_v29, 4  ;;  %v3271_v54 = vrot.slane %v6987_v28, 5 }
  0x5f   : > { %v7097_v35 = vld [vmem:[#allocation2 + $0x34] sm:$0xf]  ;;  %v2619_v40 = vshll.u32 %v7093_v15, 16  ;;  %v317_v45 = vsel %vm6910_vm9, %v309_v8, %v316_v34  ;;  %v5489_v46 = vcombine.low %v809_v4, %v819_v53  ;;  %v2606_v48 = vor.u32 %v2605_v32, %v2602_v52  ;;  %v709_v49 = vld [vmem:[#allocation2 + $0x38] sm:$0x1] }
  0x60   : > { %v681_v41 = vld [vmem:[#allocation2 + $0x34] sm:$0xf]  ;;  %v2598_v47 = vsel %vm6930_vm12, %v2593_v63, %v2597_v10  ;;  %v2609_v26 = vshll.u32 %v7097_v35, 16  ;;  %591 = vst.msk [vmem:[#allocation2 + $0x40] sm:$0xf] %vm143_vm1, %v317_v45  ;;  %v2613_v58 = vshrl.u32 %v7097_v35, 16  ;;  %v589_v17 = vsel %vm6917_vm10, %v308_v7, %v588_v50 }
  0x61   : > { %v5635_v57 = vcombine.low %v2588_v5, %v2598_v47  ;;  %v826_v59 = vrot.slane %v824_v33, 5  ;;  %5994 = vmatmul.mubr.msk.bf16.gmra.mrb[4].mxu1 %vm1158_vm8, %v5489_v46  ;;  %v2607_v0 = vrot.slane %v2606_v48, 4  ;;  %v830_v2 = vshll.u32 %v681_v41, 16  ;;  %590 = vst [vmem:[#allocation2 + $0x3c] sm:$0xf] %v589_v17 }
  0x62   : > { %v2611_v1 = vrot.slane %v2609_v26, 5  ;;  %v834_v60 = vshrl.u32 %v681_v41, 16  ;;  %v2615_v42 = vrot.slane %v2613_v58, 4  ;;  %v840_v55 = vshll.u32 %v709_v49, 16  ;;  %v595_v41 = vld [vmem:[#allocation2 + $0x48] sm:$0xf] }
  0x63   : > { %6129 = vmatprep.mubr.msk.bf16.mxu0 %vm1158_vm8, %v5635_v57  ;;  %v827_v8 = vor.u32 %v826_v59, %v823_v44  ;;  %v2621_v10 = vrot.slane %v2619_v40, 5  ;;  %v832_v4 = vrot.slane %v830_v2, 5  ;;  %v593_v11 = vsel %vm6923_vm11, %v318_v37, %v592_v62  ;;  %v5566_v57 = vld [vmem:[%s8673_s1 + $0x4] sm:$0x3]  ;;  %v7756_v3 = vld [vmem:[#allocation2 + $0x38] sm:$0x1] }
  0x64   : > { %v836_v16 = vrot.slane %v834_v60, 4  ;;  %v2616_v12 = vor.u32 %v2615_v42, %v2611_v1  ;;  %v842_v20 = vrot.slane %v840_v55, 5  ;;  %594 = vst [vmem:[#allocation2 + $0x44] sm:$0x1] %v593_v11  ;;  %v320_v5 = vshrl.u32 %v209_v27, 16  ;;  %6553 = vmatprep.subr.msk.bf16.mxu1 %vm1207_vm0, %v5566_v57  ;;  %8716 = vst [vmem:[#allocation13_spill] sm:$0xff] %v7756_v3 }
  0x65   : > { %v828_v13 = vrot.slane %v827_v8, 4  ;;  %v323_v23 = vshll.u32 %v209_v27, 16  ;;  %v328_v24 = vshrl.u32 %v7114_v9, 16  ;;  %v331_v7 = vshll.u32 %v7114_v9, 16  ;;  %v211_v11 = vld [vmem:[%s6903_s5 + $0x30] sm:$0xf] }
  0x66   : > { %v837_v21 = vor.u32 %v836_v16, %v832_v4  ;;  %v2612_v6 = vsel %vm6930_vm12, %v2607_v0, %v2611_v1  ;;  %v2617_v29 = vrot.slane %v2616_v12, 4  ;;  %v7126_v52 = vrot.slane %v320_v5, 7 }
  0x67   : > { %v833_v33 = vsel %vm6930_vm12, %v828_v13, %v832_v4  ;;  %v683_v34 = vld [vmem:[#allocation2 + $0x40] sm:$0xf]  ;;  %v5519_v17 = vcombine.low %v6974_v18, %v6976_v19  ;;  %vm5403_vm2 = vcmask 58368  }
  0x68   : > { %v7124_v63 = vld [vmem:[#allocation2 + $0x40] sm:$0xf]  ;;  %v838_v32 = vrot.slane %v837_v21, 4  ;;  %v854_v37 = vshll.u32 %v683_v34, 16  ;;  %v858_v53 = vshrl.u32 %v683_v34, 16  ;;  %v2622_v44 = vsel %vm6930_vm12, %v2617_v29, %v2621_v10 }
  0x69   : > { %v2633_v40 = vshll.u32 %v7124_v63, 16  ;;  %v2637_v45 = vshrl.u32 %v7124_v63, 16  ;;  %v325_v46 = vor.u32 %v323_v23, %v7126_v52  ;;  %v326_v47 = vrot.slane %v7126_v52, 4  ;;  %v682_v59 = vld [vmem:[#allocation2 + $0x3c] sm:$0xf] }
  0x6a   : > { %v5636_v48 = vcombine.low %v2612_v6, %v2622_v44  ;;  %v843_v26 = vsel %vm6930_vm12, %v838_v32, %v842_v20  ;;  %v856_v49 = vrot.slane %v854_v37, 5  ;;  %v860_v50 = vrot.slane %v858_v53, 4  ;;  %v2491_v62 = vld [vmem:[#allocation2 + $0x3c] sm:$0xf]  ;;  %v212_v21 = vld [vmem:[%s6903_s5 + $0x34] sm:$0xf] }
  0x6b   : > { %v5490_v58 = vcombine.low %v833_v33, %v843_v26  ;;  %v2635_v0 = vrot.slane %v2633_v40, 5  ;;  %v2639_v1 = vrot.slane %v2637_v45, 4  ;;  %v596_v2 = vsel %vm6917_vm10, %v325_v46, %v595_v41  ;;  %v710_v60 = vld [vmem:[#allocation2 + $0x44] sm:$0x1]  ;;  %v599_v34 = vld [vmem:[#allocation2 + $0x50] sm:$0x1] }
  0x6c   : > { %6130 = vmatmul.mubr.msk.bf16.gmra.mrb[4].mxu0 %vm1158_vm8, %v5636_v48  ;;  %v845_v27 = vshrl.u32 %v682_v59, 16  ;;  %v848_v42 = vshll.u32 %v682_v59, 16  ;;  %v861_v8 = vor.u32 %v860_v50, %v856_v49  ;;  %v7143_v55 = vld [vmem:[#allocation2 + $0x44] sm:$0x1]  ;;  %597 = vst [vmem:[#allocation2 + $0x48] sm:$0xf] %v596_v2 }
  0x6d   : > { %5997 = vmatprep.mubr.msk.bf16.mxu1 %vm1158_vm8, %v5490_v58  ;;  %v864_v9 = vshll.u32 %v710_v60, 16  ;;  %v2624_v10 = vshrl.u32 %v2491_v62, 16  ;;  %v2627_v4 = vshll.u32 %v2491_v62, 16  ;;  %v2640_v16 = vor.u32 %v2639_v1, %v2635_v0  ;;  %v602_v60 = vld [vmem:[#allocation2 + $0x54] sm:$0xf] }
  0x6e   : > { %v847_v12 = vrot.slane %v845_v27, 4  ;;  %v850_v13 = vrot.slane %v848_v42, 5  ;;  %v862_v20 = vrot.slane %v861_v8, 4  ;;  %v2643_v5 = vshll.u32 %v7143_v55, 16  ;;  %v213_v27 = vld [vmem:[%s6903_s5 + $0x38] sm:$0xf] }
  0x6f   : > { %v866_v23 = vrot.slane %v864_v9, 5  ;;  %v2626_v6 = vrot.slane %v2624_v10, 4  ;;  %v2629_v29 = vrot.slane %v2627_v4, 5  ;;  %v2641_v33 = vrot.slane %v2640_v16, 4 }
  0x70   : > { %v851_v52 = vor.u32 %v850_v13, %v847_v12  ;;  %v2645_v32 = vrot.slane %v2643_v5, 5  ;;  %v330_v37 = vrot.slane %v328_v24, 7  ;;  %v337_v53 = vshrl.u32 %v211_v11, 16  ;;  %v606_v12 = vld [vmem:[#allocation2 + $0x5c] sm:$0x1] }
  0x71   : > { %v2630_v40 = vor.u32 %v2629_v29, %v2626_v6  ;;  %v340_v41 = vshll.u32 %v211_v11, 16  ;;  %v345_v44 = vshrl.u32 %v212_v21, 16  ;;  %v867_v46 = vsel %vm6930_vm12, %v862_v20, %v866_v23  ;;  %v7167_v13 = vld [vmem:[%s6903_s5 + $0x40] sm:$0xf] }
  0x72   : > { %v852_v45 = vrot.slane %v851_v52, 4  ;;  %v333_v48 = vor.u32 %v331_v7, %v330_v37  ;;  %v335_v26 = vrot.slane %v330_v37, 4  ;;  %v2646_v57 = vsel %vm6930_vm12, %v2641_v33, %v2645_v32 }
  0x73   : > { %v2631_v50 = vrot.slane %v2630_v40, 4  ;;  %v2494_v58 = vld [vmem:[#allocation2 + $0x48] sm:$0xf]  ;;  %v339_v62 = vrot.slane %v337_v53, 7  ;;  %v347_v6 = vrot.slane %v345_v44, 7  ;;  %v348_v29 = vshll.u32 %v212_v21, 16 }
  0x74   : > { %v684_v59 = vld [vmem:[#allocation2 + $0x48] sm:$0xf]  ;;  %v857_v24 = vsel %vm6930_vm12, %v852_v45, %v856_v49  ;;  %v334_v1 = vsel %vm6910_vm9, %v326_v47, %v333_v48  ;;  %v600_v2 = vsel %vm6923_vm11, %v335_v26, %v599_v34  ;;  %v2648_v7 = vshrl.u32 %v2494_v58, 16  ;;  %v214_v49 = vld [vmem:[%s6903_s5 + $0x3c] sm:$0xf] }
  0x75   : > { %v5491_v42 = vcombine.low %v857_v24, %v867_v46  ;;  %v2636_v8 = vsel %vm6930_vm12, %v2631_v50, %v2635_v0  ;;  %598 = vst.msk [vmem:[#allocation2 + $0x4c] sm:$0xf] %vm143_vm1, %v334_v1  ;;  %601 = vst [vmem:[#allocation2 + $0x50] sm:$0x1] %v600_v2  ;;  %v2651_v9 = vshll.u32 %v2494_v58, 16  ;;  %v869_v10 = vshrl.u32 %v684_v59, 16 }
  0x76   : > { %v5637_v4 = vcombine.low %v2636_v8, %v2646_v57  ;;  %v2650_v16 = vrot.slane %v2648_v7, 4  ;;  %v872_v47 = vshll.u32 %v684_v59, 16  ;;  %v342_v11 = vor.u32 %v340_v41, %v339_v62 }
  0x77   : > { %5998 = vmatmul.mubr.msk.bf16.gmra.mrb[8].mxu1 %vm1158_vm8, %v5491_v42  ;;  %v2653_v20 = vrot.slane %v2651_v9, 5  ;;  %v871_v5 = vrot.slane %v869_v10, 4  ;;  %v343_v23 = vrot.slane %v339_v62, 4  ;;  %v354_v34 = vshrl.u32 %v213_v27, 16 }
  0x78   : > { %6133 = vmatprep.mubr.msk.bf16.mxu0 %vm1158_vm8, %v5637_v4  ;;  %v874_v0 = vrot.slane %v872_v47, 5  ;;  %v603_v33 = vsel %vm6917_vm10, %v342_v11, %v602_v60  ;;  %v352_v32 = vrot.slane %v347_v6, 4  ;;  %v357_v37 = vshll.u32 %v213_v27, 16  ;;  %v609_v47 = vld [vmem:[#allocation2 + $0x60] sm:$0xf] }
  0x79   : > { %v2654_v52 = vor.u32 %v2653_v20, %v2650_v16  ;;  %604 = vst [vmem:[#allocation2 + $0x54] sm:$0xf] %v603_v33  ;;  %v362_v53 = vshrl.u32 %v214_v49, 16  ;;  %v350_v41 = vor.u32 %v348_v29, %v347_v6  ;;  %v356_v45 = vrot.slane %v354_v34, 7 }
  0x7a   : > { %v875_v40 = vor.u32 %v874_v0, %v871_v5  ;;  %v365_v46 = vshll.u32 %v214_v49, 16  ;;  %v607_v44 = vsel %vm6923_vm11, %v352_v32, %v606_v12  ;;  %v371_v21 = vshrl.u32 %v7167_v13, 16 }
  0x7b   : > { %v2655_v48 = vrot.slane %v2654_v52, 4  ;;  %v364_v26 = vrot.slane %v362_v53, 7  ;;  %v351_v59 = vsel %vm6910_vm9, %v343_v23, %v350_v41  ;;  %608 = vst [vmem:[#allocation2 + $0x5c] sm:$0x1] %v607_v44  ;;  %v359_v62 = vor.u32 %v357_v37, %v356_v45  ;;  %v613_v52 = vld [vmem:[#allocation2 + $0x68] sm:$0x1] }
  0x7c   : > { %v7176_v50 = vld [vmem:[#allocation2 + $0x4c] sm:$0xf]  ;;  %v7178_v57 = vld [vmem:[#allocation2 + $0x50] sm:$0x1]  ;;  %v876_v60 = vrot.slane %v875_v40, 4  ;;  %v360_v9 = vrot.slane %v356_v45, 4 }
  0x7d   : > { %v685_v58 = vld [vmem:[#allocation2 + $0x4c] sm:$0xf]  ;;  %v2657_v24 = vshll.u32 %v7176_v50, 16  ;;  %v2661_v1 = vshrl.u32 %v7176_v50, 16  ;;  %v2667_v2 = vshll.u32 %v7178_v57, 16  ;;  %v367_v16 = vor.u32 %v365_v46, %v364_v26 }
  0x7e   : > { %v711_v7 = vld [vmem:[#allocation2 + $0x50] sm:$0x1]  ;;  %605 = vst.msk [vmem:[#allocation2 + $0x58] sm:$0xf] %vm143_vm1, %v351_v59  ;;  %v878_v27 = vshll.u32 %v685_v58, 16  ;;  %v882_v42 = vshrl.u32 %v685_v58, 16 }
  0x7f   : > { %v888_v8 = vshll.u32 %v711_v7, 16  ;;  %v2659_v10 = vrot.slane %v2657_v24, 5  ;;  %v2663_v49 = vrot.slane %v2661_v1, 4  ;;  %v2669_v4 = vrot.slane %v2667_v2, 5 }
  0x80   : > { %v880_v11 = vrot.slane %v878_v27, 5  ;;  %v884_v12 = vrot.slane %v882_v42, 4  ;;  %v686_v5 = vld [vmem:[#allocation2 + $0x54] sm:$0xf]  ;;  %v369_v23 = vrot.slane %v364_v26, 4  ;;  %v368_v26 = vsel %vm6910_vm9, %v360_v9, %v367_v16 }
  0x81   : > { %v890_v20 = vrot.slane %v888_v8, 5  ;;  %v2660_v6 = vsel %vm6930_vm12, %v2655_v48, %v2659_v10  ;;  %v2664_v0 = vor.u32 %v2663_v49, %v2659_v10  ;;  %v893_v29 = vshrl.u32 %v686_v5, 16  ;;  %v2497_v34 = vld [vmem:[#allocation2 + $0x54] sm:$0xf]  ;;  %612 = vst.msk [vmem:[#allocation2 + $0x64] sm:$0xf] %vm143_vm1, %v368_v26 }
  0x82   : > { %v896_v33 = vshll.u32 %v686_v5, 16  ;;  %v881_v32 = vsel %vm6930_vm12, %v876_v60, %v880_v11  ;;  %v885_v37 = vor.u32 %v884_v12, %v880_v11  ;;  %v2672_v53 = vshrl.u32 %v2497_v34, 16  ;;  %v712_v45 = vld [vmem:[#allocation2 + $0x5c] sm:$0x1] }
  0x83   : > { %v2675_v40 = vshll.u32 %v2497_v34, 16  ;;  %v2665_v41 = vrot.slane %v2664_v0, 4  ;;  %v895_v46 = vrot.slane %v893_v29, 4  ;;  %v912_v59 = vshll.u32 %v712_v45, 16  ;;  %v7201_v8 = vld [vmem:[#allocation2 + $0x5c] sm:$0x1] }
  0x84   : > { %v898_v44 = vrot.slane %v896_v33, 5  ;;  %v886_v58 = vrot.slane %v885_v37, 4  ;;  %v610_v1 = vsel %vm6917_vm10, %v359_v62, %v609_v47  ;;  %v614_v2 = vsel %vm6923_vm11, %v369_v23, %v613_v52 }
  0x85   : > { %v687_v48 = vld [vmem:[#allocation2 + $0x58] sm:$0xf]  ;;  %v2670_v7 = vsel %vm6930_vm12, %v2665_v41, %v2669_v4  ;;  %611 = vst [vmem:[#allocation2 + $0x60] sm:$0xf] %v610_v1  ;;  %615 = vst [vmem:[#allocation2 + $0x68] sm:$0x1] %v614_v2 }
  0x86   : > { %v7192_v24 = vld [vmem:[#allocation2 + $0x58] sm:$0xf]  ;;  %v899_v60 = vor.u32 %v898_v44, %v895_v46  ;;  %v902_v27 = vshll.u32 %v687_v48, 16  ;;  %v906_v42 = vshrl.u32 %v687_v48, 16  ;;  %v3274_v9 = vrot.slane %v6993_v38, 5 }
  0x87   : > { %v5638_v10 = vcombine.low %v2660_v6, %v2670_v7  ;;  %v891_v62 = vsel %vm6930_vm12, %v886_v58, %v890_v20  ;;  %v2674_v49 = vrot.slane %v2672_v53, 4  ;;  %v2677_v4 = vrot.slane %v2675_v40, 5 }
  0x88   : > { %v5492_v16 = vcombine.low %v881_v32, %v891_v62  ;;  %v900_v47 = vrot.slane %v899_v60, 4  ;;  %v904_v11 = vrot.slane %v902_v27, 5  ;;  %v908_v12 = vrot.slane %v906_v42, 4  ;;  %v7218_v41 = vld [vmem:[#allocation2 + $0x64] sm:$0xf] }
  0x89   : > { %6134 = vmatmul.mubr.msk.bf16.gmra.mrb[8].mxu0 %vm1158_vm8, %v5638_v10  ;;  %v2681_v5 = vshll.u32 %v7192_v24, 16  ;;  %v2685_v23 = vshrl.u32 %v7192_v24, 16  ;;  %v2691_v0 = vshll.u32 %v7201_v8, 16  ;;  %v914_v29 = vrot.slane %v912_v59, 5  ;;  %v689_v45 = vld [vmem:[#allocation2 + $0x64] sm:$0xf] }
  0x8a   : > { %6001 = vmatprep.mubr.msk.bf16.mxu1 %vm1158_vm8, %v5492_v16  ;;  %v909_v6 = vor.u32 %v908_v12, %v904_v11  ;;  %v7213_v20 = vrot.slane %v371_v21, 7  ;;  %v374_v33 = vshll.u32 %v7167_v13, 16  ;;  %v2678_v34 = vor.u32 %v2677_v4, %v2674_v49  ;;  %v216_v49 = vld [vmem:[%s6903_s5 + $0x44] sm:$0xf] }
  0x8b   : > { %v2683_v52 = vrot.slane %v2681_v5, 5  ;;  %v2687_v32 = vrot.slane %v2685_v23, 4  ;;  %v2693_v37 = vrot.slane %v2691_v0, 5  ;;  %v905_v53 = vsel %vm6930_vm12, %v900_v47, %v904_v11  ;;  %v616_v5 = vld [vmem:[#allocation2 + $0x6c] sm:$0xf] }
  0x8c   : > { %v910_v40 = vrot.slane %v909_v6, 4  ;;  %v377_v46 = vrot.slane %v7213_v20, 4  ;;  %v2679_v44 = vrot.slane %v2678_v34, 4  ;;  %v2500_v21 = vld [vmem:[#allocation2 + $0x60] sm:$0xf]  ;;  %v2705_v13 = vshll.u32 %v7218_v41, 16 }
  0x8d   : > { %v2688_v26 = vor.u32 %v2687_v32, %v2683_v52  ;;  %v7221_v58 = vld [vmem:[#allocation2 + $0x68] sm:$0x1]  ;;  %v376_v48 = vor.u32 %v374_v33, %v7213_v20  ;;  %v2696_v1 = vshrl.u32 %v2500_v21, 16  ;;  %v2699_v2 = vshll.u32 %v2500_v21, 16  ;;  %v688_v60 = vld [vmem:[#allocation2 + $0x60] sm:$0xf] }
  0x8e   : > { %v915_v59 = vsel %vm6930_vm12, %v910_v40, %v914_v29  ;;  %v2709_v7 = vshrl.u32 %v7218_v41, 16  ;;  %v2684_v42 = vsel %vm6930_vm12, %v2679_v44, %v2683_v52  ;;  %v2707_v62 = vrot.slane %v2705_v13, 5  ;;  %v713_v4 = vld [vmem:[#allocation2 + $0x68] sm:$0x1]  ;;  %v3206_v13 = vld [vmem:[#allocation2 + $0x18] sm:$0xe] }
  0x8f   : > { %v5493_v27 = vcombine.low %v905_v53, %v915_v59  ;;  %v2689_v10 = vrot.slane %v2688_v26, 4  ;;  %v2698_v16 = vrot.slane %v2696_v1, 4  ;;  %v2701_v47 = vrot.slane %v2699_v2, 5  ;;  %v3205_v53 = vld [vmem:[#allocation2 + $0xc] sm:$0xe] }
  0x90   : > { %v2711_v11 = vrot.slane %v2709_v7, 4  ;;  %v2715_v12 = vshll.u32 %v7221_v58, 16  ;;  %v917_v0 = vshrl.u32 %v688_v60, 16  ;;  %v920_v6 = vshll.u32 %v688_v60, 16 }
  0x91   : > { %6002 = vmatmul.mubr.msk.bf16.gmra.mrb[12].mxu1 %vm1158_vm8, %v5493_v27  ;;  %v2694_v23 = vsel %vm6930_vm12, %v2689_v10, %v2693_v37  ;;  %v926_v29 = vshll.u32 %v689_v45, 16  ;;  %v2702_v34 = vor.u32 %v2701_v47, %v2698_v16  ;;  %v930_v21 = vshrl.u32 %v689_v45, 16 }
  0x92   : > { %v5639_v33 = vcombine.low %v2684_v42, %v2694_v23  ;;  %v2712_v52 = vor.u32 %v2711_v11, %v2707_v62  ;;  %v2717_v32 = vrot.slane %v2715_v12, 5  ;;  %v919_v40 = vrot.slane %v917_v0, 4  ;;  %v620_v23 = vld [vmem:[#allocation2 + $0x74] sm:$0x1] }
  0x93   : > { %v922_v44 = vrot.slane %v920_v6, 5  ;;  %v928_v26 = vrot.slane %v926_v29, 5  ;;  %v2703_v59 = vrot.slane %v2702_v34, 4  ;;  %v936_v2 = vshll.u32 %v713_v4, 16 }
  0x94   : > { %6137 = vmatprep.mubr.msk.bf16.mxu0 %vm1158_vm8, %v5639_v33  ;;  %v2713_v1 = vrot.slane %v2712_v52, 4  ;;  %v379_v7 = vshrl.u32 %v216_v49, 16  ;;  %v932_v27 = vrot.slane %v930_v21, 4  ;;  %v382_v60 = vshll.u32 %v216_v49, 16 }
  0x95   : > { %v923_v37 = vor.u32 %v922_v44, %v919_v40  ;;  %v617_v42 = vsel %vm6917_vm10, %v376_v48, %v616_v5  ;;  %v2708_v10 = vsel %vm6930_vm12, %v2703_v59, %v2707_v62  ;;  %v938_v16 = vrot.slane %v936_v2, 5  ;;  %v217_v5 = vld [vmem:[%s6903_s5 + $0x48] sm:$0xf]  ;;  %v220_v44 = vld [vmem:[%s6903_s5 + $0x54] sm:$0xf] }
  0x96   : > { %v2718_v45 = vsel %vm6930_vm12, %v2713_v1, %v2717_v32  ;;  %v381_v47 = vrot.slane %v379_v7, 7  ;;  %618 = vst [vmem:[#allocation2 + $0x6c] sm:$0xf] %v617_v42  ;;  %v933_v4 = vor.u32 %v932_v27, %v928_v26  ;;  %v5665_v0 = vrot.slane %v3205_v53, 9  ;;  %v218_v32 = vld [vmem:[%s6903_s5 + $0x4c] sm:$0xf] }
  0x97   : > { %v5640_v11 = vcombine.low %v2708_v10, %v2718_v45  ;;  %v924_v12 = vrot.slane %v923_v37, 4  ;;  %v3273_v48 = vrot.slane %v3271_v54, 4  ;;  %v5666_v62 = vrot.slane %v3206_v13, 9  ;;  %v627_v2 = vld [vmem:[#allocation2 + $0x80] sm:$0x1] }
  0x98   : > { %v384_v49 = vor.u32 %v382_v60, %v381_v47  ;;  %v386_v6 = vrot.slane %v381_v47, 4  ;;  %v934_v33 = vrot.slane %v933_v4, 4  ;;  %v3272_v34 = vsel %vm7065_vm15, %v5665_v0, %v3271_v54  ;;  %v7284_v45 = vld [vmem:[%s8673_s1 + $0xe] sm:$0x3]  ;;  %v630_v4 = vld [vmem:[#allocation2 + $0x84] sm:$0xf] }
  0x99   : > { %6138 = vmatmul.mubr.msk.bf16.gmra.mrb[12].mxu0 %vm1158_vm8, %v5640_v11  ;;  %v929_v29 = vsel %vm6930_vm12, %v924_v12, %v928_v26  ;;  %v3839_v52 = vsel %vm1207_vm0, %v7042_v31, 0  ;;  %v3275_v28 = vsel %vm7065_vm15, %v3273_v48, %v3274_v9  ;;  %v3279_v54 = vsel %vm7065_vm15, %v5666_v62, %v3278_v25  ;;  %v219_v31 = vld [vmem:[%s6903_s5 + $0x50] sm:$0xf] }
  0x9a   : > { %v385_v53 = vsel %vm6910_vm9, %v377_v46, %v384_v49  ;;  %v621_v40 = vsel %vm6923_vm11, %v386_v6, %v620_v23  ;;  %v939_v20 = vsel %vm6930_vm12, %v934_v33, %v938_v16  ;;  %v5682_v46 = vcombine.low %v3272_v34, %v3275_v28  ;;  %v634_v33 = vld [vmem:[#allocation2 + $0x8c] sm:$0x1]  ;;  %v3207_v34 = vld [vmem:[#allocation2 + $0x24] sm:$0xe] }
  0x9b   : > { %619 = vst.msk [vmem:[#allocation2 + $0x70] sm:$0xf] %vm143_vm1, %v385_v53  ;;  %622 = vst [vmem:[#allocation2 + $0x74] sm:$0x1] %v621_v40  ;;  %v5683_v26 = vcombine.low %v3279_v54, %v7079_v56  ;;  %v388_v38 = vshrl.u32 %v217_v5, 16  ;;  %v5494_v21 = vcombine.low %v929_v29, %v939_v20  ;;  %v391_v13 = vshll.u32 %v217_v5, 16 }
  0x9c   : > { %v396_v9 = vshrl.u32 %v218_v32, 16  ;;  %v399_v59 = vshll.u32 %v218_v32, 16  ;;  %6159 = vmatprep.mubr.msk.bf16.mxu0 %vm1158_vm8, %v5682_v46  ;;  %v405_v7 = vshrl.u32 %v219_v31, 16  ;;  %v408_v37 = vshll.u32 %v219_v31, 16 }
  0x9d   : > { %v7275_v1 = vld [vmem:[#allocation2 + $0x6c] sm:$0xf]  ;;  %v390_v25 = vrot.slane %v388_v38, 7  ;;  %v413_v27 = vshrl.u32 %v220_v44, 16  ;;  %6005 = vmatprep.mubr.msk.bf16.mxu1 %vm1158_vm8, %v5494_v21  ;;  %v416_v10 = vshll.u32 %v220_v44, 16 }
  0x9e   : > { %v941_v60 = vshrl.u32 %v7275_v1, 16  ;;  %v944_v56 = vshll.u32 %v7275_v1, 16  ;;  %v398_v42 = vrot.slane %v396_v9, 7  ;;  %v407_v11 = vrot.slane %v405_v7, 7  ;;  %v221_v7 = vld [vmem:[%s6903_s5 + $0x58] sm:$0xf] }
  0x9f   : > { %v393_v16 = vor.u32 %v391_v13, %v390_v25  ;;  %v394_v47 = vrot.slane %v390_v25, 4  ;;  %v415_v12 = vrot.slane %v413_v27, 7  ;;  %v5667_v9 = vrot.slane %v3207_v34, 9 }
  0xa0   : > { %v943_v23 = vrot.slane %v941_v60, 4  ;;  %v946_v0 = vrot.slane %v944_v56, 5  ;;  %v401_v49 = vor.u32 %v399_v59, %v398_v42  ;;  %v403_v6 = vrot.slane %v398_v42, 4  ;;  %v7313_v42 = vld [vmem:[%s6903_s5 + $0x5c] sm:$0xf] }
  0xa1   : > { %6160 = vmatmul.mubr.msk.bf16.vlgmr.msra.gmra.mrb[0].mxu0 %vm1158_vm8, %v5683_v26  ;;  %v624_v48 = vsel %vm6917_vm10, %v393_v16, %v623_v51  ;;  %v410_v62 = vor.u32 %v408_v37, %v407_v11  ;;  %v411_v5 = vrot.slane %v407_v11, 4  ;;  %v418_v29 = vor.u32 %v416_v10, %v415_v12  ;;  %v3208_v26 = vld [vmem:[#allocation2 + $0x30] sm:$0xe] }
  0xa2   : > { %v7289_v32 = vld [vmem:[#allocation2 + $0x70] sm:$0xf]  ;;  %v714_v53 = vld [vmem:[#allocation2 + $0x74] sm:$0x1]  ;;  %v947_v40 = vor.u32 %v946_v0, %v943_v23  ;;  %6192 = vmatpush3.bf16.msra.mxu0 %v3839_v52  ;;  %v402_v28 = vsel %vm6910_vm9, %v394_v47, %v401_v49  ;;  %625 = vst [vmem:[#allocation2 + $0x78] sm:$0xf] %v624_v48  ;;  %v628_v54 = vsel %vm6923_vm11, %v403_v6, %v627_v2 }
  0xa3   : > { %v420_v31 = vrot.slane %v415_v12, 4  ;;  %v950_v44 = vshll.u32 %v7289_v32, 16  ;;  %v954_v20 = vshrl.u32 %v7289_v32, 16  ;;  %v960_v46 = vshll.u32 %v714_v53, 16  ;;  %626 = vst.msk [vmem:[#allocation2 + $0x7c] sm:$0xf] %vm143_vm1, %v402_v28  ;;  %6559 = vmatprep.subr.msk.bf16.mxu0 %vm1207_vm0, %v7284_v45 }
  0xa4   : > { %629 = vst [vmem:[#allocation2 + $0x80] sm:$0x1] %v628_v54  ;;  %v419_v52 = vsel %vm6910_vm9, %v411_v5, %v418_v29  ;;  %v948_v38 = vrot.slane %v947_v40, 4  ;;  %v631_v21 = vsel %vm6917_vm10, %v410_v62, %v630_v4  ;;  %v3285_v2 = vrot.slane %v7070_v14, 5 }
  0xa5   : > { %633 = vst.msk [vmem:[#allocation2 + $0x88] sm:$0xf] %vm143_vm1, %v419_v52  ;;  %v635_v13 = vsel %vm6923_vm11, %v420_v31, %v634_v33  ;;  %v952_v59 = vrot.slane %v950_v44, 5  ;;  %v956_v51 = vrot.slane %v954_v20, 4  ;;  %v962_v25 = vrot.slane %v960_v46, 5 }
  0xa6   : > { %632 = vst [vmem:[#allocation2 + $0x84] sm:$0xf] %v631_v21  ;;  %636 = vst [vmem:[#allocation2 + $0x8c] sm:$0x1] %v635_v13  ;;  %v3288_v37 = vrot.slane %v7081_v61, 5  ;;  %v5668_v27 = vrot.slane %v3208_v26, 9  ;;  %v3286_v47 = vsel %vm7065_vm15, %v5667_v9, %v3285_v2 }
  0xa7   : > { %v3292_v60 = vrot.slane %v7097_v35, 5  ;;  %v3295_v56 = vrot.slane %v7093_v15, 5  ;;  %v953_v10 = vsel %vm6930_vm12, %v948_v38, %v952_v59  ;;  %v957_v16 = vor.u32 %v956_v51, %v952_v59 }
  0xa8   : > { %v3287_v11 = vrot.slane %v3285_v2, 4  ;;  %v422_v61 = vshrl.u32 %v221_v7, 16  ;;  %v425_v4 = vshll.u32 %v221_v7, 16  ;;  %v430_v0 = vshrl.u32 %v7313_v42, 16 }
  0xa9   : > { %v3293_v14 = vsel %vm7065_vm15, %v5668_v27, %v3292_v60  ;;  %v3294_v12 = vrot.slane %v3292_v60, 4  ;;  %v958_v23 = vrot.slane %v957_v16, 4  ;;  %v7321_v35 = vld [vmem:[#allocation2 + $0x78] sm:$0xf]  ;;  %v433_v49 = vshll.u32 %v7313_v42, 16 }
  0xaa   : > { %v3289_v15 = vsel %vm7065_vm15, %v3287_v11, %v3288_v37  ;;  %v7327_v6 = vld [vmem:[#allocation2 + $0x7c] sm:$0xf]  ;;  %v965_v62 = vshrl.u32 %v7321_v35, 16  ;;  %v968_v5 = vshll.u32 %v7321_v35, 16  ;;  %v424_v60 = vrot.slane %v422_v61, 7 }
  0xab   : > { %v715_v48 = vld [vmem:[#allocation2 + $0x80] sm:$0x1]  ;;  %v5684_v29 = vcombine.low %v3286_v47, %v3289_v15  ;;  %v3296_v33 = vsel %vm7065_vm15, %v3294_v12, %v3295_v56  ;;  %v963_v34 = vsel %vm6930_vm12, %v958_v23, %v962_v25  ;;  %v974_v53 = vshll.u32 %v7327_v6, 16  ;;  %v637_v56 = vld [vmem:[#allocation2 + $0x90] sm:$0xf] }
  0xac   : > { %v978_v40 = vshrl.u32 %v7327_v6, 16  ;;  %v984_v28 = vshll.u32 %v715_v48, 16  ;;  %v7337_v54 = vld [vmem:[#allocation2 + $0x88] sm:$0xf]  ;;  %v5495_v31 = vcombine.low %v953_v10, %v963_v34  ;;  %v967_v44 = vrot.slane %v965_v62, 4 }
  0xad   : > { %v970_v20 = vrot.slane %v968_v5, 5  ;;  %v7339_v46 = vld [vmem:[#allocation2 + $0x84] sm:$0xf]  ;;  %v716_v52 = vld [vmem:[#allocation2 + $0x8c] sm:$0x1]  ;;  %6163 = vmatprep.mubr.msk.bf16.mxu0 %vm1158_vm8, %v5684_v29  ;;  %v5685_v26 = vcombine.low %v3293_v14, %v3296_v33  ;;  %v976_v38 = vrot.slane %v974_v53, 5  ;;  %v427_v23 = vor.u32 %v425_v4, %v424_v60 }
  0xae   : > { %v980_v21 = vrot.slane %v978_v40, 4  ;;  %v986_v13 = vrot.slane %v984_v28, 5  ;;  %v989_v9 = vshrl.u32 %v7339_v46, 16  ;;  %6006 = vmatmul.mubr.msk.bf16.gmra.mrb[16].mxu1 %vm1158_vm8, %v5495_v31  ;;  %v992_v51 = vshll.u32 %v7339_v46, 16  ;;  %v223_v11 = vld [vmem:[%s6903_s5 + $0x60] sm:$0xf] }
  0xaf   : > { %v971_v59 = vor.u32 %v970_v20, %v967_v44  ;;  %v998_v25 = vshll.u32 %v7337_v54, 16  ;;  %v1002_v2 = vshrl.u32 %v7337_v54, 16  ;;  %6164 = vmatmul.mubr.msk.bf16.gmra.mrb[4].mxu0 %vm1158_vm8, %v5685_v26  ;;  %v1008_v27 = vshll.u32 %v716_v52, 16  ;;  %v641_v33 = vld [vmem:[#allocation2 + $0x98] sm:$0x1] }
  0xb0   : > { %v981_v7 = vor.u32 %v980_v21, %v976_v38  ;;  %v991_v37 = vrot.slane %v989_v9, 4  ;;  %v994_v10 = vrot.slane %v992_v51, 5  ;;  %v428_v15 = vrot.slane %v424_v60, 4  ;;  %v224_v34 = vld [vmem:[%s6903_s5 + $0x64] sm:$0xf] }
  0xb1   : > { %v972_v42 = vrot.slane %v971_v59, 4  ;;  %v1000_v16 = vrot.slane %v998_v25, 5  ;;  %v1004_v47 = vrot.slane %v1002_v2, 4  ;;  %v1010_v12 = vrot.slane %v1008_v27, 5  ;;  %v3209_v61 = vld [vmem:[#allocation2 + $0x3c] sm:$0xe] }
  0xb2   : > { %v982_v14 = vrot.slane %v981_v7, 4  ;;  %v995_v62 = vor.u32 %v994_v10, %v991_v37  ;;  %v432_v29 = vrot.slane %v430_v0, 7  ;;  %v638_v40 = vsel %vm6917_vm10, %v427_v23, %v637_v56  ;;  %v3210_v9 = vld [vmem:[#allocation2 + $0x48] sm:$0xe]  ;;  %v644_v25 = vld [vmem:[#allocation2 + $0x9c] sm:$0xf] }
  0xb3   : > { %v977_v48 = vsel %vm6930_vm12, %v972_v42, %v976_v38  ;;  %v1005_v5 = vor.u32 %v1004_v47, %v1000_v16  ;;  %v439_v28 = vshrl.u32 %v223_v11, 16  ;;  %v442_v31 = vshll.u32 %v223_v11, 16  ;;  %639 = vst [vmem:[#allocation2 + $0x90] sm:$0xf] %v638_v40  ;;  %v648_v56 = vld [vmem:[#allocation2 + $0xa4] sm:$0x1] }
  0xb4   : > { %v987_v53 = vsel %vm6930_vm12, %v982_v14, %v986_v13  ;;  %v996_v4 = vrot.slane %v995_v62, 4  ;;  %v435_v52 = vor.u32 %v433_v49, %v432_v29  ;;  %v437_v26 = vrot.slane %v432_v29, 4  ;;  %v225_v49 = vld [vmem:[%s6903_s5 + $0x68] sm:$0xf] }
  0xb5   : > { %v5496_v44 = vcombine.low %v977_v48, %v987_v53  ;;  %v1006_v20 = vrot.slane %v1005_v5, 4  ;;  %v441_v38 = vrot.slane %v439_v28, 7  ;;  %v447_v0 = vshrl.u32 %v224_v34, 16  ;;  %v226_v5 = vld [vmem:[%s6903_s5 + $0x6c] sm:$0xf] }
  0xb6   : > { %v450_v21 = vshll.u32 %v224_v34, 16  ;;  %v1001_v13 = vsel %vm6930_vm12, %v996_v4, %v1000_v16  ;;  %v436_v51 = vsel %vm6910_vm9, %v428_v15, %v435_v52  ;;  %v5669_v2 = vrot.slane %v3209_v61, 9  ;;  %v651_v28 = vld [vmem:[#allocation2 + $0xa8] sm:$0xf]  ;;  %v227_v52 = vld [vmem:[%s6903_s5 + $0x70] sm:$0xf] }
  0xb7   : > { %6009 = vmatprep.mubr.msk.bf16.mxu1 %vm1158_vm8, %v5496_v44  ;;  %v1011_v59 = vsel %vm6930_vm12, %v1006_v20, %v1010_v12  ;;  %640 = vst.msk [vmem:[#allocation2 + $0x94] sm:$0xf] %vm143_vm1, %v436_v51  ;;  %v642_v37 = vsel %vm6923_vm11, %v437_v26, %v641_v33  ;;  %v444_v27 = vor.u32 %v442_v31, %v441_v38  ;;  %v445_v60 = vrot.slane %v441_v38, 4 }
  0xb8   : > { %v5497_v7 = vcombine.low %v1001_v13, %v1011_v59  ;;  %643 = vst [vmem:[#allocation2 + $0x98] sm:$0x1] %v642_v37  ;;  %v449_v42 = vrot.slane %v447_v0, 7  ;;  %v3299_v10 = vrot.slane %v7124_v63, 5  ;;  %v3302_v16 = vrot.slane %v7143_v55, 5 }
  0xb9   : > { %v5670_v47 = vrot.slane %v3210_v9, 9  ;;  %v645_v11 = vsel %vm6917_vm10, %v444_v27, %v644_v25  ;;  %v3306_v14 = vrot.slane %v7176_v50, 5  ;;  %v3309_v12 = vrot.slane %v7178_v57, 5 }
  0xba   : > { %6010 = vmatmul.mubr.msk.bf16.gmra.mrb[20].mxu1 %vm1158_vm8, %v5497_v7  ;;  %v456_v23 = vshrl.u32 %v225_v49, 16  ;;  %v452_v15 = vor.u32 %v450_v21, %v449_v42  ;;  %v454_v48 = vrot.slane %v449_v42, 4  ;;  %646 = vst [vmem:[#allocation2 + $0x9c] sm:$0xf] %v645_v11  ;;  %v3300_v62 = vsel %vm7065_vm15, %v5669_v2, %v3299_v10  ;;  %v7377_v55 = vld [vmem:[#allocation2 + $0x90] sm:$0xf] }
  0xbb   : > { %v3301_v63 = vrot.slane %v3299_v10, 4  ;;  %v3307_v29 = vsel %vm7065_vm15, %v5670_v47, %v3306_v14  ;;  %v3308_v33 = vrot.slane %v3306_v14, 4  ;;  %v459_v50 = vshll.u32 %v225_v49, 16 }
  0xbc   : > { %v458_v34 = vrot.slane %v456_v23, 7  ;;  %v1013_v57 = vshrl.u32 %v7377_v55, 16  ;;  %v1016_v61 = vshll.u32 %v7377_v55, 16  ;;  %v453_v53 = vsel %vm6910_vm9, %v445_v60, %v452_v15 }
  0xbd   : > { %v649_v40 = vsel %vm6923_vm11, %v454_v48, %v648_v56  ;;  %647 = vst.msk [vmem:[#allocation2 + $0xa0] sm:$0xf] %vm143_vm1, %v453_v53  ;;  %v3303_v31 = vsel %vm7065_vm15, %v3301_v63, %v3302_v16  ;;  %v3310_v44 = vsel %vm7065_vm15, %v3308_v33, %v3309_v12  ;;  %v464_v25 = vshrl.u32 %v226_v5, 16 }
  0xbe   : > { %650 = vst [vmem:[#allocation2 + $0xa4] sm:$0x1] %v649_v40  ;;  %v461_v4 = vor.u32 %v459_v50, %v458_v34  ;;  %v462_v20 = vrot.slane %v458_v34, 4  ;;  %v7393_v26 = vld [vmem:[#allocation2 + $0x94] sm:$0xf]  ;;  %v1015_v38 = vrot.slane %v1013_v57, 4  ;;  %v5686_v21 = vcombine.low %v3300_v62, %v3303_v31 }
  0xbf   : > { %v1018_v0 = vrot.slane %v1016_v61, 5  ;;  %v5687_v9 = vcombine.low %v3307_v29, %v3310_v44  ;;  %v717_v13 = vld [vmem:[#allocation2 + $0x98] sm:$0x1]  ;;  %v1022_v59 = vshll.u32 %v7393_v26, 16  ;;  %v1026_v51 = vshrl.u32 %v7393_v26, 16 }
  0xc0   : > { %v467_v2 = vshll.u32 %v226_v5, 16  ;;  %v1032_v7 = vshll.u32 %v717_v13, 16  ;;  %6167 = vmatprep.mubr.msk.bf16.mxu0 %vm1158_vm8, %v5686_v21  ;;  %v652_v37 = vsel %vm6917_vm10, %v461_v4, %v651_v28  ;;  %v473_v27 = vshrl.u32 %v227_v52, 16  ;;  %v655_v62 = vld [vmem:[#allocation2 + $0xb0] sm:$0x1] }
  0xc1   : > { %v1019_v49 = vor.u32 %v1018_v0, %v1015_v38  ;;  %v1024_v60 = vrot.slane %v1022_v59, 5  ;;  %v1028_v56 = vrot.slane %v1026_v51, 4  ;;  %v7400_v42 = vld [vmem:[#allocation2 + $0x9c] sm:$0xf]  ;;  %6168 = vmatmul.mubr.msk.bf16.gmra.mrb[8].mxu0 %vm1158_vm8, %v5687_v9  ;;  %v466_v10 = vrot.slane %v464_v25, 7 }
  0xc2   : > { %653 = vst [vmem:[#allocation2 + $0xa8] sm:$0xf] %v652_v37  ;;  %v476_v16 = vshll.u32 %v227_v52, 16  ;;  %v1034_v11 = vrot.slane %v1032_v7, 5  ;;  %v1037_v14 = vshrl.u32 %v7400_v42, 16  ;;  %v1040_v12 = vshll.u32 %v7400_v42, 16 }
  0xc3   : > { %v1020_v47 = vrot.slane %v1019_v49, 4  ;;  %v1029_v23 = vor.u32 %v1028_v56, %v1024_v60  ;;  %v469_v15 = vor.u32 %v467_v2, %v466_v10  ;;  %v471_v48 = vrot.slane %v466_v10, 4  ;;  %v228_v28 = vld [vmem:[%s6903_s5 + $0x74] sm:$0xf]  ;;  %v3212_v56 = vld [vmem:[#allocation2 + $0x60] sm:$0xe] }
  0xc4   : > { %v475_v63 = vrot.slane %v473_v27, 7  ;;  %v7407_v29 = vld [vmem:[#allocation2 + $0xa0] sm:$0xf]  ;;  %v1039_v34 = vrot.slane %v1037_v14, 4  ;;  %v1042_v50 = vrot.slane %v1040_v12, 5  ;;  %v481_v49 = vshrl.u32 %v228_v28, 16 }
  0xc5   : > { %v1025_v5 = vsel %vm6930_vm12, %v1020_v47, %v1024_v60  ;;  %v718_v33 = vld [vmem:[#allocation2 + $0xa4] sm:$0x1]  ;;  %v1030_v57 = vrot.slane %v1029_v23, 4  ;;  %v1046_v61 = vshll.u32 %v7407_v29, 16  ;;  %v1050_v53 = vshrl.u32 %v7407_v29, 16 }
  0xc6   : > { %v1056_v40 = vshll.u32 %v718_v33, 16  ;;  %v1043_v31 = vor.u32 %v1042_v50, %v1039_v34  ;;  %v470_v44 = vsel %vm6910_vm9, %v462_v20, %v469_v15  ;;  %v656_v4 = vsel %vm6923_vm11, %v471_v48, %v655_v62  ;;  %v658_v38 = vld [vmem:[#allocation2 + $0xb4] sm:$0xf]  ;;  %v662_v15 = vld [vmem:[#allocation2 + $0xbc] sm:$0x1] }
  0xc7   : > { %v478_v52 = vor.u32 %v476_v16, %v475_v63  ;;  %v1035_v0 = vsel %vm6930_vm12, %v1030_v57, %v1034_v11  ;;  %v1048_v21 = vrot.slane %v1046_v61, 5  ;;  %v1052_v9 = vrot.slane %v1050_v53, 4  ;;  %654 = vst.msk [vmem:[#allocation2 + $0xac] sm:$0xf] %vm143_vm1, %v470_v44  ;;  %657 = vst [vmem:[#allocation2 + $0xb0] sm:$0x1] %v656_v4 }
  0xc8   : > { %v1058_v13 = vrot.slane %v1056_v40, 5  ;;  %v3211_v59 = vld [vmem:[#allocation2 + $0x54] sm:$0xe]  ;;  %v5498_v51 = vcombine.low %v1025_v5, %v1035_v0  ;;  %v1044_v25 = vrot.slane %v1043_v31, 4  ;;  %v479_v20 = vrot.slane %v475_v63, 4 }
  0xc9   : > { %v7419_v2 = vld [vmem:[#allocation2 + $0xa8] sm:$0xf]  ;;  %v1053_v7 = vor.u32 %v1052_v9, %v1048_v21  ;;  %v484_v60 = vshll.u32 %v228_v28, 16  ;;  %v483_v16 = vrot.slane %v481_v49, 7  ;;  %v659_v47 = vsel %vm6917_vm10, %v478_v52, %v658_v38  ;;  %v2504_v53 = vld [vmem:[#allocation2 + $0x70] sm:$0xf] }
  0xca   : > { %v1061_v37 = vshrl.u32 %v7419_v2, 16  ;;  %v1064_v27 = vshll.u32 %v7419_v2, 16  ;;  %6013 = vmatprep.mubr.msk.bf16.mxu1 %vm1158_vm8, %v5498_v51  ;;  %v1049_v10 = vsel %vm6930_vm12, %v1044_v25, %v1048_v21  ;;  %v5671_v11 = vrot.slane %v3211_v59, 9  ;;  %660 = vst [vmem:[#allocation2 + $0xb4] sm:$0xf] %v659_v47 }
  0xcb   : > { %v1054_v14 = vrot.slane %v1053_v7, 4  ;;  %v3313_v48 = vrot.slane %v7192_v24, 5  ;;  %v486_v62 = vor.u32 %v484_v60, %v483_v16  ;;  %v488_v63 = vrot.slane %v483_v16, 4  ;;  %v3213_v40 = vld [vmem:[#allocation2 + $0x6c] sm:$0xe] }
  0xcc   : > { %v1063_v12 = vrot.slane %v1061_v37, 4  ;;  %v1066_v23 = vrot.slane %v1064_v27, 5  ;;  %v3316_v5 = vrot.slane %v7201_v8, 5  ;;  %v5672_v33 = vrot.slane %v3212_v56, 9  ;;  %v2505_v21 = vld [vmem:[#allocation2 + $0x74] sm:$0x1] }
  0xcd   : > { %v1059_v34 = vsel %vm6930_vm12, %v1054_v14, %v1058_v13  ;;  %v3314_v57 = vsel %vm7065_vm15, %v5671_v11, %v3313_v48  ;;  %v3315_v61 = vrot.slane %v3313_v48, 4  ;;  %v487_v24 = vsel %vm6910_vm9, %v479_v20, %v486_v62 }
  0xce   : > { %v1067_v50 = vor.u32 %v1066_v23, %v1063_v12  ;;  %v5499_v28 = vcombine.low %v1049_v10, %v1059_v34  ;;  %v7434_v31 = vld [vmem:[#allocation2 + $0xac] sm:$0xf]  ;;  %v7436_v44 = vld [vmem:[#allocation2 + $0xb0] sm:$0x1]  ;;  %v663_v8 = vsel %vm6923_vm11, %v488_v63, %v662_v15  ;;  %v3320_v4 = vrot.slane %v7218_v41, 5 }
  0xcf   : > { %v1070_v52 = vshll.u32 %v7434_v31, 16  ;;  %v1074_v38 = vshrl.u32 %v7434_v31, 16  ;;  %v1080_v0 = vshll.u32 %v7436_v44, 16  ;;  %661 = vst.msk [vmem:[#allocation2 + $0xb8] sm:$0xf] %vm143_vm1, %v487_v24  ;;  %v3317_v13 = vsel %vm7065_vm15, %v3315_v61, %v3316_v5 }
  0xd0   : > { %664 = vst [vmem:[#allocation2 + $0xbc] sm:$0x1] %v663_v8  ;;  %6014 = vmatmul.mubr.msk.bf16.gmra.mrb[24].mxu1 %vm1158_vm8, %v5499_v28  ;;  %v1068_v9 = vrot.slane %v1067_v50, 4  ;;  %v3322_v59 = vrot.slane %v3320_v4, 4  ;;  %v3323_v51 = vrot.slane %v7221_v58, 5  ;;  %v5688_v20 = vcombine.low %v3314_v57, %v3317_v13 }
  0xd1   : > { %v1072_v41 = vrot.slane %v1070_v52, 5  ;;  %v1076_v25 = vrot.slane %v1074_v38, 4  ;;  %v3321_v49 = vsel %vm7065_vm15, %v5672_v33, %v3320_v4  ;;  %v7453_v7 = vld [vmem:[#allocation2 + $0xb4] sm:$0xf]  ;;  %v5673_v27 = vrot.slane %v3213_v40, 9 }
  0xd2   : > { %v3324_v37 = vsel %vm7065_vm15, %v3322_v59, %v3323_v51  ;;  %v3327_v60 = vrot.slane %v2504_v53, 5  ;;  %v3330_v56 = vrot.slane %v2505_v21, 5  ;;  %v1082_v16 = vrot.slane %v1080_v0, 5  ;;  %6171 = vmatprep.mubr.msk.bf16.mxu0 %vm1158_vm8, %v5688_v20  ;;  %v7471_v34 = vld [vmem:[#allocation2 + $0x7c] sm:$0xf] }
  0xd3   : > { %v1077_v10 = vor.u32 %v1076_v25, %v1072_v41  ;;  %v1085_v47 = vshrl.u32 %v7453_v7, 16  ;;  %v1088_v58 = vshll.u32 %v7453_v7, 16  ;;  %v1073_v11 = vsel %vm6930_vm12, %v1068_v9, %v1072_v41  ;;  %v7477_v40 = vld [vmem:[#allocation2 + $0x80] sm:$0x1]  ;;  %v3214_v28 = vld [vmem:[#allocation2 + $0x78] sm:$0xe] }
  0xd4   : > { %v5689_v14 = vcombine.low %v3321_v49, %v3324_v37  ;;  %v3329_v12 = vrot.slane %v3327_v60, 4  ;;  %v3328_v62 = vsel %vm7065_vm15, %v5673_v27, %v3327_v60  ;;  %v2510_v52 = vld [vmem:[#allocation2 + $0x88] sm:$0xf]  ;;  %v3215_v9 = vld [vmem:[#allocation2 + $0x84] sm:$0xe]  ;;  %v5674_v13 = vrot.slane %v3214_v28, 9 }
  0xd5   : > { %v1078_v23 = vrot.slane %v1077_v10, 4  ;;  %v1087_v15 = vrot.slane %v1085_v47, 4  ;;  %v1090_v48 = vrot.slane %v1088_v58, 5  ;;  %v3334_v59 = vrot.slane %v7471_v34, 5  ;;  %v2511_v51 = vld [vmem:[#allocation2 + $0x8c] sm:$0x1] }
  0xd6   : > { %v7464_v63 = vld [vmem:[#allocation2 + $0xb8] sm:$0xf]  ;;  %6172 = vmatmul.mubr.msk.bf16.gmra.mrb[12].mxu0 %vm1158_vm8, %v5689_v14  ;;  %v3331_v33 = vsel %vm7065_vm15, %v3329_v12, %v3330_v56  ;;  %v3216_v41 = vld [vmem:[#allocation2 + $0x90] sm:$0xe]  ;;  %v6633_v49 = vld [vmem:[#allocation2] sm:$0xf] }
  0xd7   : > { %v7466_v5 = vld [vmem:[#allocation2 + $0xbc] sm:$0x1]  ;;  %v1083_v50 = vsel %vm6930_vm12, %v1078_v23, %v1082_v16  ;;  %v1091_v57 = vor.u32 %v1090_v48, %v1087_v15  ;;  %v1094_v61 = vshll.u32 %v7464_v63, 16  ;;  %v1098_v53 = vshrl.u32 %v7464_v63, 16  ;;  %v7483_v37 = vld [vmem:[#allocation2 + $0x4] sm:$0xf] }
  0xd8   : > { %v5500_v24 = vcombine.low %v1073_v11, %v1083_v50  ;;  %v1104_v8 = vshll.u32 %v7466_v5, 16  ;;  %v5690_v4 = vcombine.low %v3328_v62, %v3331_v33  ;;  %v5518_v27 = vcombine.low %v6633_v49, %v7483_v37  ;;  %v2513_v56 = vld [vmem:[#allocation2 + $0x94] sm:$0xf]  ;;  %v2514_v10 = vld [vmem:[#allocation2 + $0x98] sm:$0x1] }
  0xd9   : > { %v1092_v38 = vrot.slane %v1091_v57, 4  ;;  %v1096_v0 = vrot.slane %v1094_v61, 5  ;;  %v1100_v21 = vrot.slane %v1098_v53, 4  ;;  %v3337_v60 = vrot.slane %v7477_v40, 5  ;;  %v3217_v14 = vld [vmem:[#allocation2 + $0x9c] sm:$0xe] }
  0xda   : > { %6017 = vmatprep.mubr.msk.bf16.mxu1 %vm1158_vm8, %v5500_v24  ;;  %6175 = vmatprep.mubr.msk.bf16.mxu0 %vm1158_vm8, %v5690_v4  ;;  %v1106_v20 = vrot.slane %v1104_v8, 5  ;;  %v3335_v16 = vsel %vm7065_vm15, %v5674_v13, %v3334_v59  ;;  %v3336_v47 = vrot.slane %v3334_v59, 4  ;;  %v5675_v58 = vrot.slane %v3215_v9, 9  ;;  %v2516_v61 = vld [vmem:[#allocation2 + $0xa0] sm:$0xf] }
  0xdb   : > { %v1101_v25 = vor.u32 %v1100_v21, %v1096_v0  ;;  %v3341_v11 = vrot.slane %v2510_v52, 5  ;;  %v1097_v12 = vsel %vm6930_vm12, %v1092_v38, %v1096_v0  ;;  %v3344_v15 = vrot.slane %v2511_v51, 5  ;;  %v2517_v53 = vld [vmem:[#allocation2 + $0xa4] sm:$0x1]  ;;  %v2519_v52 = vld [vmem:[#allocation2 + $0xac] sm:$0xf] }
  0xdc   : > { %v5676_v48 = vrot.slane %v3216_v41, 9  ;;  %v3338_v62 = vsel %vm7065_vm15, %v3336_v47, %v3337_v60  ;;  %v3348_v57 = vrot.slane %v2513_v56, 5  ;;  %v3351_v8 = vrot.slane %v2514_v10, 5  ;;  %v2522_v9 = vld [vmem:[#allocation2 + $0xb8] sm:$0xf] }
  0xdd   : > { %v1102_v23 = vrot.slane %v1101_v25, 4  ;;  %v3342_v33 = vsel %vm7065_vm15, %v5675_v58, %v3341_v11  ;;  %v3343_v50 = vrot.slane %v3341_v11, 4  ;;  %v5691_v24 = vcombine.low %v3335_v16, %v3338_v62  ;;  %v3218_v41 = vld [vmem:[#allocation2 + $0xa8] sm:$0xe]  ;;  %v229_v25 = vld [vmem:[%s6903_s5 + $0x78] sm:$0xf] }
  0xde   : > { %v5677_v4 = vrot.slane %v3217_v14, 9  ;;  %v3350_v21 = vrot.slane %v3348_v57, 4  ;;  %v3355_v59 = vrot.slane %v2516_v61, 5  ;;  %v3358_v51 = vrot.slane %v2517_v53, 5  ;;  %v2520_v60 = vld [vmem:[#allocation2 + $0xb0] sm:$0x1] }
  0xdf   : > { %v1107_v28 = vsel %vm6930_vm12, %v1102_v23, %v1106_v20  ;;  %v3345_v0 = vsel %vm7065_vm15, %v3343_v50, %v3344_v15  ;;  %6176 = vmatmul.mubr.msk.bf16.gmra.mrb[16].mxu0 %vm1158_vm8, %v5691_v24  ;;  %v3349_v20 = vsel %vm7065_vm15, %v5676_v48, %v3348_v57  ;;  %v3362_v56 = vrot.slane %v2519_v52, 5  ;;  %v6635_v10 = vld [vmem:[#allocation2 + $0x10] sm:$0xf]  ;;  %v230_v14 = vld [vmem:[%s6903_s5 + $0x7c] sm:$0xf]  ;;  %s5419_s5 = sshll.u32 %s136_s4, 4  ;;  %s8632_s5 = int_to_ptr.vmem [resolvable:$true] %s5419_s5 }
  0xe0   : > { %v5501_v38 = vcombine.low %v1097_v12, %v1107_v28  ;;  %v5692_v13 = vcombine.low %v3342_v33, %v3345_v0  ;;  %v3352_v49 = vsel %vm7065_vm15, %v3350_v21, %v3351_v8  ;;  %v1724_v16 = vrot.slane %v6635_v10, 5  ;;  %v6636_v12 = vld [vmem:[#allocation2 + $0x18] sm:$0xf]  ;;  %v7511_v23 = vld [vmem:[#allocation2 + $0x1c] sm:$0xf]  ;;  %s6686_s13 = scalar_lea.vmem %s8632_s5, 32  ;;  %p6693_p0 = scmp.lt.s32.totalorder %s8632_s5, %s6691_s17 }
  0xe1   : > { %v3356_v47 = vsel %vm7065_vm15, %v5677_v4, %v3355_v59  ;;  %v3357_v58 = vrot.slane %v3355_v59, 4  ;;  %v3369_v11 = vrot.slane %v2522_v9, 5  ;;  %v5520_v15 = vcombine.low %v6636_v12, %v7511_v23  ;;  %v2523_v62 = vld [vmem:[#allocation2 + $0xbc] sm:$0x1]  ;;  %v3219_v33 = vld [vmem:[#allocation2 + $0xb4] sm:$0xe]  ;;  %p6687_p11 = scmp.ne.s32.totalorder %s8632_s5, %s6686_s13  ;;  %p6694_p1 = scmp.lt.s32.totalorder %s6692_s21, %s6686_s13 }
  0xe2   : > { %6018 = vmatmul.mubr.msk.bf16.gmra.mrb[28].mxu1 %vm1158_vm8, %v5501_v38  ;;  %6179 = vmatprep.mubr.msk.bf16.mxu0 %vm1158_vm8, %v5692_v13  ;;  %v5678_v48 = vrot.slane %v3218_v41, 9  ;;  %v490_v50 = vshrl.u32 %v229_v25, 16  ;;  %v5693_v57 = vcombine.low %v3349_v20, %v3352_v49  ;;  %v3365_v61 = vrot.slane %v2520_v60, 5  ;;  %v665_v9 = vld [vmem:[#allocation2 + $0xc0] sm:$0xf] }
  0xe3   : > { %6023 = vmatprep.mubr.msk.bf16.mxu1 %vm1158_vm8, %v5518_v27  ;;  %v3359_v27 = vsel %vm7065_vm15, %v3357_v58, %v3358_v51  ;;  %v493_v53 = vshll.u32 %v229_v25, 16  ;;  %v3364_v24 = vrot.slane %v3362_v56, 4  ;;  %v498_v4 = vshrl.u32 %v230_v14, 16  ;;  %v6638_v13 = vld [vmem:[%s8673_s1 + $0x4] sm:$0x3]  ;;  %p6688_p12 = pnand %p6687_p11, %p6805_p5  ;;  %p6695_p2 = por %p6694_p1, %p6693_p0 }
  0xe4   : > { %v5694_v28 = vcombine.low %v3356_v47, %v3359_v27  ;;  %v492_v8 = vrot.slane %v490_v50, 7  ;;  %v5679_v52 = vrot.slane %v3219_v33, 9  ;;  %v3371_v38 = vrot.slane %v3369_v11, 4  ;;  %v1665_v49 = vld [vmem:[#allocation2 + $0xc] sm:$0xe] }
  0xe5   : > { %v3372_v0 = vrot.slane %v2523_v62, 5  ;;  %v501_v21 = vshll.u32 %v230_v14, 16  ;;  %v1926_v59 = vsel %vm1207_vm0, %v6638_v13, 0  ;;  %v500_v51 = vrot.slane %v498_v4, 7  ;;  %v6639_v25 = vld [vmem:[#allocation2 + $0x14] sm:$0x1]  ;;  %p6689_p13 = pneg %p6688_p12 }
  0xe6   : > { %v495_v41 = vor.u32 %v493_v53, %v492_v8  ;;  %v496_v20 = vrot.slane %v492_v8, 4  ;;  %v1727_v60 = vrot.slane %v6639_v25, 5  ;;  %v3363_v10 = vsel %vm7065_vm15, %v5678_v48, %v3362_v56  ;;  %v669_v47 = vld [vmem:[#allocation2 + $0xc8] sm:$0x1]  ;;  %v7526_v58 = vld [vmem:[%s8673_s1 + $0x6] sm:$0x3] }
  0xe7   : > { %6180 = vmatmul.mubr.msk.bf16.gmra.mrb[20].mxu0 %vm1158_vm8, %v5693_v57  ;;  %v3366_v14 = vsel %vm7065_vm15, %v3364_v24, %v3365_v61  ;;  %v503_v12 = vor.u32 %v501_v21, %v500_v51  ;;  %v505_v62 = vrot.slane %v500_v51, 4  ;;  %v3370_v48 = vsel %vm7065_vm15, %v5679_v52, %v3369_v11  ;;  %v7553_v57 = vld [vmem:[#allocation2 + $0x28] sm:$0xf]  ;;  %v6642_v61 = vld [vmem:[#allocation2 + $0x30] sm:$0xf]  ;;  %p6696_p3 = pnand %p6695_p2, %p6689_p13 }
  0xe8   : > { %6183 = vmatprep.mubr.msk.bf16.mxu0 %vm1158_vm8, %v5694_v28  ;;  %v666_v56 = vsel %vm6917_vm10, %v495_v41, %v665_v9  ;;  %v3373_v18 = vsel %vm7065_vm15, %v3371_v38, %v3372_v0  ;;  %v5551_v19 = vrot.slane %v1665_v49, 9  ;;  %v1726_v50 = vrot.slane %v1724_v16, 4  ;;  %v7560_v53 = vld [vmem:[#allocation2 + $0x34] sm:$0xf]  ;;  %v7571_v13 = vld [vmem:[#allocation2 + $0x40] sm:$0xf] }
  0xe9   : > { %667 = vst [vmem:[#allocation2 + $0xc0] sm:$0xf] %v666_v56  ;;  %v670_v33 = vsel %vm6923_vm11, %v505_v62, %v669_v47  ;;  %v5695_v30 = vcombine.low %v3363_v10, %v3366_v14  ;;  %v5696_v27 = vcombine.low %v3370_v48, %v3373_v18  ;;  %v5522_v28 = vcombine.low %v6642_v61, %v7560_v53  ;;  %v7574_v51 = vld [vmem:[#allocation2 + $0x4c] sm:$0xf]  ;;  %v6601_v47 = vld [vmem:[#allocation2 + $0x18] sm:$0xff]  }
  0xea   : > { %6024 = vmatmul.mubr.msk.bf16.vlgmr.msra.gmra.mrb[0].mxu1 %vm1158_vm8, %v5519_v17  ;;  %v504_v17 = vsel %vm6910_vm9, %v496_v20, %v503_v12  ;;  %671 = vst [vmem:[#allocation2 + $0xc8] sm:$0x1] %v670_v33  ;;  %v7551_v11 = vsel %vm7065_vm15, %v5551_v19, %v1724_v16  ;;  %v7558_v36 = vsel %vm7065_vm15, %v1726_v50, %v1727_v60  ;;  %v2753_v21 = vshll.u32 %v7471_v34, 16  ;;  %v6646_v20 = vld [vmem:[#allocation2 + $0x48] sm:$0xf] }
  0xeb   : > { %6056 = vmatpush3.bf16.msra.mxu1 %v1926_v59  ;;  %6027 = vmatprep.mubr.msk.bf16.mxu1 %vm1158_vm8, %v5520_v15  ;;  %668 = vst.msk [vmem:[#allocation2 + $0xc4] sm:$0xf] %vm143_vm1, %v504_v17  ;;  %v6640_v15 = vld [vmem:[#allocation2 + $0x24] sm:$0xf]  ;;  %v2757_v9 = vshrl.u32 %v7471_v34, 16  ;;  %v5524_v49 = vcombine.low %v6646_v20, %v7574_v51  ;;  %v2763_v48 = vshll.u32 %v7477_v40, 16 }
  0xec   : > { %6554 = vmatprep.subr.msk.bf16.mxu1 %vm1207_vm0, %v7526_v58  ;;  %v5521_v22 = vcombine.low %v6640_v15, %v7553_v57  ;;  %v6645_v59 = vld [vmem:[#allocation2 + $0x3c] sm:$0xf]  ;;  %v7581_v14 = vrot.slane %v2753_v21, 5  ;;  %v6648_v62 = vld [vmem:[#allocation2 + $0x8] sm:$0x1]  ;;  %v1717_v15 = vrot.slane %v7483_v37, 5 }
  0xed   : > { %v5523_v41 = vcombine.low %v6645_v59, %v7571_v13  ;;  %v2759_v34 = vrot.slane %v2757_v9, 4  ;;  %v1720_v56 = vrot.slane %v6648_v62, 5  ;;  %v1664_v18 = vld [vmem:[#allocation2] sm:$0xe]  ;;  %v6649_v17 = vld [vmem:[#allocation2 + $0x54] sm:$0xf] }
  0xee   : > { %8709 = vst [vmem:[#allocation7_spill] sm:$0xff] %v7581_v14  ;;  %v7589_v33 = vld [vmem:[#allocation2 + $0x58] sm:$0xf]  ;;  %v1667_v40 = vld [vmem:[#allocation2 + $0x24] sm:$0xe]  ;;  %v1745_v37 = vrot.slane %v7560_v53, 5 }
  0xef   : > { %6184 = vmatmul.mubr.msk.bf16.gmra.mrb[24].mxu0 %vm1158_vm8, %v5695_v30  ;;  %v2760_v19 = vor.u32 %v2759_v34, %v7581_v14  ;;  %v5525_v50 = vcombine.low %v6649_v17, %v7589_v33  ;;  %v6602_v30 = vld [vmem:[#allocation2 + $0x24] sm:$0xff]   ;;  %v1669_v21 = vld [vmem:[#allocation2 + $0x3c] sm:$0xe]  ;;  %v1752_v9 = vrot.slane %v7571_v13, 5  ;;  %v7613_v13 = vld [vmem:[%s8673_s1 + $0x10] sm:$0x3]  ;;  %v5528_v17 = vcombine.low %v7321_v35, %v7327_v6 }
  0xf0   : > { %6187 = vmatprep.mubr.msk.bf16.mxu0 %vm1158_vm8, %v5696_v27  ;;  %v3220_v16 = vld [vmem:[#allocation2 + $0xc0] sm:$0xe]  ;;  %v1747_v34 = vrot.slane %v1745_v37, 4  ;;  %v4043_v14 = vld [vmem:[#allocation2 + $0x3c] sm:$0xf]  ;;  %vm5401_vm1 = vcmask 1040384  }
  0xf1   : > { %v5680_v8 = vrot.slane %v3220_v16, 9  ;;  %v2526_v52 = vld [vmem:[#allocation2 + $0xc8] sm:$0x1]  ;;  %v6652_v27 = vld [vmem:[#allocation2 + $0x60] sm:$0xf]  ;;  %v1731_v16 = vrot.slane %v7511_v23, 5 }
  0xf2   : > { %6028 = vmatmul.mubr.msk.bf16.gmra.mrb[4].mxu1 %vm1158_vm8, %v5521_v22  ;;  %v2525_v4 = vld [vmem:[#allocation2 + $0xc4] sm:$0xf]  ;;  %v3379_v0 = vrot.slane %v2526_v52, 5  ;;  %v7598_v52 = vrot.slane %v2763_v48, 5  ;;  %v7604_v59 = vrot.slane %v2760_v19, 4  ;;  %v4565_v23 = vsel %vm1207_vm0, %v7284_v45, 0 }
  0xf3   : > { %6031 = vmatprep.mubr.msk.bf16.mxu1 %vm1158_vm8, %v5522_v28  ;;  %v3376_v38 = vrot.slane %v2525_v4, 5  ;;  %v7593_v22 = vld [vmem:[#allocation2 + $0x64] sm:$0xf]  ;;  %v1666_v28 = vld [vmem:[#allocation2 + $0x18] sm:$0xe]  ;;  %v1754_v48 = vrot.slane %v1752_v9, 4 }
  0xf4   : > { %v5526_v61 = vcombine.low %v6652_v27, %v7593_v22  ;;  %v1668_v4 = vld [vmem:[#allocation2 + $0x30] sm:$0xe]  ;;  %8710 = vst [vmem:[#allocation8_spill] sm:$0xff] %v7598_v52  ;;  %8711 = vst [vmem:[#allocation9_spill] sm:$0xff] %v7604_v59  ;;  %v5552_v20 = vrot.slane %v1666_v28, 9  ;;  %v4150_v52 = vshll.u32 %v7756_v3, 16 }
  0xf5   : > { %v3377_v25 = vsel %vm7065_vm15, %v5680_v8, %v3376_v38  ;;  %v3378_v60 = vrot.slane %v3376_v38, 4  ;;  %v1738_v8 = vrot.slane %v7553_v57, 5  ;;  %v5527_v38 = vcombine.low %v7275_v1, %v7289_v32 }
  0xf6   : > { %v5550_v57 = vrot.slane %v1664_v18, 9  ;;  %v5553_v32 = vrot.slane %v1667_v40, 9  ;;  %v5554_v45 = vrot.slane %v1668_v4, 9  ;;  %v6656_v18 = vld [vmem:[#allocation2 + $0x44] sm:$0x1]  ;;  %v7637_v6 = vsel %vm7065_vm15, %v5552_v20, %v1731_v16  ;;  %v6604_v4 = vld [vmem:[#allocation2 + $0x3c] sm:$0xff]  }
  0xf7   : > { %v3380_v10 = vsel %vm7065_vm15, %v3378_v60, %v3379_v0  ;;  %v6603_v0 = vld [vmem:[#allocation2 + $0x30] sm:$0xff]   ;;  %v1733_v60 = vrot.slane %v1731_v16, 4  ;;  %v1755_v19 = vrot.slane %v6656_v18, 5 }
  0xf8   : > { %v5697_v12 = vcombine.low %v3377_v25, %v3380_v10  ;;  %v6654_v25 = vld [vmem:[#allocation2 + $0x2c] sm:$0x1]  ;;  %v1740_v10 = vrot.slane %v1738_v8, 4  ;;  %v7629_v28 = vsel %vm7065_vm15, %v5550_v57, %v1717_v15  ;;  %v7641_v40 = vsel %vm7065_vm15, %v5553_v32, %v1738_v8  ;;  %v1671_v20 = vld [vmem:[#allocation2 + $0x54] sm:$0xe] }
  0xf9   : > { %v1741_v53 = vrot.slane %v6654_v25, 5  ;;  %v4034_v32 = vld [vmem:[#allocation2 + $0x18] sm:$0xf]  ;;  %v1673_v25 = vld [vmem:[#allocation2 + $0x6c] sm:$0xe] }
  0xfa   : > { %6032 = vmatmul.mubr.msk.bf16.gmra.mrb[8].mxu1 %vm1158_vm8, %v5523_v41  ;;  %6188 = vmatmul.mubr.msk.bf16.gmra.mrb[28].mxu0 %vm1158_vm8, %v5697_v12  ;;  %v1719_v41 = vrot.slane %v1717_v15, 4  ;;  %v6655_v12 = vld [vmem:[#allocation2 + $0x38] sm:$0x1]  ;;  %v4083_v18 = vshrl.u32 %v4034_v32, 16 }
  0xfb   : > { %6035 = vmatprep.mubr.msk.bf16.mxu1 %vm1158_vm8, %v5524_v49  ;;  %6193 = vmatprep.mubr.msk.bf16.mxu0 %vm1158_vm8, %v6601_v47  ;;  %v6653_v49 = vld [vmem:[#allocation2 + $0x20] sm:$0x1]  ;;  %v5555_v47 = vrot.slane %v1669_v21, 9  ;;  %v1748_v62 = vrot.slane %v6655_v12, 5  ;;  %v7649_v15 = vsel %vm7065_vm15, %v1740_v10, %v1741_v53  ;;  %v6605_v21 = vld [vmem:[#allocation2 + $0x48] sm:$0xff]  }
  0xfc   : > { %v1734_v1 = vrot.slane %v6653_v49, 5  ;;  %v7633_v35 = vsel %vm7065_vm15, %v1719_v41, %v1720_v56  ;;  %v7653_v56 = vsel %vm7065_vm15, %v5554_v45, %v1745_v37  ;;  %v1759_v41 = vrot.slane %v7574_v51, 5  ;;  %v6657_v53 = vld [vmem:[#allocation2 + $0x50] sm:$0x1]  ;;  %v1672_v10 = vld [vmem:[#allocation2 + $0x60] sm:$0xe] }
  0xfd   : > { %v7657_v16 = vsel %vm7065_vm15, %v5555_v47, %v1752_v9  ;;  %v7661_v8 = vsel %vm7065_vm15, %v1747_v34, %v1748_v62  ;;  %v7675_v49 = vsel %vm1207_vm0, %v7526_v58, 0  ;;  %v5557_v45 = vrot.slane %v1671_v20, 9  ;;  %v4035_v34 = vld [vmem:[#allocation2 + $0x1c] sm:$0xf]  ;;  %v4037_v12 = vld [vmem:[#allocation2 + $0x24] sm:$0xf] }
  0xfe   : > { %v1773_v47 = vrot.slane %v7593_v22, 5  ;;  %v5558_v58 = vrot.slane %v1672_v10, 9  ;;  %v4092_v22 = vshll.u32 %v4035_v34, 16  ;;  %v4107_v24 = vshrl.u32 %v4037_v12, 16  ;;  %v6660_v37 = vld [vmem:[#allocation2 + $0x70] sm:$0xf] }
  0xff   : > { %v4110_v51 = vshll.u32 %v4037_v12, 16  ;;  %v6661_v12 = vld [vmem:[#allocation2 + $0x74] sm:$0x1] }
 0x100   : > { %v1775_v9 = vrot.slane %v1773_v47, 4 }
 0x102   : > { %6036 = vmatmul.mubr.msk.bf16.gmra.mrb[12].mxu1 %vm1158_vm8, %v5525_v50  ;;  %6194 = vmatmul.mubr.msk.bf16.vlgmr.msra.gmra.mrb[0].mxu0 %vm1158_vm8, %v6602_v30  ;;  %v5529_v50 = vcombine.low %v7339_v46, %v7337_v54  ;;  %v6607_v30 = vld [vmem:[#allocation2 + $0x60] sm:$0xff]   ;;  %v7722_v54 = vrot.slane %v4092_v22, 5 }
 0x103   : > { %6039 = vmatprep.mubr.msk.bf16.mxu1 %vm1158_vm8, %v5526_v61  ;;  %6226 = vmatpush3.bf16.msra.mxu0 %v4565_v23  ;;  %v1670_v61 = vld [vmem:[#allocation2 + $0x48] sm:$0xe]  ;;  %v7665_v23 = vsel %vm7065_vm15, %v1754_v48, %v1755_v19  ;;  %v1761_v48 = vrot.slane %v1759_v41, 4  ;;  %v4086_v19 = vshll.u32 %v4034_v32, 16 }
 0x104   : > { %6197 = vmatprep.mubr.msk.bf16.mxu0 %vm1158_vm8, %v6603_v0  ;;  %6560 = vmatprep.subr.msk.bf16.mxu0 %vm1207_vm0, %v7613_v13  ;;  %v7645_v0 = vsel %vm7065_vm15, %v1733_v60, %v1734_v1  ;;  %v5556_v57 = vrot.slane %v1670_v61, 9  ;;  %v1766_v1 = vrot.slane %v7589_v33, 5  ;;  %v1762_v60 = vrot.slane %v6657_v53, 5  ;;  %v6659_v33 = vld [vmem:[#allocation2 + $0x68] sm:$0x1] }
 0x105   : > { %v1776_v20 = vrot.slane %v6659_v33, 5  ;;  %v4085_v33 = vrot.slane %v4083_v18, 4  ;;  %v8713_v18 = vcombine.low %v7377_v55, %v7393_v26 }
 0x106   : > { %v7694_v62 = vsel %vm7065_vm15, %v5556_v57, %v1759_v41  ;;  %v1768_v61 = vrot.slane %v1766_v1, 4  ;;  %v1780_v57 = vrot.slane %v6660_v37, 5  ;;  %v7698_v32 = vsel %vm7065_vm15, %v1761_v48, %v1762_v60 }
 0x107   : > { %v7702_v10 = vsel %vm7065_vm15, %v5557_v45, %v1766_v1  ;;  %v5559_v60 = vrot.slane %v1673_v25, 9  ;;  %v1783_v48 = vrot.slane %v6661_v12, 5  ;;  %v7716_v1 = vld [vmem:[#allocation2 + $0x20] sm:$0x1]  ;;  %v4040_v45 = vld [vmem:[#allocation2 + $0x30] sm:$0xf]  ;;  %v7729_v25 = vsel %vm7065_vm15, %v1775_v9, %v1776_v20 }
 0x108   : > { %8712 = vst [vmem:[#allocation10_spill] sm:$0xff] %v7716_v1  ;;  %v4131_v9 = vshrl.u32 %v4040_v45, 16  ;;  %v4134_v20 = vshll.u32 %v4040_v45, 16  ;;  %v6662_v12 = vld [vmem:[#allocation2 + $0x7c] sm:$0xf] }
 0x109   : > { %v7748_v26 = vsel %vm7065_vm15, %v5559_v60, %v1780_v57 }
 0x10a   : > { %6040 = vmatmul.mubr.msk.bf16.gmra.mrb[16].mxu1 %vm1158_vm8, %v5527_v38  ;;  %6198 = vmatmul.mubr.msk.bf16.gmra.mrb[4].mxu0 %vm1158_vm8, %v6604_v4  ;;  %v6658_v4 = vld [vmem:[#allocation2 + $0x5c] sm:$0x1]  ;;  %v4096_v38 = vshrl.u32 %v4035_v34, 16  ;;  %v7714_v34 = vsel %vm7065_vm15, %v5558_v58, %v1773_v47  ;;  %v1782_v58 = vrot.slane %v1780_v57, 4  ;;  %v8717_v57 = vcombine.low %v7400_v42, %v7407_v29 }
 0x10b   : > { %6043 = vmatprep.mubr.msk.bf16.mxu1 %vm1158_vm8, %v5528_v17  ;;  %6201 = vmatprep.mubr.msk.bf16.mxu0 %vm1158_vm8, %v6605_v21  ;;  %v4038_v17 = vld [vmem:[#allocation2 + $0x28] sm:$0xf]  ;;  %v1769_v53 = vrot.slane %v6658_v4, 5  ;;  %v6606_v21 = vld [vmem:[#allocation2 + $0x54] sm:$0xff]   ;;  %v4088_v4 = vrot.slane %v4086_v19, 5  ;;  %v4112_v19 = vrot.slane %v4110_v51, 5 }
 0x10c   : > { %v4116_v27 = vshll.u32 %v4038_v17, 16  ;;  %v4120_v41 = vshrl.u32 %v4038_v17, 16  ;;  %v4098_v46 = vrot.slane %v4096_v38, 4  ;;  %v7724_v17 = vld [vmem:[#allocation2 + $0x34] sm:$0xf]  ;;  %v4102_v51 = vshll.u32 %v7716_v1, 16 }
 0x10d   : > { %v7710_v37 = vsel %vm7065_vm15, %v1768_v61, %v1769_v53  ;;  %8714 = vst [vmem:[#allocation11_spill] sm:$0xff] %v7724_v17  ;;  %v7739_v38 = vld [vmem:[#allocation2 + $0x2c] sm:$0x1]  ;;  %v1674_v53 = vld [vmem:[#allocation2 + $0x78] sm:$0xe]  ;;  %v4144_v22 = vshrl.u32 %v7724_v17, 16  ;;  %v7752_v45 = vsel %vm7065_vm15, %v1782_v58, %v1783_v48 }
 0x10e   : > { %v7731_v47 = vrot.slane %v4116_v27, 5  ;;  %v4122_v61 = vrot.slane %v4120_v41, 4  ;;  %8715 = vst [vmem:[#allocation12_spill] sm:$0xff] %v7739_v38  ;;  %v4140_v27 = vshll.u32 %v7724_v17, 16  ;;  %v4126_v17 = vshll.u32 %v7739_v38, 16 }
 0x10f   : > { %v4133_v60 = vrot.slane %v4131_v9, 4  ;;  %v4136_v48 = vrot.slane %v4134_v20, 5  ;;  %v6664_v38 = vld [vmem:[#allocation2 + $0x80] sm:$0x1]  ;;  %v6665_v20 = vld [vmem:[#allocation2 + $0x8c] sm:$0x1] }
 0x110   : > { %v4123_v55 = vor.u32 %v4122_v61, %v7731_v47  ;;  %v7762_v58 = vrot.slane %v4140_v27, 5  ;;  %v4146_v61 = vrot.slane %v4144_v22, 4  ;;  %v1790_v59 = vrot.slane %v6664_v38, 5 }
 0x111   : > { %v1797_v27 = vrot.slane %v6665_v20, 5  ;;  %v4046_v20 = vld [vmem:[#allocation2 + $0x48] sm:$0xf] }
 0x112   : > { %6044 = vmatmul.mubr.msk.bf16.gmra.mrb[20].mxu1 %vm1158_vm8, %v5529_v50  ;;  %v4109_v50 = vrot.slane %v4107_v24, 4  ;;  %6202 = vmatmul.mubr.msk.bf16.gmra.mrb[8].mxu0 %vm1158_vm8, %v6606_v21  ;;  %v4089_v24 = vor.u32 %v4088_v4, %v4085_v33  ;;  %v4099_v21 = vor.u32 %v4098_v46, %v7722_v54  ;;  %v6608_v33 = vld [vmem:[#allocation2 + $0x6c] sm:$0xff]   ;;  %v6609_v4 = vld [vmem:[#allocation2 + $0x78] sm:$0xff]   ;;  %v4104_v46 = vrot.slane %v4102_v51, 5 }
 0x113   : > { %6047 = vmatprep.mubr.msk.bf16.mxu1 %vm1158_vm8, %v8713_v18  ;;  %6205 = vmatprep.mubr.msk.bf16.mxu0 %vm1158_vm8, %v6607_v30  ;;  %v1787_v18 = vrot.slane %v6662_v12, 5  ;;  %v1675_v30 = vld [vmem:[#allocation2 + $0x84] sm:$0xe]  ;;  %v4124_v42 = vrot.slane %v4123_v55, 4  ;;  %v4147_v38 = vor.u32 %v4146_v61, %v7762_v58 }
 0x114   : > { %v4113_v41 = vor.u32 %v4112_v19, %v4109_v50  ;;  %v4090_v1 = vrot.slane %v4089_v24, 4  ;;  %v5560_v50 = vrot.slane %v1674_v53, 9  ;;  %v6663_v19 = vld [vmem:[#allocation2 + $0x88] sm:$0xf]  ;;  %v8718_v24 = vcombine.low %v7419_v2, %v7434_v31  ;;  %v7771_v2 = vld [vmem:[#allocation2 + $0x40] sm:$0xf] }
 0x115   : > { %v1794_v12 = vrot.slane %v6663_v19, 5  ;;  %v4100_v51 = vrot.slane %v4099_v21, 4  ;;  %v1789_v19 = vrot.slane %v1787_v18, 4  ;;  %v5561_v9 = vrot.slane %v1675_v30, 9  ;;  %8719 = vst [vmem:[#allocation14_spill] sm:$0xff] %v7771_v2 }
 0x116   : > { %v4114_v53 = vrot.slane %v4113_v41, 4  ;;  %v4158_v21 = vshll.u32 %v4043_v14, 16  ;;  %v4095_v55 = vsel %vm6930_vm12, %v4090_v1, %v7722_v54  ;;  %v6610_v1 = vld [vmem:[#allocation2 + $0x84] sm:$0xff]   ;;  %v4182_v41 = vshll.u32 %v4046_v20, 16 }
 0x117   : > { %v1796_v22 = vrot.slane %v1794_v12, 4  ;;  %v4105_v30 = vsel %vm6930_vm12, %v4100_v51, %v4104_v46  ;;  %v7796_v46 = vsel %vm7065_vm15, %v5561_v9, %v1794_v12  ;;  %v8721_v12 = vcombine.low %v7453_v7, %v7464_v63  ;;  %v6666_v7 = vld [vmem:[#allocation2 + $0x94] sm:$0xf] }
 0x118   : > { %v4160_v51 = vrot.slane %v4158_v21, 5  ;;  %v4179_v9 = vshrl.u32 %v4046_v20, 16 }
 0x11a   : > { %6048 = vmatmul.mubr.msk.bf16.gmra.mrb[24].mxu1 %vm1158_vm8, %v8717_v57  ;;  %6206 = vmatmul.mubr.msk.bf16.gmra.mrb[12].mxu0 %vm1158_vm8, %v6608_v33  ;;  %v4128_v57 = vrot.slane %v4126_v17, 5  ;;  %v4137_v17 = vor.u32 %v4136_v48, %v4133_v60  ;;  %v4119_v33 = vsel %vm6930_vm12, %v4114_v53, %v7731_v47  ;;  %v7798_v60 = vld [vmem:[#allocation2 + $0x44] sm:$0x1]  ;;  %v4164_v47 = vshll.u32 %v7771_v2, 16  ;;  %v7806_v53 = vld [vmem:[#allocation2 + $0x4c] sm:$0xf] }
 0x11b   : > { %6051 = vmatprep.mubr.msk.bf16.mxu1 %vm1158_vm8, %v8718_v24  ;;  %6209 = vmatprep.mubr.msk.bf16.mxu0 %vm1158_vm8, %v6609_v4  ;;  %v4155_v24 = vshrl.u32 %v4043_v14, 16  ;;  %v7786_v14 = vsel %vm7065_vm15, %v5560_v50, %v1787_v18  ;;  %v7790_v4 = vsel %vm7065_vm15, %v1789_v19, %v1790_v59  ;;  %8720 = vst [vmem:[#allocation15_spill] sm:$0xff] %v7798_v60  ;;  %v4168_v18 = vshrl.u32 %v7771_v2, 16  ;;  %v6611_v50 = vld [vmem:[#allocation2 + $0x90] sm:$0xff]  }
 0x11c   : > { %v4129_v54 = vsel %vm6930_vm12, %v4124_v42, %v4128_v57  ;;  %v7804_v59 = vsel %vm7065_vm15, %v1796_v22, %v1797_v27  ;;  %v4152_v48 = vrot.slane %v4150_v52, 5  ;;  %v4138_v19 = vrot.slane %v4137_v17, 4  ;;  %v1676_v57 = vld [vmem:[#allocation2 + $0x90] sm:$0xe] }
 0x11d   : > { %v4157_v61 = vrot.slane %v4155_v24, 4  ;;  %v4148_v42 = vrot.slane %v4147_v38, 4  ;;  %v8722_v2 = vcombine.low %v7629_v28, %v7633_v35  ;;  %v7816_v52 = vcombine.low %v4095_v55, %v4105_v30  ;;  %v4049_v24 = vld [vmem:[#allocation2 + $0x54] sm:$0xf] }
 0x11e   : > { %v7818_v27 = vcombine.low %v4119_v33, %v4129_v54  ;;  %v7822_v22 = vsel %vm1207_vm0, %v7613_v13, 0  ;;  %v7827_v21 = vrot.slane %v4164_v47, 5  ;;  %v4170_v17 = vrot.slane %v4168_v18, 4 }
 0x11f   : > { %v4188_v28 = vshll.u32 %v7806_v53, 16  ;;  %v4192_v35 = vshrl.u32 %v7806_v53, 16  ;;  %v4161_v55 = vor.u32 %v4160_v51, %v4157_v61  ;;  %v4174_v38 = vshll.u32 %v7798_v60, 16  ;;  %v6612_v61 = vld [vmem:[#allocation2 + $0x9c] sm:$0xff]   ;;  %v6613_v51 = vld [vmem:[#allocation2 + $0xa8] sm:$0xff]  }
 0x120   : > { %v5562_v30 = vrot.slane %v1676_v57, 9  ;;  %v4143_v33 = vsel %vm6930_vm12, %v4138_v19, %v7762_v58  ;;  %v4153_v20 = vsel %vm6930_vm12, %v4148_v42, %v4152_v48  ;;  %v4181_v54 = vrot.slane %v4179_v9, 4  ;;  %v6667_v48 = vld [vmem:[#allocation2 + $0x98] sm:$0x1] }
 0x121   : > { %v4184_v47 = vrot.slane %v4182_v41, 5  ;;  %v4203_v18 = vshrl.u32 %v4049_v24, 16  ;;  %v4171_v57 = vor.u32 %v4170_v17, %v7827_v21  ;;  %v1801_v60 = vrot.slane %v6666_v7, 5 }
 0x122   : > { %6052 = vmatmul.mubr.msk.bf16.gmra.mrb[28].mxu1 %vm1158_vm8, %v8721_v12  ;;  %6210 = vmatmul.mubr.msk.bf16.gmra.mrb[16].mxu0 %vm1158_vm8, %v6610_v1  ;;  %v1677_v1 = vld [vmem:[#allocation2 + $0x9c] sm:$0xe]  ;;  %v4206_v12 = vshll.u32 %v4049_v24, 16  ;;  %v7845_v3 = vrot.slane %v4188_v28, 5  ;;  %v4194_v58 = vrot.slane %v4192_v35, 4  ;;  %v7847_v19 = vrot.slane %v4174_v38, 5 }
 0x123   : > { %6057 = vmatprep.mubr.msk.bf16.mxu1 %vm1158_vm8, %v8722_v2  ;;  %v7831_v2 = vld [vmem:[#allocation2 + $0x58] sm:$0xf]  ;;  %6213 = vmatprep.mubr.msk.bf16.mxu0 %vm1158_vm8, %v6611_v50  ;;  %v1804_v42 = vrot.slane %v6667_v48, 5  ;;  %v5563_v41 = vrot.slane %v1677_v1, 9  ;;  %v1808_v9 = vrot.slane %v7407_v29, 5  ;;  %v7856_v17 = vcombine.low %v4143_v33, %v4153_v20 }
 0x124   : > { %8723 = vst [vmem:[#allocation16_spill] sm:$0xff] %v7831_v2  ;;  %v4212_v50 = vshll.u32 %v7831_v2, 16  ;;  %v4216_v13 = vshrl.u32 %v7831_v2, 16  ;;  %v7850_v24 = vld [vmem:[#allocation2 + $0x50] sm:$0x1]  ;;  %v8724_v2 = vcombine.low %v7551_v11, %v7558_v36  ;;  %v7858_v7 = vrot.slane %v4161_v55, 4 }
 0x125   : > { %v7862_v28 = vsel %vm7065_vm15, %v5562_v30, %v1801_v60  ;;  %v4185_v35 = vor.u32 %v4184_v47, %v4181_v54  ;;  %v7864_v38 = vld [vmem:[#allocation2 + $0x5c] sm:$0x1]  ;;  %v8726_v29 = vcombine.low %v7637_v6, %v7645_v0  ;;  %v4205_v11 = vrot.slane %v4203_v18, 4  ;;  %v4052_v33 = vld [vmem:[#allocation2 + $0x60] sm:$0xf] }
 0x126   : > { %8725 = vst [vmem:[#allocation17_spill] sm:$0xff] %v7864_v38  ;;  %v4208_v36 = vrot.slane %v4206_v12, 5  ;;  %v4218_v55 = vrot.slane %v4216_v13, 4  ;;  %v4172_v30 = vrot.slane %v4171_v57, 4  ;;  %v1803_v20 = vrot.slane %v1801_v60, 4 }
 0x127   : > { %v4195_v1 = vor.u32 %v4194_v58, %v7845_v3  ;;  %v4198_v54 = vshll.u32 %v7850_v24, 16  ;;  %v6668_v6 = vld [vmem:[%s8673_s1 + $0x8] sm:$0x3]  ;;  %v7883_v0 = vsel %vm7065_vm15, %v5563_v41, %v1808_v9  ;;  %v1810_v13 = vrot.slane %v1808_v9, 4  ;;  %v6669_v47 = vld [vmem:[#allocation2 + $0xa4] sm:$0x1] }
 0x128   : > { %8727 = vst [vmem:[#allocation18_spill] sm:$0xff] %v7883_v0  ;;  %v1811_v60 = vrot.slane %v6669_v47, 5  ;;  %v1815_v18 = vrot.slane %v7434_v31, 5  ;;  %v4186_v12 = vrot.slane %v4185_v35, 4  ;;  %v4230_v57 = vshll.u32 %v4052_v33, 16  ;;  %v6614_v58 = vld [vmem:[#allocation2 + $0xb4] sm:$0xff]  }
 0x129   : > { %v4209_v48 = vor.u32 %v4208_v36, %v4205_v11  ;;  %v4177_v9 = vsel %vm6930_vm12, %v4172_v30, %v7847_v19  ;;  %v7897_v31 = vsel %vm7065_vm15, %v1803_v20, %v1804_v42  ;;  %v4196_v35 = vrot.slane %v4195_v1, 4  ;;  %v7899_v47 = vld [vmem:[#allocation2 + $0x64] sm:$0xf]  ;;  %v7907_v19 = vld [vmem:[#allocation2 + $0x68] sm:$0x1] }
 0x12a   : > { %6058 = vmatmul.mubr.msk.bf16.vlgmr.msra.gmra.mrb[0].mxu1 %vm1158_vm8, %v8724_v2  ;;  %v7871_v2 = vrot.slane %v4212_v50, 5  ;;  %6214 = vmatmul.mubr.msk.bf16.gmra.mrb[20].mxu0 %vm1158_vm8, %v6612_v61  ;;  %v4222_v50 = vshll.u32 %v7864_v38, 16  ;;  %v4227_v61 = vshrl.u32 %v4052_v33, 16  ;;  %v4200_v33 = vrot.slane %v4198_v54, 5  ;;  %v6615_v38 = vld [vmem:[#allocation2 + $0xc0] sm:$0xff]  }
 0x12b   : > { %6090 = vmatpush3.bf16.msra.mxu1 %v7675_v49  ;;  %6061 = vmatprep.mubr.msk.bf16.mxu1 %vm1158_vm8, %v8726_v29  ;;  %v1678_v49 = vld [vmem:[#allocation2 + $0xa8] sm:$0xe]  ;;  %v1818_v11 = vrot.slane %v7436_v44, 5  ;;  %v1822_v36 = vrot.slane %v7464_v63, 5  ;;  %v8729_v42 = vcombine.low %v7641_v40, %v7649_v15  ;;  %v4232_v1 = vrot.slane %v4230_v57, 5 }
 0x12c   : > { %6556 = vmatprep.subr.msk.bf16.mxu1 %vm1207_vm0, %v6668_v6  ;;  %6217 = vmatprep.mubr.msk.bf16.mxu0 %vm1158_vm8, %v6613_v51  ;;  %v4167_v51 = vsel %vm6930_vm12, %v7858_v7, %v7827_v21  ;;  %v4219_v41 = vor.u32 %v4218_v55, %v7871_v2  ;;  %v5564_v29 = vrot.slane %v1678_v49, 9  ;;  %v1679_v6 = vld [vmem:[#allocation2 + $0xb4] sm:$0xe]  ;;  %v7903_v21 = vsel %vm7065_vm15, %v1810_v13, %v1811_v60  ;;  %v4055_v54 = vld [vmem:[#allocation2 + $0x6c] sm:$0xf] }
 0x12d   : > { %8728 = vst [vmem:[#allocation19_spill] sm:$0xff] %v7903_v21  ;;  %v1817_v7 = vrot.slane %v1815_v18, 4  ;;  %v4191_v55 = vsel %vm6930_vm12, %v4186_v12, %v7845_v3  ;;  %v7916_v30 = vrot.slane %v4222_v50, 5  ;;  %v4229_v20 = vrot.slane %v4227_v61, 4  ;;  %v7930_v3 = vld [vmem:[#allocation2 + $0x70] sm:$0xf] }
 0x12e   : > { %v8730_v44 = vcombine.low %v7653_v56, %v7661_v8  ;;  %v7922_v63 = vrot.slane %v4209_v48, 4  ;;  %v7924_v49 = vrot.slane %v4219_v41, 4  ;;  %v7928_v40 = vsel %vm7065_vm15, %v5564_v29, %v1815_v18  ;;  %8732 = vst [vmem:[#allocation21_spill] sm:$0xff] %v7930_v3  ;;  %v6616_v41 = vld [vmem:[#allocation2 + $0xcc] sm:$0xff]  }
 0x12f   : > { %8731 = vst [vmem:[#allocation20_spill] sm:$0xff] %v7928_v40  ;;  %v5565_v15 = vrot.slane %v1679_v6, 9  ;;  %v4201_v13 = vsel %vm6930_vm12, %v4196_v35, %v4200_v33  ;;  %v1825_v56 = vrot.slane %v7466_v5, 5  ;;  %v4236_v8 = vshll.u32 %v7899_v47, 16  ;;  %v7957_v6 = vld [vmem:[#allocation2 + $0x74] sm:$0x1] }
 0x130   : > { %v4240_v60 = vshrl.u32 %v7899_v47, 16  ;;  %v7941_v18 = vsel %vm7065_vm15, %v1817_v7, %v1818_v11  ;;  %v1824_v12 = vrot.slane %v1822_v36, 4  ;;  %v4246_v50 = vshll.u32 %v7907_v19, 16  ;;  %8734 = vst [vmem:[#allocation23_spill] sm:$0xff] %v7957_v6 }
 0x131   : > { %8733 = vst [vmem:[#allocation22_spill] sm:$0xff] %v7941_v18  ;;  %v4251_v61 = vshrl.u32 %v4055_v54, 16  ;;  %v4254_v48 = vshll.u32 %v4055_v54, 16  ;;  %v4260_v5 = vshll.u32 %v7930_v3, 16  ;;  %v7947_v29 = vcombine.low %v4167_v51, %v4177_v9 }
 0x132   : > { %6062 = vmatmul.mubr.msk.bf16.gmra.mrb[4].mxu1 %vm1158_vm8, %v8729_v42  ;;  %6218 = vmatmul.mubr.msk.bf16.gmra.mrb[24].mxu0 %vm1158_vm8, %v6614_v58  ;;  %v4233_v58 = vor.u32 %v4232_v1, %v4229_v20  ;;  %v7951_v35 = vcombine.low %v4191_v55, %v4201_v13  ;;  %v7965_v9 = vrot.slane %v4236_v8, 5  ;;  %v4242_v11 = vrot.slane %v4240_v60, 4  ;;  %v4058_v42 = vld [vmem:[#allocation2 + $0x78] sm:$0xf]  ;;  %v7967_v55 = vld [vmem:[#allocation2 + $0x7c] sm:$0xf] }
 0x133   : > { %6065 = vmatprep.mubr.msk.bf16.mxu1 %vm1158_vm8, %v8730_v44  ;;  %6221 = vmatprep.mubr.msk.bf16.mxu0 %vm1158_vm8, %v6615_v38  ;;  %8735 = vst [vmem:[#allocation24_spill] sm:$0xff] %v7967_v55  ;;  %v7971_v20 = vsel %vm7065_vm15, %v5565_v15, %v1822_v36  ;;  %v7975_v1 = vsel %vm7065_vm15, %v1824_v12, %v1825_v56  ;;  %v7977_v54 = vrot.slane %v4246_v50, 5  ;;  %v4253_v44 = vrot.slane %v4251_v61, 4  ;;  %v4061_v13 = vld [vmem:[#allocation2 + $0x84] sm:$0xf] }
 0x134   : > { %v7979_v38 = vld [vmem:[#allocation2 + $0x88] sm:$0xf]  ;;  %v8737_v8 = vcombine.low %v7657_v16, %v7665_v23  ;;  %v7985_v60 = vrot.slane %v4233_v58, 4  ;;  %v4256_v51 = vrot.slane %v4254_v48, 5  ;;  %v7987_v36 = vrot.slane %v4260_v5, 5 }
 0x135   : > { %8736 = vst [vmem:[#allocation25_spill] sm:$0xff] %v7979_v38  ;;  %v4264_v15 = vshrl.u32 %v7930_v3, 16  ;;  %v4064_v56 = vld [vmem:[#allocation2 + $0x90] sm:$0xf]  ;;  %v8738_v12 = vcombine.low %v7694_v62, %v7698_v32  ;;  %v4275_v50 = vshrl.u32 %v4058_v42, 16  ;;  %v4278_v61 = vshll.u32 %v4058_v42, 16 }
 0x136   : > { %v4284_v57 = vshll.u32 %v7967_v55, 16  ;;  %v4288_v16 = vshrl.u32 %v7967_v55, 16  ;;  %v7996_v23 = vld [vmem:[#allocation2 + $0x94] sm:$0xf]  ;;  %v4243_v58 = vor.u32 %v4242_v11, %v7965_v9  ;;  %v4270_v48 = vshll.u32 %v7957_v6, 16 }
 0x137   : > { %8739 = vst [vmem:[#allocation26_spill] sm:$0xff] %v7996_v23  ;;  %v4299_v5 = vshrl.u32 %v4061_v13, 16  ;;  %v4308_v62 = vshll.u32 %v7979_v38, 16  ;;  %v4312_v32 = vshrl.u32 %v7979_v38, 16  ;;  %v4323_v42 = vshrl.u32 %v4064_v56, 16 }
 0x138   : > { %v4257_v33 = vor.u32 %v4256_v51, %v4253_v44  ;;  %v4266_v7 = vrot.slane %v4264_v15, 4  ;;  %v8005_v55 = vld [vmem:[#allocation2 + $0x80] sm:$0x1]  ;;  %v4336_v11 = vshrl.u32 %v7996_v23, 16  ;;  %v4277_v18 = vrot.slane %v4275_v50, 4 }
 0x139   : > { %v4280_v40 = vrot.slane %v4278_v61, 5  ;;  %v4290_v21 = vrot.slane %v4288_v16, 4  ;;  %v8017_v51 = vld [vmem:[#allocation2 + $0x8c] sm:$0x1]  ;;  %v4301_v44 = vrot.slane %v4299_v5, 4  ;;  %v8019_v0 = vrot.slane %v4308_v62, 5 }
 0x13a   : > { %6066 = vmatmul.mubr.msk.bf16.gmra.mrb[8].mxu1 %vm1158_vm8, %v8737_v8  ;;  %6222 = vmatmul.mubr.msk.bf16.gmra.mrb[28].mxu0 %vm1158_vm8, %v6616_v41  ;;  %v4302_v8 = vshll.u32 %v4061_v13, 16  ;;  %v4332_v41 = vshll.u32 %v7996_v23, 16  ;;  %v8009_v13 = vrot.slane %v4284_v57, 5  ;;  %v4314_v23 = vrot.slane %v4312_v32, 4  ;;  %v8021_v57 = vld [vmem:[#allocation2 + $0xa0] sm:$0xf] }
 0x13b   : > { %6069 = vmatprep.mubr.msk.bf16.mxu1 %vm1158_vm8, %v8738_v12  ;;  %6227 = vmatprep.mubr.msk.bf16.mxu0 %vm1158_vm8, %v7816_v52  ;;  %v4326_v12 = vshll.u32 %v4064_v56, 16  ;;  %v4067_v52 = vld [vmem:[#allocation2 + $0x9c] sm:$0xf]  ;;  %v8015_v56 = vrot.slane %v4243_v58, 4  ;;  %v4325_v50 = vrot.slane %v4323_v42, 4  ;;  %8740 = vst [vmem:[#allocation27_spill] sm:$0xff] %v8021_v57  ;;  %v8741_v16 = vcombine.low %v7702_v10, %v7710_v37 }
 0x13c   : > { %v4304_v15 = vrot.slane %v4302_v8, 5  ;;  %v8027_v6 = vld [vmem:[#allocation2 + $0x98] sm:$0x1]  ;;  %v8029_v58 = vrot.slane %v4332_v41, 5  ;;  %v4338_v38 = vrot.slane %v4336_v11, 4  ;;  %v4347_v3 = vshrl.u32 %v4067_v52, 16 }
 0x13d   : > { %v4328_v61 = vrot.slane %v4326_v12, 5  ;;  %8742 = vst [vmem:[#allocation28_spill] sm:$0xff] %v8027_v6  ;;  %v4350_v5 = vshll.u32 %v4067_v52, 16  ;;  %v8743_v8 = vcombine.low %v7714_v34, %v7729_v25  ;;  %v4267_v62 = vor.u32 %v4266_v7, %v7987_v36 }
 0x13e   : > { %v4281_v32 = vor.u32 %v4280_v40, %v4277_v18  ;;  %v4291_v42 = vor.u32 %v4290_v21, %v8009_v13  ;;  %v4294_v10 = vshll.u32 %v8005_v55, 16  ;;  %v4258_v37 = vrot.slane %v4257_v33, 4  ;;  %v4070_v18 = vld [vmem:[#allocation2 + $0xa8] sm:$0xf] }
 0x13f   : > { %v4272_v12 = vrot.slane %v4270_v48, 5  ;;  %v4356_v41 = vshll.u32 %v8021_v57, 16  ;;  %v4360_v11 = vshrl.u32 %v8021_v57, 16  ;;  %v4305_v34 = vor.u32 %v4304_v15, %v4301_v44 }
 0x140   : > { %v4315_v25 = vor.u32 %v4314_v23, %v8019_v0  ;;  %v4318_v21 = vshll.u32 %v8017_v51, 16  ;;  %v4342_v40 = vshll.u32 %v8027_v6, 16  ;;  %v4339_v33 = vor.u32 %v4338_v38, %v8029_v58  ;;  %v8055_v38 = vld [vmem:[#allocation2 + $0xa4] sm:$0x1] }
 0x141   : > { %v4349_v7 = vrot.slane %v4347_v3, 4  ;;  %v4352_v48 = vrot.slane %v4350_v5, 5  ;;  %v4268_v52 = vrot.slane %v4267_v62, 4  ;;  %v8049_v57 = vrot.slane %v4356_v41, 5 }
 0x142   : > { %6070 = vmatmul.mubr.msk.bf16.gmra.mrb[12].mxu1 %vm1158_vm8, %v8741_v16  ;;  %6228 = vmatmul.mubr.msk.bf16.vlgmr.msra.gmra.mrb[0].mxu0 %vm1158_vm8, %v7818_v27  ;;  %v4329_v27 = vor.u32 %v4328_v61, %v4325_v50  ;;  %v4282_v16 = vrot.slane %v4281_v32, 4  ;;  %v4371_v44 = vshrl.u32 %v4070_v18, 16  ;;  %v4374_v15 = vshll.u32 %v4070_v18, 16 }
 0x143   : > { %6073 = vmatprep.mubr.msk.bf16.mxu1 %vm1158_vm8, %v8743_v8  ;;  %6260 = vmatpush3.bf16.msra.mxu0 %v7822_v22  ;;  %v4292_v8 = vrot.slane %v4291_v42, 4  ;;  %v4296_v22 = vrot.slane %v4294_v10, 5  ;;  %v4249_v23 = vsel %vm6930_vm12, %v8015_v56, %v7977_v54  ;;  %v4306_v6 = vrot.slane %v4305_v34, 4  ;;  %v8061_v10 = vld [vmem:[#allocation2 + $0xac] sm:$0xf] }
 0x144   : > { %6231 = vmatprep.mubr.msk.bf16.mxu0 %vm1158_vm8, %v7856_v17  ;;  %v4362_v17 = vrot.slane %v4360_v11, 4  ;;  %v4316_v50 = vrot.slane %v4315_v25, 4  ;;  %v4320_v61 = vrot.slane %v4318_v21, 5  ;;  %v8744_v3 = vcombine.low %v7748_v26, %v7752_v45  ;;  %v8098_v25 = vld [vmem:[#allocation2 + $0xb0] sm:$0x1] }
 0x145   : > { %v4330_v5 = vrot.slane %v4329_v27, 4  ;;  %v4340_v62 = vrot.slane %v4339_v33, 4  ;;  %v4344_v32 = vrot.slane %v4342_v40, 5  ;;  %v4353_v42 = vor.u32 %v4352_v48, %v4349_v7  ;;  %v4073_v21 = vld [vmem:[#allocation2 + $0xb4] sm:$0xf] }
 0x146   : > { %v8745_v41 = vcombine.low %v7786_v14, %v7790_v4  ;;  %v4263_v54 = vsel %vm6930_vm12, %v4258_v37, %v7987_v36  ;;  %v4273_v26 = vsel %vm6930_vm12, %v4268_v52, %v4272_v12  ;;  %v4287_v45 = vsel %vm6930_vm12, %v4282_v16, %v8009_v13  ;;  %v8120_v27 = vld [vmem:[#allocation2 + $0xb8] sm:$0xf]  ;;  %v4764_v33 = vld [vmem:[#allocation2 + $0x48] sm:$0xe] }
 0x147   : > { %v4297_v56 = vsel %vm6930_vm12, %v4292_v8, %v4296_v22  ;;  %v4363_v14 = vor.u32 %v4362_v17, %v8049_v57  ;;  %v4366_v4 = vshll.u32 %v8055_v38, 16  ;;  %v4373_v11 = vrot.slane %v4371_v44, 4  ;;  %v4765_v8 = vld [vmem:[#allocation2 + $0x54] sm:$0xe] }
 0x148   : > { %v4376_v34 = vrot.slane %v4374_v15, 5  ;;  %v8746_v36 = vsel %vm6930_vm12, %v7924_v49, %v7916_v30  ;;  %v8747_v13 = vsel %vm6930_vm12, %v7922_v63, %v7871_v2  ;;  %v4311_v37 = vsel %vm6930_vm12, %v4306_v6, %v8019_v0 }
 0x149   : > { %v4321_v12 = vsel %vm6930_vm12, %v4316_v50, %v4320_v61  ;;  %v4335_v30 = vsel %vm6930_vm12, %v4330_v5, %v8029_v58  ;;  %v4345_v49 = vsel %vm6930_vm12, %v4340_v62, %v4344_v32  ;;  %v8106_v2 = vrot.slane %v4353_v42, 4 }
 0x14a   : > { %6074 = vmatmul.mubr.msk.bf16.gmra.mrb[16].mxu1 %vm1158_vm8, %v8744_v3  ;;  %6232 = vmatmul.mubr.msk.bf16.gmra.mrb[4].mxu0 %vm1158_vm8, %v7947_v29  ;;  %v5753_v29 = vcombine.low %v8747_v13, %v8746_v36  ;;  %v4384_v63 = vshrl.u32 %v8061_v10, 16  ;;  %v5582_v0 = vcombine.low %v7971_v20, %v7975_v1  ;;  %v8748_v6 = vsel %vm6930_vm12, %v7985_v60, %v7965_v9  ;;  %v4766_v3 = vld [vmem:[#allocation2 + $0x60] sm:$0xe] }
 0x14b   : > { %6077 = vmatprep.mubr.msk.bf16.mxu1 %vm1158_vm8, %v8745_v41  ;;  %6235 = vmatprep.mubr.msk.bf16.mxu0 %vm1158_vm8, %v7951_v35  ;;  %v4380_v35 = vshll.u32 %v8061_v10, 16  ;;  %v5754_v40 = vcombine.low %v8748_v6, %v4249_v23  ;;  %v8116_v18 = vcombine.low %v4263_v54, %v4273_v26  ;;  %v8118_v58 = vcombine.low %v4287_v45, %v4297_v56  ;;  %v4767_v26 = vld [vmem:[#allocation2 + $0x6c] sm:$0xe]  ;;  %v8752_v45 = vld [vmem:[#allocation17_spill] sm:$0xff]  ;;  %v8188_v6 = vld [vmem:[#allocation2 + $0xc4] sm:$0xf] }
 0x14c   : > { %v8122_v7 = vrot.slane %v4363_v14, 4  ;;  %v8124_v48 = vrot.slane %v4366_v4, 5  ;;  %v4377_v52 = vor.u32 %v4376_v34, %v4373_v11  ;;  %v4390_v16 = vshll.u32 %v8098_v25, 16 }
 0x14d   : > { %v8127_v22 = vcombine.low %v4311_v37, %v4321_v12  ;;  %v8129_v17 = vcombine.low %v4335_v30, %v4345_v49  ;;  %v8131_v9 = vrot.slane %v4380_v35, 5  ;;  %v4395_v60 = vshrl.u32 %v4073_v21, 16 }
 0x14e   : > { %v8749_v44 = vcombine.low %v7796_v46, %v7804_v59  ;;  %v4359_v15 = vsel %vm6930_vm12, %v8106_v2, %v8049_v57  ;;  %v4386_v23 = vrot.slane %v4384_v63, 4  ;;  %v4398_v50 = vshll.u32 %v4073_v21, 16  ;;  %v8766_v2 = vld [vmem:[#allocation26_spill] sm:$0xff] }
 0x14f   : > { %v5784_v61 = vrot.slane %v4764_v33, 9  ;;  %v8750_v5 = vcombine.low %v7862_v28, %v7897_v31  ;;  %v4404_v62 = vshll.u32 %v8120_v27, 16  ;;  %v4854_v46 = vrot.slane %v7806_v53, 5  ;;  %v8751_v28 = vld [vmem:[#allocation16_spill] sm:$0xff] }
 0x150   : > { %v4857_v59 = vrot.slane %v7850_v24, 5  ;;  %v5785_v32 = vrot.slane %v4765_v8, 9  ;;  %v4369_v42 = vsel %vm6930_vm12, %v8122_v7, %v8124_v48  ;;  %v8153_v41 = vrot.slane %v4377_v52, 4  ;;  %v8754_v52 = vld [vmem:[#allocation23_spill] sm:$0xff]  ;;  %v8755_v8 = vld [vmem:[#allocation18_spill] sm:$0xff] }
 0x151   : > { %v8155_v54 = vrot.slane %v4390_v16, 5  ;;  %v4861_v31 = vrot.slane %v8751_v28, 5  ;;  %v8161_v53 = vsel %vm7065_vm15, %v5784_v61, %v4854_v46  ;;  %v4856_v24 = vrot.slane %v4854_v46, 4  ;;  %v2506_v46 = vld [vmem:[#allocation2 + $0x78] sm:$0xf] }
 0x152   : > { %6078 = vmatmul.mubr.msk.bf16.gmra.mrb[20].mxu1 %vm1158_vm8, %v8749_v44  ;;  %6236 = vmatmul.mubr.msk.bf16.gmra.mrb[8].mxu0 %vm1158_vm8, %v5753_v29  ;;  %v4864_v56 = vrot.slane %v8752_v45, 5  ;;  %v5786_v14 = vrot.slane %v4766_v3, 9  ;;  %v4387_v4 = vor.u32 %v4386_v23, %v8131_v9  ;;  %v4868_v36 = vrot.slane %v7899_v47, 5  ;;  %v4076_v29 = vld [vmem:[#allocation2 + $0xc0] sm:$0xf]  ;;  %v8756_v44 = vld [vmem:[#allocation19_spill] sm:$0xff] }
 0x153   : > { %6081 = vmatprep.mubr.msk.bf16.mxu1 %vm1158_vm8, %v8750_v5  ;;  %6239 = vmatprep.mubr.msk.bf16.mxu0 %vm1158_vm8, %v5754_v40  ;;  %v8167_v11 = vsel %vm7065_vm15, %v5785_v32, %v4861_v31  ;;  %v4863_v34 = vrot.slane %v4861_v31, 4  ;;  %v4408_v13 = vshrl.u32 %v8120_v27, 16  ;;  %v8173_v37 = vsel %vm7065_vm15, %v4856_v24, %v4857_v59  ;;  %v8753_v40 = vld [vmem:[#allocation21_spill] sm:$0xff]  ;;  %v8758_v59 = vld [vmem:[#allocation20_spill] sm:$0xff]  ;;  %v8759_v32 = vld [vmem:[#allocation22_spill] sm:$0xff] }
 0x154   : > { %v4871_v12 = vrot.slane %v7907_v19, 5  ;;  %v5787_v35 = vrot.slane %v4767_v26, 9  ;;  %v5801_v30 = vcombine.low %v8161_v53, %v8173_v37  ;;  %v8184_v47 = vsel %vm7065_vm15, %v5786_v14, %v4868_v36  ;;  %v2512_v37 = vld [vmem:[#allocation2 + $0x90] sm:$0xf] }
 0x155   : > { %v8180_v49 = vsel %vm7065_vm15, %v4863_v34, %v4864_v56  ;;  %v4870_v63 = vrot.slane %v4868_v36, 4  ;;  %v8186_v21 = vrot.slane %v4395_v60, 4  ;;  %v4875_v33 = vrot.slane %v8753_v40, 5  ;;  %v4768_v34 = vld [vmem:[#allocation2 + $0x78] sm:$0xe] }
 0x156   : > { %v5802_v19 = vcombine.low %v8167_v11, %v8180_v49  ;;  %v4878_v16 = vrot.slane %v8754_v52, 5  ;;  %v8757_v23 = vcombine.low %v8755_v8, %v8756_v44  ;;  %v8198_v61 = vrot.slane %v4398_v50, 5  ;;  %v8227_v36 = vld [vmem:[#allocation2 + $0xbc] sm:$0x1]  ;;  %v6617_v8 = vld [vmem:[#allocation2 + $0xc] sm:$0xff]  }
 0x157   : > { %v4419_v3 = vshrl.u32 %v4076_v29, 16  ;;  %v4422_v5 = vshll.u32 %v4076_v29, 16  ;;  %v8202_v60 = vsel %vm7065_vm15, %v4870_v63, %v4871_v12  ;;  %v8760_v28 = vcombine.low %v8758_v59, %v8759_v32  ;;  %v8762_v63 = vld [vmem:[#allocation9_spill] sm:$0xff]  ;;  %v8763_v59 = vld [vmem:[#allocation24_spill] sm:$0xff] }
 0x158   : > { %v8208_v31 = vrot.slane %v4404_v62, 5  ;;  %v5803_v26 = vcombine.low %v8184_v47, %v8202_v60  ;;  %v8214_v50 = vsel %vm7065_vm15, %v5787_v35, %v4875_v33  ;;  %v4877_v24 = vrot.slane %v4875_v33, 4  ;;  %v8761_v35 = vld [vmem:[#allocation8_spill] sm:$0xff]  ;;  %v6675_v49 = vld [vmem:[#allocation2 + $0x94] sm:$0xf] }
 0x159   : > { %v4383_v45 = vsel %vm6930_vm12, %v8153_v41, %v8131_v9  ;;  %v8222_v56 = vrot.slane %v4387_v4, 4  ;;  %v4410_v62 = vrot.slane %v4408_v13, 4  ;;  %v4428_v14 = vshll.u32 %v8188_v6, 16  ;;  %v4769_v13 = vld [vmem:[#allocation2 + $0x84] sm:$0xe] }
 0x15a   : > { %6082 = vmatmul.mubr.msk.bf16.gmra.mrb[24].mxu1 %vm1158_vm8, %v8757_v23  ;;  %6240 = vmatmul.mubr.msk.bf16.gmra.mrb[12].mxu0 %vm1158_vm8, %v8116_v18  ;;  %v8231_v29 = vsel %vm7065_vm15, %v4877_v24, %v4878_v16  ;;  %v2744_v18 = vshrl.u32 %v2506_v46, 16  ;;  %v2747_v12 = vshll.u32 %v2506_v46, 16  ;;  %v2766_v4 = vsel %vm6930_vm12, %v8762_v63, %v8761_v35  ;;  %v6676_v60 = vld [vmem:[#allocation2 + $0x8c] sm:$0x1] }
 0x15b   : > { %6085 = vmatprep.mubr.msk.bf16.mxu1 %vm1158_vm8, %v8760_v28  ;;  %6243 = vmatprep.mubr.msk.bf16.mxu0 %vm1158_vm8, %v8118_v58  ;;  %v4421_v40 = vrot.slane %v4419_v3, 4  ;;  %v4424_v33 = vrot.slane %v4422_v5, 5  ;;  %v4432_v52 = vshrl.u32 %v8188_v6, 16  ;;  %v5788_v16 = vrot.slane %v4768_v34, 9  ;;  %v4079_v5 = vld [vmem:[#allocation2 + $0xcc] sm:$0xf] }
 0x15c   : > { %v2746_v44 = vrot.slane %v2744_v18, 4  ;;  %v2749_v23 = vrot.slane %v2747_v12, 5  ;;  %v4882_v32 = vrot.slane %v8763_v59, 5  ;;  %v4401_v46 = vor.u32 %v8198_v61, %v8186_v21  ;;  %v8764_v18 = vld [vmem:[#allocation25_spill] sm:$0xff]  ;;  %v8260_v34 = vld [vmem:[#allocation2 + $0xd0] sm:$0xf] }
 0x15d   : > { %v4414_v28 = vshll.u32 %v8227_v36, 16  ;;  %v4885_v24 = vrot.slane %v8005_v55, 5  ;;  %v5789_v3 = vrot.slane %v4769_v13, 9  ;;  %v4889_v12 = vrot.slane %v8764_v18, 5 }
 0x15e   : > { %v2750_v35 = vor.u32 %v2749_v23, %v2746_v44  ;;  %v8247_v63 = vsel %vm7065_vm15, %v5788_v16, %v4882_v32  ;;  %v4884_v58 = vrot.slane %v4882_v32, 4  ;;  %v4393_v55 = vsel %vm6930_vm12, %v8222_v56, %v8155_v54  ;;  %v8265_v23 = vld [vmem:[#allocation2 + $0xc8] sm:$0x1] }
 0x15f   : > { %v8258_v21 = vrot.slane %v4428_v14, 5  ;;  %v4434_v61 = vrot.slane %v4432_v52, 4  ;;  %v4892_v13 = vrot.slane %v8017_v51, 5  ;;  %v4411_v44 = vor.u32 %v4410_v62, %v8208_v31  ;;  %v8765_v52 = vld [vmem:[#allocation7_spill] sm:$0xff] }
 0x160   : > { %v4425_v20 = vor.u32 %v4424_v33, %v4421_v40  ;;  %v2751_v1 = vrot.slane %v2750_v35, 4  ;;  %v4443_v54 = vshrl.u32 %v4079_v5, 16  ;;  %v8277_v51 = vsel %vm7065_vm15, %v5789_v3, %v4889_v12 }
 0x161   : > { %v4891_v62 = vrot.slane %v4889_v12, 4  ;;  %v4446_v14 = vshll.u32 %v4079_v5, 16  ;;  %v4452_v40 = vshll.u32 %v8260_v34, 16  ;;  %v4456_v33 = vshrl.u32 %v8260_v34, 16 }
 0x162   : > { %6086 = vmatmul.mubr.msk.bf16.gmra.mrb[28].mxu1 %vm1158_vm8, %v5582_v0  ;;  %v8269_v0 = vsel %vm7065_vm15, %v4884_v58, %v4885_v24  ;;  %6244 = vmatmul.mubr.msk.bf16.gmra.mrb[16].mxu0 %vm1158_vm8, %v8127_v22  ;;  %v2756_v22 = vsel %vm6930_vm12, %v2751_v1, %v8765_v52  ;;  %v6618_v58 = vld [vmem:[#allocation2 + $0x18] sm:$0xff]   ;;  %v4438_v16 = vshll.u32 %v8265_v23, 16  ;;  %v6619_v24 = vld [vmem:[#allocation2 + $0x24] sm:$0xff]   ;;  %v4402_v3 = vrot.slane %v4401_v46, 4 }
 0x163   : > { %6091 = vmatprep.mubr.msk.bf16.mxu1 %vm1158_vm8, %v6617_v8  ;;  %v5805_v56 = vcombine.low %v8247_v63, %v8269_v0  ;;  %6247 = vmatprep.mubr.msk.bf16.mxu0 %vm1158_vm8, %v8129_v17  ;;  %v4435_v8 = vor.u32 %v4434_v61, %v8258_v21  ;;  %v8288_v59 = vcombine.low %v2756_v22, %v2766_v4  ;;  %v4770_v17 = vld [vmem:[#allocation2 + $0x90] sm:$0xe]  ;;  %v4412_v5 = vrot.slane %v4411_v44, 4  ;;  %v8311_v61 = vld [vmem:[#allocation2 + $0xd4] sm:$0x1]  ;;  %v8769_v22 = vld [vmem:[#allocation27_spill] sm:$0xff] }
 0x164   : > { %v8292_v32 = vsel %vm7065_vm15, %v4891_v62, %v4892_v13  ;;  %v4416_v35 = vrot.slane %v4414_v28, 5  ;;  %v5759_v4 = vcombine.low %v4359_v15, %v4369_v42  ;;  %v5760_v46 = vcombine.low %v4383_v45, %v4393_v55  ;;  %v4771_v42 = vld [vmem:[#allocation2 + $0x9c] sm:$0xe]  ;;  %v8768_v45 = vld [vmem:[#allocation28_spill] sm:$0xff] }
 0x165   : > { %v5806_v18 = vcombine.low %v8277_v51, %v8292_v32  ;;  %v4426_v28 = vrot.slane %v4425_v20, 4  ;;  %v4445_v12 = vrot.slane %v4443_v54, 4  ;;  %v4448_v13 = vrot.slane %v4446_v14, 5  ;;  %v8767_v62 = vld [vmem:[#allocation6_spill] sm:$0xff]  ;;  %v6679_v63 = vld [vmem:[#allocation2 + $0xac] sm:$0xf] }
 0x166   : > { %v8313_v44 = vrot.slane %v4452_v40, 5  ;;  %v4458_v7 = vrot.slane %v4456_v33, 4  ;;  %v5790_v48 = vrot.slane %v4770_v17, 9  ;;  %v4436_v1 = vrot.slane %v4435_v8, 4  ;;  %v6620_v8 = vld [vmem:[#allocation2 + $0x30] sm:$0xff]  }
 0x167   : > { %v4440_v57 = vrot.slane %v4438_v16, 5  ;;  %v4896_v15 = vrot.slane %v8766_v2, 5  ;;  %v4407_v9 = vsel %vm6930_vm12, %v4402_v3, %v8208_v31  ;;  %v4417_v41 = vsel %vm6930_vm12, %v4412_v5, %v4416_v35  ;;  %v6621_v5 = vld [vmem:[#allocation2 + $0x3c] sm:$0xff]   ;;  %v4760_v35 = vld [vmem:[#allocation2 + $0x18] sm:$0xe] }
 0x168   : > { %v4899_v55 = vrot.slane %v8768_v45, 5  ;;  %v4431_v20 = vsel %vm6930_vm12, %v4426_v28, %v8258_v21  ;;  %v4462_v54 = vshll.u32 %v8311_v61, 16  ;;  %v4449_v31 = vor.u32 %v4448_v13, %v4445_v12  ;;  %v6670_v21 = vld [vmem:[#allocation2 + $0x1c] sm:$0xf]  ;;  %v4772_v45 = vld [vmem:[#allocation2 + $0xa8] sm:$0xe] }
 0x169   : > { %v8332_v14 = vsel %vm7065_vm15, %v5790_v48, %v4896_v15  ;;  %v4898_v40 = vrot.slane %v4896_v15, 4  ;;  %v4459_v33 = vor.u32 %v4458_v7, %v8313_v44  ;;  %v5791_v52 = vrot.slane %v4771_v42, 9  ;;  %v8770_v15 = vld [vmem:[#allocation10_spill] sm:$0xff] }
 0x16a   : > { %6092 = vmatmul.mubr.msk.bf16.vlgmr.msra.gmra.mrb[0].mxu1 %vm1158_vm8, %v6618_v58  ;;  %6248 = vmatmul.mubr.msk.bf16.gmra.mrb[20].mxu0 %vm1158_vm8, %v5759_v4  ;;  %v4903_v58 = vrot.slane %v8769_v22, 5  ;;  %v4441_v16 = vsel %vm6930_vm12, %v4436_v1, %v4440_v57  ;;  %v4826_v17 = vrot.slane %v6670_v21, 5  ;;  %v4906_v3 = vrot.slane %v8055_v38, 5 }
 0x16b   : > { %6294 = vmatpush3.bf16.msra.mxu1 %v8767_v62  ;;  %6095 = vmatprep.mubr.msk.bf16.mxu1 %vm1158_vm8, %v6619_v24  ;;  %v8341_v24 = vsel %vm7065_vm15, %v4898_v40, %v4899_v55  ;;  %v5761_v12 = vcombine.low %v4407_v9, %v4417_v41  ;;  %v4464_v13 = vrot.slane %v4462_v54, 5  ;;  %v5762_v7 = vcombine.low %v4431_v20, %v4441_v16  ;;  %v4761_v9 = vld [vmem:[#allocation2 + $0x24] sm:$0xe]  ;;  %v6671_v41 = vld [vmem:[#allocation2 + $0x28] sm:$0xf]  ;;  %v6623_v16 = vld [vmem:[#allocation2 + $0x54] sm:$0xff]  }
 0x16c   : > { %6251 = vmatprep.mubr.msk.bf16.mxu0 %vm1158_vm8, %v5760_v46  ;;  %v5807_v4 = vcombine.low %v8332_v14, %v8341_v24  ;;  %v8348_v46 = vsel %vm7065_vm15, %v5791_v52, %v4903_v58  ;;  %v4905_v28 = vrot.slane %v4903_v58, 4  ;;  %v4450_v48 = vrot.slane %v4449_v31, 4  ;;  %v4773_v31 = vld [vmem:[#allocation2 + $0xb4] sm:$0xe]  ;;  %v8771_v58 = vld [vmem:[#allocation11_spill] sm:$0xff] }
 0x16d   : > { %v4460_v1 = vrot.slane %v4459_v33, 4  ;;  %v5780_v38 = vrot.slane %v4760_v35, 9  ;;  %v4828_v2 = vrot.slane %v4826_v17, 4  ;;  %v4829_v42 = vrot.slane %v8770_v15, 5  ;;  %v6622_v33 = vld [vmem:[#allocation2 + $0x48] sm:$0xff]  }
 0x16e   : > { %v8352_v57 = vsel %vm7065_vm15, %v4905_v28, %v4906_v3  ;;  %v4833_v55 = vrot.slane %v6671_v41, 5  ;;  %v4455_v20 = vsel %vm6930_vm12, %v4450_v48, %v8313_v44  ;;  %v5792_v40 = vrot.slane %v4772_v45, 9  ;;  %v4762_v3 = vld [vmem:[#allocation2 + $0x30] sm:$0xe]  ;;  %v4774_v14 = vld [vmem:[#allocation2 + $0xc0] sm:$0xe] }
 0x16f   : > { %v5808_v62 = vcombine.low %v8348_v46, %v8352_v57  ;;  %v4465_v54 = vsel %vm6930_vm12, %v4460_v1, %v4464_v13  ;;  %v4827_v52 = vsel %vm7065_vm15, %v5780_v38, %v4826_v17  ;;  %v4830_v22 = vsel %vm7065_vm15, %v4828_v2, %v4829_v42 }
 0x170   : > { %v5781_v21 = vrot.slane %v4761_v9, 9  ;;  %v4913_v44 = vrot.slane %v8098_v25, 5  ;;  %v5763_v35 = vcombine.low %v4455_v20, %v4465_v54  ;;  %v4835_v28 = vrot.slane %v4833_v55, 4 }
 0x171   : > { %v5797_v48 = vcombine.low %v4827_v52, %v4830_v22  ;;  %v4917_v38 = vrot.slane %v8120_v27, 5  ;;  %v5782_v2 = vrot.slane %v4762_v3, 9  ;;  %v4920_v25 = vrot.slane %v8227_v36, 5  ;;  %v8774_v27 = vld [vmem:[#allocation14_spill] sm:$0xff]  ;;  %v6625_v3 = vld [vmem:[#allocation2 + $0x6c] sm:$0xff]  }
 0x172   : > { %6096 = vmatmul.mubr.msk.bf16.gmra.mrb[4].mxu1 %vm1158_vm8, %v6620_v8  ;;  %6252 = vmatmul.mubr.msk.bf16.gmra.mrb[24].mxu0 %vm1158_vm8, %v5761_v12  ;;  %v4840_v8 = vrot.slane %v8771_v58, 5  ;;  %v8772_v12 = vld [vmem:[#allocation12_spill] sm:$0xff]  ;;  %v4847_v20 = vrot.slane %v8774_v27, 5  ;;  %v4834_v36 = vsel %vm7065_vm15, %v5781_v21, %v4833_v55  ;;  %v6624_v52 = vld [vmem:[#allocation2 + $0x60] sm:$0xff]   ;;  %v2795_v11 = vshll.u32 %v2512_v37, 16 }
 0x173   : > { %6099 = vmatprep.mubr.msk.bf16.mxu1 %vm1158_vm8, %v6621_v5  ;;  %6255 = vmatprep.mubr.msk.bf16.mxu0 %vm1158_vm8, %v5762_v7  ;;  %v4910_v5 = vrot.slane %v8061_v10, 5  ;;  %v4836_v13 = vrot.slane %v8772_v12, 5  ;;  %v5793_v7 = vrot.slane %v4773_v31, 9  ;;  %v8773_v10 = vld [vmem:[#allocation13_spill] sm:$0xff]  ;;  %v4919_v41 = vrot.slane %v4917_v38, 4 }
 0x174   : > { %v4842_v15 = vrot.slane %v4840_v8, 4  ;;  %v4843_v42 = vrot.slane %v8773_v10, 5  ;;  %v4763_v31 = vld [vmem:[#allocation2 + $0x3c] sm:$0xe]  ;;  %v4841_v22 = vsel %vm7065_vm15, %v5782_v2, %v4840_v8  ;;  %v4775_v12 = vld [vmem:[#allocation2 + $0xcc] sm:$0xe] }
 0x175   : > { %v8376_v17 = vsel %vm7065_vm15, %v5792_v40, %v4910_v5  ;;  %v4912_v1 = vrot.slane %v4910_v5, 4  ;;  %v8389_v9 = vsel %vm7065_vm15, %v5793_v7, %v4917_v38  ;;  %v4837_v40 = vsel %vm7065_vm15, %v4835_v28, %v4836_v13  ;;  %v6626_v38 = vld [vmem:[#allocation2 + $0x78] sm:$0xff]  }
 0x176   : > { %v4844_v58 = vsel %vm7065_vm15, %v4842_v15, %v4843_v42  ;;  %v5798_v55 = vcombine.low %v4834_v36, %v4837_v40  ;;  %v5783_v21 = vrot.slane %v4763_v31, 9  ;;  %v4849_v5 = vrot.slane %v4847_v20, 4  ;;  %v6627_v15 = vld [vmem:[#allocation2 + $0x84] sm:$0xff]  }
 0x177   : > { %v8385_v45 = vsel %vm7065_vm15, %v4912_v1, %v4913_v44  ;;  %v8775_v44 = vld [vmem:[#allocation15_spill] sm:$0xff]  ;;  %v5799_v28 = vcombine.low %v4841_v22, %v4844_v58  ;;  %v5795_v7 = vrot.slane %v4775_v12, 9  ;;  %v4931_v1 = vrot.slane %v8260_v34, 5 }
 0x178   : > { %v5809_v54 = vcombine.low %v8376_v17, %v8385_v45  ;;  %v4848_v8 = vsel %vm7065_vm15, %v5783_v21, %v4847_v20  ;;  %v4934_v2 = vrot.slane %v8311_v61, 5  ;;  %v6672_v20 = vld [vmem:[#allocation2 + $0x70] sm:$0xf]  ;;  %v2509_v21 = vld [vmem:[#allocation2 + $0x84] sm:$0xf]  ;;  %v2849_v0 = vshll.u32 %v6679_v63, 16 }
 0x179   : > { %v4933_v27 = vrot.slane %v4931_v1, 4  ;;  %v2729_v36 = vshll.u32 %v6672_v20, 16  ;;  %v2733_v40 = vshrl.u32 %v6672_v20, 16  ;;  %v2768_v12 = vshrl.u32 %v2509_v21, 16 }
 0x17a   : > { %6100 = vmatmul.mubr.msk.bf16.gmra.mrb[8].mxu1 %vm1158_vm8, %v6622_v33  ;;  %6256 = vmatmul.mubr.msk.bf16.gmra.mrb[28].mxu0 %vm1158_vm8, %v5763_v35  ;;  %v8402_v33 = vsel %vm7065_vm15, %v4919_v41, %v4920_v25  ;;  %v4850_v35 = vrot.slane %v8775_v44, 5  ;;  %v8423_v41 = vsel %vm7065_vm15, %v5795_v7, %v4931_v1  ;;  %v4924_v51 = vrot.slane %v8188_v6, 5 }
 0x17b   : > { %6103 = vmatprep.mubr.msk.bf16.mxu1 %vm1158_vm8, %v6623_v16  ;;  %6261 = vmatprep.mubr.msk.bf16.mxu0 %vm1158_vm8, %v5797_v48  ;;  %v5810_v16 = vcombine.low %v8389_v9, %v8402_v33  ;;  %v2503_v48 = vld [vmem:[#allocation2 + $0x6c] sm:$0xf]  ;;  %v8428_v34 = vsel %vm7065_vm15, %v4933_v27, %v4934_v2  ;;  %v2731_v22 = vrot.slane %v2729_v36, 5  ;;  %v2735_v58 = vrot.slane %v2733_v40, 4  ;;  %v6631_v27 = vld [vmem:[#allocation2 + $0xb4] sm:$0xff]  }
 0x17c   : > { %v4851_v13 = vsel %vm7065_vm15, %v4849_v5, %v4850_v35  ;;  %v2720_v42 = vshrl.u32 %v2503_v48, 16  ;;  %v2723_v25 = vshll.u32 %v2503_v48, 16  ;;  %v5812_v61 = vcombine.low %v8423_v41, %v8428_v34  ;;  %v6673_v35 = vld [vmem:[#allocation2 + $0x74] sm:$0x1]  ;;  %v6630_v48 = vld [vmem:[#allocation2 + $0xa8] sm:$0xff]  }
 0x17d   : > { %v5800_v10 = vcombine.low %v4848_v8, %v4851_v13  ;;  %v2736_v44 = vor.u32 %v2735_v58, %v2731_v22  ;;  %v2771_v8 = vshll.u32 %v2509_v21, 16  ;;  %v6674_v13 = vld [vmem:[#allocation2 + $0x88] sm:$0xf]  ;;  %v2770_v2 = vrot.slane %v2768_v12, 4 }
 0x17e   : > { %v2722_v31 = vrot.slane %v2720_v42, 4  ;;  %v2777_v7 = vshll.u32 %v6674_v13, 16  ;;  %v2781_v53 = vshrl.u32 %v6674_v13, 16  ;;  %v2792_v42 = vshrl.u32 %v2512_v37, 16 }
 0x17f   : > { %v2737_v1 = vrot.slane %v2736_v44, 4  ;;  %v2805_v36 = vshrl.u32 %v6675_v49, 16  ;;  %v8776_v12 = vcombine.low %v8214_v50, %v8231_v29  ;;  %vm5230_vm0 = vcmask 64512  }
 0x180   : > { %v2783_v20 = vrot.slane %v2781_v53, 4 }
 0x182   : > { %6104 = vmatmul.mubr.msk.bf16.gmra.mrb[12].mxu1 %vm1158_vm8, %v6624_v52  ;;  %6262 = vmatmul.mubr.msk.bf16.vlgmr.msra.gmra.mrb[0].mxu0 %vm1158_vm8, %v5798_v55  ;;  %v2725_v52 = vrot.slane %v2723_v25, 5  ;;  %v6629_v55 = vld [vmem:[#allocation2 + $0x9c] sm:$0xff]  }
 0x183   : > { %6107 = vmatprep.mubr.msk.bf16.mxu1 %vm1158_vm8, %v6625_v3  ;;  %6265 = vmatprep.mubr.msk.bf16.mxu0 %vm1158_vm8, %v5799_v28  ;;  %v6628_v3 = vld [vmem:[#allocation2 + $0x90] sm:$0xff]   ;;  %v2739_v28 = vshll.u32 %v6673_v35, 16  ;;  %v2515_v25 = vld [vmem:[#allocation2 + $0x9c] sm:$0xf]  ;;  %v2797_v35 = vrot.slane %v2795_v11, 5 }
 0x184   : > { %v2726_v5 = vor.u32 %v2725_v52, %v2722_v31  ;;  %v2816_v31 = vshrl.u32 %v2515_v25, 16  ;;  %v2819_v52 = vshll.u32 %v2515_v25, 16  ;;  %v2521_v11 = vld [vmem:[#allocation2 + $0xb4] sm:$0xf] }
 0x186   : > { %v2818_v53 = vrot.slane %v2816_v31, 4  ;;  %v2821_v37 = vrot.slane %v2819_v52, 5 }
 0x18a   : > { %6108 = vmatmul.mubr.msk.bf16.gmra.mrb[16].mxu1 %vm1158_vm8, %v6626_v38  ;;  %6266 = vmatmul.mubr.msk.bf16.gmra.mrb[4].mxu0 %vm1158_vm8, %v5800_v10  ;;  %v2741_v38 = vrot.slane %v2739_v28, 5  ;;  %v8448_v10 = vrot.slane %v2777_v7, 5  ;;  %v2807_v28 = vrot.slane %v2805_v36, 4 }
 0x18b   : > { %6111 = vmatprep.mubr.msk.bf16.mxu1 %vm1158_vm8, %v6627_v15  ;;  %6269 = vmatprep.mubr.msk.bf16.mxu0 %vm1158_vm8, %v5801_v30  ;;  %v2727_v30 = vrot.slane %v2726_v5, 4  ;;  %v2773_v15 = vrot.slane %v2771_v8, 5  ;;  %v2518_v8 = vld [vmem:[#allocation2 + $0xa8] sm:$0xf] }
 0x18c   : > { %v2742_v47 = vsel %vm6930_vm12, %v2737_v1, %v2741_v38  ;;  %v2784_v44 = vor.u32 %v2783_v20, %v8448_v10  ;;  %v6678_v1 = vld [vmem:[#allocation2 + $0x98] sm:$0x1]  ;;  %v2840_v25 = vshrl.u32 %v2518_v8, 16  ;;  %v2843_v20 = vshll.u32 %v2518_v8, 16 }
 0x18d   : > { %v2732_v40 = vsel %vm6930_vm12, %v2727_v30, %v2731_v22  ;;  %v2774_v58 = vor.u32 %v2773_v15, %v2770_v2  ;;  %v6632_v30 = vld [vmem:[#allocation2 + $0xc0] sm:$0xff]   ;;  %v2811_v38 = vshll.u32 %v6678_v1, 16  ;;  %v6682_v1 = vld [vmem:[#allocation2 + $0xb0] sm:$0x1] }
 0x18e   : > { %v5641_v13 = vcombine.low %v2732_v40, %v2742_v47  ;;  %v2785_v50 = vrot.slane %v2784_v44, 4  ;;  %v6680_v40 = vld [vmem:[#allocation2 + $0xa4] sm:$0x1]  ;;  %v2842_v52 = vrot.slane %v2840_v25, 4  ;;  %v2845_v44 = vrot.slane %v2843_v20, 5 }
 0x18f   : > { %v2835_v47 = vshll.u32 %v6680_v40, 16 }
 0x191   : > { %v2837_v8 = vrot.slane %v2835_v47, 5 }
 0x192   : > { %6112 = vmatmul.mubr.msk.bf16.gmra.mrb[20].mxu1 %vm1158_vm8, %v6628_v3  ;;  %6270 = vmatmul.mubr.msk.bf16.gmra.mrb[8].mxu0 %vm1158_vm8, %v5802_v19  ;;  %v2801_v19 = vshll.u32 %v6675_v49, 16  ;;  %v2794_v3 = vrot.slane %v2792_v42, 4 }
 0x193   : > { %6115 = vmatprep.mubr.msk.bf16.mxu1 %vm1158_vm8, %v6629_v55  ;;  %6273 = vmatprep.mubr.msk.bf16.mxu0 %vm1158_vm8, %v5803_v26  ;;  %v2787_v26 = vshll.u32 %v6676_v60, 16  ;;  %v6677_v55 = vld [vmem:[#allocation2 + $0xa0] sm:$0xf] }
 0x194   : > { %v2825_v21 = vshll.u32 %v6677_v55, 16  ;;  %v2829_v5 = vshrl.u32 %v6677_v55, 16  ;;  %v8457_v22 = vrot.slane %v2801_v19, 5  ;;  %v2798_v29 = vor.u32 %v2797_v35, %v2794_v3  ;;  %v6681_v3 = vld [vmem:[#allocation2 + $0xb8] sm:$0xf] }
 0x195   : > { %v2789_v7 = vrot.slane %v2787_v26, 5  ;;  %v2813_v19 = vrot.slane %v2811_v38, 5  ;;  %v2873_v55 = vshll.u32 %v6681_v3, 16  ;;  %v8486_v35 = vrot.slane %v2849_v0, 5  ;;  %v6684_v0 = vld [vmem:[#allocation2 + $0xbc] sm:$0x1] }
 0x196   : > { %v8467_v2 = vrot.slane %v2825_v21, 5  ;;  %v2831_v15 = vrot.slane %v2829_v5, 4  ;;  %v2808_v42 = vor.u32 %v2807_v28, %v8457_v22  ;;  %v2799_v26 = vrot.slane %v2798_v29, 4 }
 0x197   : > { %v2790_v60 = vsel %vm6930_vm12, %v2785_v50, %v2789_v7  ;;  %v2877_v21 = vshrl.u32 %v6681_v3, 16  ;;  %v2875_v7 = vrot.slane %v2873_v55, 5  ;;  %v2859_v38 = vshll.u32 %v6682_v1, 16 }
 0x198   : > { %v2832_v36 = vor.u32 %v2831_v15, %v8467_v2  ;;  %v2809_v31 = vrot.slane %v2808_v42, 4  ;;  %v5794_v15 = vrot.slane %v4774_v14, 9  ;;  %v4926_v50 = vrot.slane %v4924_v51, 4 }
 0x199   : > { %v4927_v29 = vrot.slane %v8265_v23, 5 }
 0x19a   : > { %6116 = vmatmul.mubr.msk.bf16.gmra.mrb[24].mxu1 %vm1158_vm8, %v6630_v48  ;;  %6274 = vmatmul.mubr.msk.bf16.gmra.mrb[12].mxu0 %vm1158_vm8, %v8776_v12  ;;  %v2775_v48 = vrot.slane %v2774_v58, 4  ;;  %v2864_v58 = vshrl.u32 %v2521_v11, 16  ;;  %v2833_v12 = vrot.slane %v2832_v36, 4  ;;  %v4925_v40 = vsel %vm7065_vm15, %v5794_v15, %v4924_v51 }
 0x19b   : > { %6119 = vmatprep.mubr.msk.bf16.mxu1 %vm1158_vm8, %v6631_v27  ;;  %6277 = vmatprep.mubr.msk.bf16.mxu0 %vm1158_vm8, %v5805_v56  ;;  %v2822_v27 = vor.u32 %v2821_v37, %v2818_v53  ;;  %v2853_v56 = vshrl.u32 %v6679_v63, 16  ;;  %v2879_v53 = vrot.slane %v2877_v21, 4  ;;  %v2524_v37 = vld [vmem:[#allocation2 + $0xc0] sm:$0xf]  ;;  %v4928_v46 = vsel %vm7065_vm15, %v4926_v50, %v4927_v29 }
 0x19c   : > { %v2780_v49 = vsel %vm6930_vm12, %v2775_v48, %v8448_v10  ;;  %v2867_v10 = vshll.u32 %v2521_v11, 16  ;;  %v2866_v24 = vrot.slane %v2864_v58, 4  ;;  %v2846_v48 = vor.u32 %v2845_v44, %v2842_v52 }
 0x19d   : > { %v2823_v5 = vrot.slane %v2822_v27, 4  ;;  %v2855_v28 = vrot.slane %v2853_v56, 4  ;;  %v5643_v32 = vcombine.low %v2780_v49, %v2790_v60  ;;  %v2888_v42 = vshrl.u32 %v2524_v37, 16 }
 0x19e   : > { %v2891_v25 = vshll.u32 %v2524_v37, 16  ;;  %v2880_v63 = vor.u32 %v2879_v53, %v2875_v7  ;;  %v2883_v56 = vshll.u32 %v6684_v0, 16  ;;  %v2847_v23 = vrot.slane %v2846_v48, 4 }
 0x19f   : > { %v2856_v6 = vor.u32 %v2855_v28, %v8486_v35  ;;  %v2890_v57 = vrot.slane %v2888_v42, 4  ;;  %v5811_v58 = vcombine.low %v4925_v40, %v4928_v46 }
 0x1a0   : > { %v2885_v52 = vrot.slane %v2883_v56, 5  ;;  %v2852_v17 = vsel %vm6930_vm12, %v2847_v23, %v8486_v35 }
 0x1a1   : > { %v2857_v36 = vrot.slane %v2856_v6, 4 }
 0x1a2   : > { %6120 = vmatmul.mubr.msk.bf16.gmra.mrb[28].mxu1 %vm1158_vm8, %v6632_v30  ;;  %6278 = vmatmul.mubr.msk.bf16.gmra.mrb[16].mxu0 %vm1158_vm8, %v5806_v18  ;;  %v2804_v18 = vsel %vm6930_vm12, %v2799_v26, %v8457_v22  ;;  %v2828_v30 = vsel %vm6930_vm12, %v2823_v5, %v8467_v2  ;;  %v2838_v22 = vsel %vm6930_vm12, %v2833_v12, %v2837_v8  ;;  %v6683_v2 = vld [vmem:[#allocation2 + $0xc4] sm:$0xf] }
 0x1a3   : > { %6141 = vmatprep.mubr.msk.bf16.mxu1 %vm1158_vm8, %v5641_v13  ;;  %6281 = vmatprep.mubr.msk.bf16.mxu0 %vm1158_vm8, %v5807_v4  ;;  %v2814_v13 = vsel %vm6930_vm12, %v2809_v31, %v2813_v19  ;;  %v2869_v4 = vrot.slane %v2867_v10, 5  ;;  %v2897_v27 = vshll.u32 %v6683_v2, 16  ;;  %v2901_v20 = vshrl.u32 %v6683_v2, 16  ;;  %v6685_v10 = vld [vmem:[#allocation2 + $0xc8] sm:$0x1] }
 0x1a4   : > { %v5644_v11 = vcombine.low %v2804_v18, %v2814_v13  ;;  %v5645_v49 = vcombine.low %v2828_v30, %v2838_v22  ;;  %v2861_v19 = vrot.slane %v2859_v38, 5  ;;  %v2881_v31 = vrot.slane %v2880_v63, 4 }
 0x1a5   : > { %v2899_v47 = vrot.slane %v2897_v27, 5  ;;  %v2903_v60 = vrot.slane %v2901_v20, 4  ;;  %v2907_v3 = vshll.u32 %v6685_v10, 16 }
 0x1a6   : > { %v2862_v39 = vsel %vm6930_vm12, %v2857_v36, %v2861_v19  ;;  %v2886_v21 = vsel %vm6930_vm12, %v2881_v31, %v2885_v52 }
 0x1a7   : > { %v5646_v5 = vcombine.low %v2852_v17, %v2862_v39  ;;  %v2909_v12 = vrot.slane %v2907_v3, 5 }
 0x1aa   : > { %6142 = vmatmul.mubr.msk.bf16.vlgmr.msra.gmra.mrb[16].mxu1 %vm1158_vm8, %v8288_v59  ;;  %6282 = vmatmul.mubr.msk.bf16.gmra.mrb[20].mxu0 %vm1158_vm8, %v5808_v62  ;;  %v2870_v59 = vor.u32 %v2869_v4, %v2866_v24  ;;  %v2893_v62 = vrot.slane %v2891_v25, 5 }
 0x1ab   : > { %6145 = vmatprep.mubr.msk.bf16.mxu1 %vm1158_vm8, %v5643_v32  ;;  %6285 = vmatprep.mubr.msk.bf16.mxu0 %vm1158_vm8, %v5809_v54  ;;  %v2904_v54 = vor.u32 %v2903_v60, %v2899_v47 }
 0x1ac   : > { %v2871_v26 = vrot.slane %v2870_v59, 4  ;;  %v2894_v45 = vor.u32 %v2893_v62, %v2890_v57 }
 0x1ad   : > { %v2905_v28 = vrot.slane %v2904_v54, 4 }
 0x1ae   : > { %v2876_v55 = vsel %vm6930_vm12, %v2871_v26, %v2875_v7  ;;  %v2895_v35 = vrot.slane %v2894_v45, 4 }
 0x1af   : > { %v5647_v44 = vcombine.low %v2876_v55, %v2886_v21  ;;  %v2910_v33 = vsel %vm6930_vm12, %v2905_v28, %v2909_v12 }
 0x1b0   : > { %v2900_v9 = vsel %vm6930_vm12, %v2895_v35, %v2899_v47 }
 0x1b2   : > { %6146 = vmatmul.mubr.msk.bf16.gmra.mrb[20].mxu1 %vm1158_vm8, %v5644_v11  ;;  %6286 = vmatmul.mubr.msk.bf16.gmra.mrb[24].mxu0 %vm1158_vm8, %v5810_v16  ;;  %v5648_v16 = vcombine.low %v2900_v9, %v2910_v33 }
 0x1b3   : > { %6149 = vmatprep.mubr.msk.bf16.mxu1 %vm1158_vm8, %v5645_v49  ;;  %6289 = vmatprep.mubr.msk.bf16.mxu0 %vm1158_vm8, %v5811_v58 }
 0x1ba   : > { %6150 = vmatmul.mubr.msk.bf16.gmra.mrb[24].mxu1 %vm1158_vm8, %v5646_v5  ;;  %6290 = vmatmul.mubr.msk.bf16.gmra.mrb[28].mxu0 %vm1158_vm8, %v5812_v61 }
 0x1bb   : > { %6153 = vmatprep.mubr.msk.bf16.mxu1 %vm1158_vm8, %v5647_v44 }
 0x1c2   : > { %6154 = vmatmul.mubr.msk.bf16.gmra.mrb[28].mxu1 %vm1158_vm8, %v5648_v16 }
 0x23d   : > { %v6093_v8 = vpop.f32.mrb[0].mxu1 }
 0x23e   : > { %v2320_v51 = vpop.f32.mrb[1].mxu1 }
 0x23f   : > { %v6094_v32 = vpop.f32.mrb[2].mxu1 }
 0x240   : > { %v2323_v18 = vpop.f32.mrb[3].mxu1 }
 0x245   : > { %v6097_v13 = vpop.f32.mrb[4].mxu1 }
 0x246   : > { %v2336_v14 = vpop.f32.mrb[5].mxu1 }
 0x247   : > { %v6098_v24 = vpop.f32.mrb[6].mxu1 }
 0x248   : > { %v2339_v4 = vpop.f32.mrb[7].mxu1 }
 0x24d   : > { %v6101_v7 = vpop.f32.mrb[8].mxu1 }
 0x24e   : > { %v2352_v53 = vpop.f32.mrb[9].mxu1 }
 0x24f   : > { %v8543_v43 = vpop.f32.mrb[10].mxu1 }
 0x250   : > { %v8545_v37 = vpop.f32.mrb[11].mxu1 }
 0x255   : > { %v8547_v41 = vpop.f32.mrb[12].mxu1  ;;  %v6263_v30 = vpop.f32.mrb[0].mxu0 }
 0x256   : > { %v8549_v34 = vpop.f32.mrb[13].mxu1  ;;  %v6295_v6 = vadd.f32 %v6263_v30, %v6093_v8  ;;  %v5071_v1 = vpop.f32.mrb[1].mxu0 }
 0x257   : > { %v8551_v61 = vpop.f32.mrb[14].mxu1  ;;  %v6296_v38 = vadd.f32 %v5071_v1, %v2320_v51  ;;  %v6264_v22 = vpop.f32.mrb[2].mxu0 }
 0x258   : > { %v8553_v48 = vpop.f32.mrb[15].mxu1  ;;  %v6297_v15 = vadd.f32 %v6264_v22, %v6094_v32  ;;  %v5074_v50 = vpop.f32.mrb[3].mxu0  ;;  %v5302_v25 = vmul.f32 %v6295_v6, %v6295_v6  ;;  %v5234_v0 = vsel %vm5230_vm0, %v6295_v6, 0.0 }
 0x259   : > { %v5300_v29 = vmul.f32 %v6296_v38, %v6296_v38  ;;  %v6298_v42 = vadd.f32 %v5074_v50, %v2323_v18  ;;  %v5231_v2 = vsel %vm5230_vm0, %v6296_v38, 0.0 }
 0x25a   : > { %v5303_v59 = vmul.f32 %v6297_v15, %v6297_v15  ;;  %v5335_v46 = vsel %vm5230_vm0, %v5302_v25, 0.0  ;;  %v5236_v57 = vsel %vm5230_vm0, %v6297_v15, 0.0 }
 0x25b   : > { %v5232_v27 = vsel %vm5230_vm0, %v6298_v42, 0.0  ;;  %v5301_v20 = vmul.f32 %v6298_v42, %v6298_v42  ;;  %v5332_v56 = vsel %vm5230_vm0, %v5300_v29, 0.0 }
 0x25c   : > { %v5233_v63 = vadd.f32 %v5232_v27, %v5231_v2  ;;  %v5337_v60 = vsel %vm5230_vm0, %v5303_v59, 0.0 }
 0x25d   : > { %v5333_v11 = vsel %vm5230_vm0, %v5301_v20, 0.0  ;;  %v6267_v49 = vpop.f32.mrb[4].mxu0 }
 0x25e   : > { %v5235_v19 = vadd.f32 %v5234_v0, %v5233_v63  ;;  %v5334_v23 = vadd.f32 %v5333_v11, %v5332_v56  ;;  %v6299_v36 = vadd.f32 %v6267_v49, %v6097_v13  ;;  %v5087_v40 = vpop.f32.mrb[5].mxu0 }
 0x25f   : > { %v6300_v62 = vadd.f32 %v5087_v40, %v2336_v14  ;;  %v6268_v47 = vpop.f32.mrb[6].mxu0 }
 0x260   : > { %v5336_v26 = vadd.f32 %v5335_v46, %v5334_v23  ;;  %v5237_v31 = vadd.f32 %v5236_v57, %v5235_v19  ;;  %v5090_v52 = vpop.f32.mrb[7].mxu0  ;;  %v6301_v39 = vadd.f32 %v6268_v47, %v6098_v24  ;;  %v5306_v21 = vmul.f32 %v6299_v36, %v6299_v36 }
 0x261   : > { %v5238_v58 = vsel %vm5230_vm0, %v6300_v62, 0.0  ;;  %v5304_v17 = vmul.f32 %v6300_v62, %v6300_v62  ;;  %v6302_v45 = vadd.f32 %v5090_v52, %v2339_v4  ;;  %v5242_v28 = vsel %vm5230_vm0, %v6299_v36, 0.0 }
 0x262   : > { %v5239_v54 = vadd.f32 %v5238_v58, %v5237_v31  ;;  %v5338_v10 = vadd.f32 %v5337_v60, %v5336_v26  ;;  %v5307_v9 = vmul.f32 %v6301_v39, %v6301_v39  ;;  %v5244_v32 = vsel %vm5230_vm0, %v6301_v39, 0.0 }
 0x263   : > { %v5339_v3 = vsel %vm5230_vm0, %v5304_v17, 0.0  ;;  %v5240_v55 = vsel %vm5230_vm0, %v6302_v45, 0.0  ;;  %v5305_v35 = vmul.f32 %v6302_v45, %v6302_v45  ;;  %v5343_v24 = vsel %vm5230_vm0, %v5306_v21, 0.0 }
 0x264   : > { %v5340_v5 = vadd.f32 %v5339_v3, %v5338_v10  ;;  %v5241_v44 = vadd.f32 %v5240_v55, %v5239_v54 }
 0x265   : > { %v6271_v12 = vpop.f32.mrb[8].mxu0  ;;  %v5341_v16 = vsel %vm5230_vm0, %v5305_v35, 0.0 }
 0x266   : > { %v5243_v33 = vadd.f32 %v5242_v28, %v5241_v44  ;;  %v6303_v8 = vadd.f32 %v6271_v12, %v6101_v7  ;;  %v5103_v51 = vpop.f32.mrb[9].mxu0  ;;  %v5342_v18 = vadd.f32 %v5341_v16, %v5340_v5  ;;  %v5345_v7 = vsel %vm5230_vm0, %v5307_v9, 0.0 }
 0x267   : > { %v6304_v13 = vadd.f32 %v5103_v51, %v2352_v53  ;;  %v6272_v14 = vpop.f32.mrb[10].mxu0 }
 0x268   : > { %v5245_v4 = vadd.f32 %v5244_v32, %v5243_v33  ;;  %v6305_v30 = vadd.f32 %v6272_v14, %v8543_v43  ;;  %v5106_v6 = vpop.f32.mrb[11].mxu0  ;;  %v5344_v1 = vadd.f32 %v5343_v24, %v5342_v18  ;;  %v5310_v2 = vmul.f32 %v6303_v8, %v6303_v8 }
 0x269   : > { %v5246_v38 = vsel %vm5230_vm0, %v6304_v13, 0.0  ;;  %v5308_v22 = vmul.f32 %v6304_v13, %v6304_v13  ;;  %v6306_v15 = vadd.f32 %v5106_v6, %v8545_v37  ;;  %v5250_v43 = vsel %vm5230_vm0, %v6303_v8, 0.0 }
 0x26a   : > { %v5247_v50 = vadd.f32 %v5246_v38, %v5245_v4  ;;  %v5346_v29 = vadd.f32 %v5345_v7, %v5344_v1  ;;  %v5311_v0 = vmul.f32 %v6305_v30, %v6305_v30  ;;  %v5252_v49 = vsel %vm5230_vm0, %v6305_v30, 0.0 }
 0x26b   : > { %v5347_v42 = vsel %vm5230_vm0, %v5308_v22, 0.0  ;;  %v5248_v53 = vsel %vm5230_vm0, %v6306_v15, 0.0  ;;  %v5309_v25 = vmul.f32 %v6306_v15, %v6306_v15  ;;  %v5351_v40 = vsel %vm5230_vm0, %v5310_v2, 0.0 }
 0x26c   : > { %v5249_v27 = vadd.f32 %v5248_v53, %v5247_v50  ;;  %v5348_v20 = vadd.f32 %v5347_v42, %v5346_v29 }
 0x26d   : > { %v5349_v59 = vsel %vm5230_vm0, %v5309_v25, 0.0  ;;  %v6275_v63 = vpop.f32.mrb[12].mxu0 }
 0x26e   : > { %v5251_v56 = vadd.f32 %v5250_v43, %v5249_v27  ;;  %v6307_v37 = vadd.f32 %v6275_v63, %v8547_v41  ;;  %v5119_v11 = vpop.f32.mrb[13].mxu0  ;;  %v5350_v19 = vadd.f32 %v5349_v59, %v5348_v20  ;;  %v5353_v41 = vsel %vm5230_vm0, %v5311_v0, 0.0 }
 0x26f   : > { %v6308_v23 = vadd.f32 %v5119_v11, %v8549_v34  ;;  %v6276_v36 = vpop.f32.mrb[14].mxu0 }
 0x270   : > { %v5253_v46 = vadd.f32 %v5252_v49, %v5251_v56  ;;  %v6309_v57 = vadd.f32 %v6276_v36, %v8551_v61  ;;  %v5122_v62 = vpop.f32.mrb[15].mxu0  ;;  %v5352_v47 = vadd.f32 %v5351_v40, %v5350_v19  ;;  %v5314_v45 = vmul.f32 %v6307_v37, %v6307_v37 }
 0x271   : > { %v5254_v60 = vsel %vm5230_vm0, %v6308_v23, 0.0  ;;  %v5312_v26 = vmul.f32 %v6308_v23, %v6308_v23  ;;  %v6310_v31 = vadd.f32 %v5122_v62, %v8553_v48  ;;  %v5258_v61 = vsel %vm5230_vm0, %v6307_v37, 0.0 }
 0x272   : > { %v5255_v52 = vadd.f32 %v5254_v60, %v5253_v46  ;;  %v5354_v58 = vadd.f32 %v5353_v41, %v5352_v47  ;;  %v5315_v21 = vmul.f32 %v6309_v57, %v6309_v57  ;;  %v5260_v44 = vsel %vm5230_vm0, %v6309_v57, 0.0 }
 0x273   : > { %v5355_v17 = vsel %vm5230_vm0, %v5312_v26, 0.0  ;;  %v5256_v34 = vsel %vm5230_vm0, %v6310_v31, 0.0  ;;  %v5313_v39 = vmul.f32 %v6310_v31, %v6310_v31  ;;  %v5359_v12 = vsel %vm5230_vm0, %v5314_v45, 0.0 }
 0x274   : > { %v5257_v54 = vadd.f32 %v5256_v34, %v5255_v52  ;;  %v5356_v10 = vadd.f32 %v5355_v17, %v5354_v58  ;;  %v5361_v8 = vsel %vm5230_vm0, %v5315_v21, 0.0 }
 0x275   : > { %v5357_v3 = vsel %vm5230_vm0, %v5313_v39, 0.0  ;;  %v6279_v55 = vpop.f32.mrb[16].mxu0 }
 0x276   : > { %v5259_v5 = vadd.f32 %v5258_v61, %v5257_v54  ;;  %v5135_v48 = vpop.f32.mrb[17].mxu0  ;;  %v5358_v35 = vadd.f32 %v5357_v3, %v5356_v10 }
 0x277   : > { %v6280_v28 = vpop.f32.mrb[18].mxu0 }
 0x278   : > { %v5261_v9 = vadd.f32 %v5260_v44, %v5259_v5  ;;  %v5138_v33 = vpop.f32.mrb[19].mxu0  ;;  %v5360_v16 = vadd.f32 %v5359_v12, %v5358_v35 }
 0x27a   : > { %v5362_v32 = vadd.f32 %v5361_v8, %v5360_v16 }
 0x27d   : > { %v6143_v51 = vpop.f32.mrb[16].mxu1  ;;  %v6283_v4 = vpop.f32.mrb[20].mxu0 }
 0x27e   : > { %v3110_v18 = vpop.f32.mrb[17].mxu1  ;;  %v6311_v13 = vadd.f32 %v6279_v55, %v6143_v51  ;;  %v5151_v1 = vpop.f32.mrb[21].mxu0 }
 0x27f   : > { %v6144_v14 = vpop.f32.mrb[18].mxu1  ;;  %v6312_v24 = vadd.f32 %v5135_v48, %v3110_v18  ;;  %v6284_v7 = vpop.f32.mrb[22].mxu0 }
 0x280   : > { %v3113_v30 = vpop.f32.mrb[19].mxu1  ;;  %v6313_v6 = vadd.f32 %v6280_v28, %v6144_v14  ;;  %v5154_v29 = vpop.f32.mrb[23].mxu0  ;;  %v5318_v42 = vmul.f32 %v6311_v13, %v6311_v13  ;;  %v5266_v59 = vsel %vm5230_vm0, %v6311_v13, 0.0 }
 0x281   : > { %v5262_v38 = vsel %vm5230_vm0, %v6312_v24, 0.0  ;;  %v5316_v22 = vmul.f32 %v6312_v24, %v6312_v24  ;;  %v6314_v15 = vadd.f32 %v5138_v33, %v3113_v30 }
 0x282   : > { %v5263_v50 = vadd.f32 %v5262_v38, %v5261_v9  ;;  %v5319_v43 = vmul.f32 %v6313_v6, %v6313_v6  ;;  %v5367_v19 = vsel %vm5230_vm0, %v5318_v42, 0.0  ;;  %v5268_v23 = vsel %vm5230_vm0, %v6313_v6, 0.0 }
 0x283   : > { %v5363_v53 = vsel %vm5230_vm0, %v5316_v22, 0.0  ;;  %v5264_v25 = vsel %vm5230_vm0, %v6314_v15, 0.0  ;;  %v5317_v2 = vmul.f32 %v6314_v15, %v6314_v15 }
 0x284   : > { %v5364_v27 = vadd.f32 %v5363_v53, %v5362_v32  ;;  %v5265_v20 = vadd.f32 %v5264_v25, %v5263_v50  ;;  %v5369_v57 = vsel %vm5230_vm0, %v5319_v43, 0.0 }
 0x285   : > { %v5365_v63 = vsel %vm5230_vm0, %v5317_v2, 0.0  ;;  %v6147_v0 = vpop.f32.mrb[20].mxu1  ;;  %v6287_v46 = vpop.f32.mrb[24].mxu0 }
 0x286   : > { %v5267_v56 = vadd.f32 %v5266_v59, %v5265_v20  ;;  %v5366_v37 = vadd.f32 %v5365_v63, %v5364_v27  ;;  %v3126_v11 = vpop.f32.mrb[21].mxu1  ;;  %v6315_v49 = vadd.f32 %v6283_v4, %v6147_v0  ;;  %v5167_v26 = vpop.f32.mrb[25].mxu0 }
 0x287   : > { %v6148_v36 = vpop.f32.mrb[22].mxu1  ;;  %v6316_v40 = vadd.f32 %v5151_v1, %v3126_v11  ;;  %v6288_v17 = vpop.f32.mrb[26].mxu0 }
 0x288   : > { %v5368_v62 = vadd.f32 %v5367_v19, %v5366_v37  ;;  %v5269_v47 = vadd.f32 %v5268_v23, %v5267_v56  ;;  %v3129_v60 = vpop.f32.mrb[23].mxu1  ;;  %v6317_v52 = vadd.f32 %v6284_v7, %v6148_v36  ;;  %v5170_v45 = vpop.f32.mrb[27].mxu0  ;;  %v5322_v10 = vmul.f32 %v6315_v49, %v6315_v49 }
 0x289   : > { %v5270_v31 = vsel %vm5230_vm0, %v6316_v40, 0.0  ;;  %v5320_v41 = vmul.f32 %v6316_v40, %v6316_v40  ;;  %v6318_v58 = vadd.f32 %v5154_v29, %v3129_v60  ;;  %v5274_v5 = vsel %vm5230_vm0, %v6315_v49, 0.0 }
 0x28a   : > { %v5271_v34 = vadd.f32 %v5270_v31, %v5269_v47  ;;  %v5370_v39 = vadd.f32 %v5369_v57, %v5368_v62  ;;  %v5323_v44 = vmul.f32 %v6317_v52, %v6317_v52  ;;  %v5276_v33 = vsel %vm5230_vm0, %v6317_v52, 0.0 }
 0x28b   : > { %v5371_v54 = vsel %vm5230_vm0, %v5320_v41, 0.0  ;;  %v5272_v61 = vsel %vm5230_vm0, %v6318_v58, 0.0  ;;  %v5321_v21 = vmul.f32 %v6318_v58, %v6318_v58  ;;  %v5375_v18 = vsel %vm5230_vm0, %v5322_v10, 0.0 }
 0x28c   : > { %v5372_v3 = vadd.f32 %v5371_v54, %v5370_v39  ;;  %v5273_v55 = vadd.f32 %v5272_v61, %v5271_v34  ;;  %v5377_v15 = vsel %vm5230_vm0, %v5323_v44, 0.0 }
 0x28d   : > { %v6151_v48 = vpop.f32.mrb[24].mxu1  ;;  %v5373_v28 = vsel %vm5230_vm0, %v5321_v21, 0.0  ;;  %v6291_v32 = vpop.f32.mrb[28].mxu0 }
 0x28e   : > { %v5275_v35 = vadd.f32 %v5274_v5, %v5273_v55  ;;  %v3142_v12 = vpop.f32.mrb[25].mxu1  ;;  %v6319_v9 = vadd.f32 %v6287_v46, %v6151_v48  ;;  %v5374_v16 = vadd.f32 %v5373_v28, %v5372_v3  ;;  %v5183_v4 = vpop.f32.mrb[29].mxu0 }
 0x28f   : > { %v6152_v8 = vpop.f32.mrb[26].mxu1  ;;  %v6320_v51 = vadd.f32 %v5167_v26, %v3142_v12  ;;  %v6292_v22 = vpop.f32.mrb[30].mxu0 }
 0x290   : > { %v5277_v13 = vadd.f32 %v5276_v33, %v5275_v35  ;;  %v3145_v14 = vpop.f32.mrb[27].mxu1  ;;  %v6321_v24 = vadd.f32 %v6288_v17, %v6152_v8  ;;  %v5376_v30 = vadd.f32 %v5375_v18, %v5374_v16  ;;  %v5186_v50 = vpop.f32.mrb[31].mxu0  ;;  %v5326_v2 = vmul.f32 %v6319_v9, %v6319_v9 }
 0x291   : > { %v5278_v6 = vsel %vm5230_vm0, %v6320_v51, 0.0  ;;  %v5324_v1 = vmul.f32 %v6320_v51, %v6320_v51  ;;  %v6322_v38 = vadd.f32 %v5170_v45, %v3145_v14  ;;  %v5282_v43 = vsel %vm5230_vm0, %v6319_v9, 0.0 }
 0x292   : > { %v5279_v7 = vadd.f32 %v5278_v6, %v5277_v13  ;;  %v5378_v29 = vadd.f32 %v5377_v15, %v5376_v30  ;;  %v5327_v0 = vmul.f32 %v6321_v24, %v6321_v24  ;;  %v5284_v49 = vsel %vm5230_vm0, %v6321_v24, 0.0 }
 0x293   : > { %v5379_v42 = vsel %vm5230_vm0, %v5324_v1, 0.0  ;;  %v5280_v53 = vsel %vm5230_vm0, %v6322_v38, 0.0  ;;  %v5325_v25 = vmul.f32 %v6322_v38, %v6322_v38  ;;  %v5383_v40 = vsel %vm5230_vm0, %v5326_v2, 0.0 }
 0x294   : > { %v5281_v27 = vadd.f32 %v5280_v53, %v5279_v7  ;;  %v5380_v20 = vadd.f32 %v5379_v42, %v5378_v29  ;;  %v5385_v41 = vsel %vm5230_vm0, %v5327_v0, 0.0 }
 0x295   : > { %v5381_v59 = vsel %vm5230_vm0, %v5325_v25, 0.0  ;;  %v6155_v63 = vpop.f32.mrb[28].mxu1 }
 0x296   : > { %v5283_v56 = vadd.f32 %v5282_v43, %v5281_v27  ;;  %v3158_v37 = vpop.f32.mrb[29].mxu1  ;;  %v6323_v11 = vadd.f32 %v6291_v32, %v6155_v63  ;;  %v5382_v19 = vadd.f32 %v5381_v59, %v5380_v20 }
 0x297   : > { %v6156_v23 = vpop.f32.mrb[30].mxu1  ;;  %v6324_v36 = vadd.f32 %v5183_v4, %v3158_v37 }
 0x298   : > { %v5285_v46 = vadd.f32 %v5284_v49, %v5283_v56  ;;  %v3161_v57 = vpop.f32.mrb[31].mxu1  ;;  %v6325_v62 = vadd.f32 %v6292_v22, %v6156_v23  ;;  %v5384_v47 = vadd.f32 %v5383_v40, %v5382_v19  ;;  %v5330_v45 = vmul.f32 %v6323_v11, %v6323_v11 }
 0x299   : > { %v5286_v60 = vsel %vm5230_vm0, %v6324_v36, 0.0  ;;  %v5328_v26 = vmul.f32 %v6324_v36, %v6324_v36  ;;  %v6326_v31 = vadd.f32 %v5186_v50, %v3161_v57  ;;  %v5290_v61 = vsel %vm5230_vm0, %v6323_v11, 0.0 }
 0x29a   : > { %v5287_v52 = vadd.f32 %v5286_v60, %v5285_v46  ;;  %v5386_v58 = vadd.f32 %v5385_v41, %v5384_v47  ;;  %v5331_v55 = vmul.f32 %v6325_v62, %v6325_v62  ;;  %v5292_v5 = vsel %vm5230_vm0, %v6325_v62, 0.0 }
 0x29b   : > { %v5387_v17 = vsel %vm5230_vm0, %v5328_v26, 0.0  ;;  %v5288_v34 = vsel %vm5230_vm0, %v6326_v31, 0.0  ;;  %v5329_v39 = vmul.f32 %v6326_v31, %v6326_v31  ;;  %v5391_v44 = vsel %vm5230_vm0, %v5330_v45, 0.0 }
 0x29c   : > { %v5289_v54 = vadd.f32 %v5288_v34, %v5287_v52  ;;  %v5388_v10 = vadd.f32 %v5387_v17, %v5386_v58  ;;  %v5393_v12 = vsel %vm5230_vm0, %v5331_v55, 0.0 }
 0x29d   : > { %v5389_v3 = vsel %vm5230_vm0, %v5329_v39, 0.0 }
 0x29e   : > { %v5291_v21 = vadd.f32 %v5290_v61, %v5289_v54  ;;  %v5390_v48 = vadd.f32 %v5389_v3, %v5388_v10 }
 0x2a0   : > { %v5293_v35 = vadd.f32 %v5292_v5, %v5291_v21  ;;  %v5392_v28 = vadd.f32 %v5391_v44, %v5390_v48 }
 0x2a2   : > { %v5294_v9 = vrot.slane %v5293_v35, 4  ;;  %v5394_v33 = vadd.f32 %v5393_v12, %v5392_v28 }
 0x2a4   : > { %v5295_v16 = vadd.f32 %v5294_v9, %v5293_v35  ;;  %v5395_v8 = vrot.slane %v5394_v33, 4 }
 0x2a6   : > { %v5296_v51 = vrot.slane %v5295_v16, 2  ;;  %v5396_v32 = vadd.f32 %v5395_v8, %v5394_v33 }
 0x2a8   : > { %v5297_v18 = vadd.f32 %v5296_v51, %v5295_v16  ;;  %v5397_v13 = vrot.slane %v5396_v32, 2 }
 0x2aa   : > { %v5298_v14 = vrot.slane %v5297_v18, 1  ;;  %v5398_v24 = vadd.f32 %v5397_v13, %v5396_v32 }
 0x2ac   : > { %v5399_v4 = vrot.slane %v5398_v24, 1  ;;  %v5299_v30 = vadd.f32 %v5298_v14, %v5297_v18 }
 0x2ae   : > { %v5400_v6 = vadd.f32 %v5399_v4, %v5398_v24 }
 0x2b0   : > { %v5402_v1 = vsel %vm5401_vm1, %v5299_v30, %v5400_v6 }
 0x2b1   : > { %5404 = vst.msk [vmem:[%s136_s4] sm:$0x3] %vm5403_vm2, %v5402_v1 }
 0x2b2   : > { %6699 = shalt.err (!%p6696_p3)
}
 0x2b3   : > { %s6700_s22 = scalar_lea.hbm %s8630_s8, 32  ;;  %s6704_s25 = scalar_lea.hbm %s8674_s2, 64 }
 0x2b4   : > { %p6701_p4 = scmp.ne.s32.totalorder %s8630_s8, %s6700_s22  ;;  %p6705_p9 = scmp.lt.u32.totalorder %s8630_s8, %s8674_s2 }
 0x2b5   : > { %p6706_p10 = scmp.lt.u32.totalorder %s6704_s25, %s6700_s22  ;;  %p6708_p12 = scmp.lt.u32.totalorder %s6700_s22, %s8630_s8 }
 0x2b6   : > { %p6702_p7 = pnand %p6701_p4, %p6805_p5 }
 0x2b7   : > { %p6707_p11 = por %p6706_p10, %p6705_p9 }
 0x2b8   : > { %p6703_p8 = pneg %p6702_p7 }
 0x2b9   : > { %p6709_p13 = por %p6708_p12, %p6707_p11 }
 0x2bb   : > { %p6710_p0 = pnand %p6709_p13, %p6703_p8 }
 0x2bd   : > { %6713 = shalt.err (!%p6710_p0)
}
 0x2be   : > { %6561 = dma.vmem_to_hbm [thread:$0]  (%p6805_p5), %s8632_s5, 32, %s8630_s8, %s5406_s14  }
 0x2bf PF: > { %p6567_p1 = scmp.ge.s32.totalorder %s6748_s12, 2  ;;  %s5431_s28 = sand.u32 1, %s6736_s9  }
 0x2c0   : > { %s5432_s29 = scalar_lea.sflag [#allocation4], %s5431_s28 }
 0x2c1   : > { %p6564_p2 = pnand %p6567_p1, %p6809_p6 }
 0x2c3   : > { %6731 = dma.done.wait (!%p6564_p2), %s5432_s29, 32  }
 0x2c4   : > { %6733 = vsyncadd (!%p6564_p2), %s5432_s29, 4294967264  ;;  %p12_p3 = scmp.ge.s32.totalorder %s6792_s15, 4   ;;  %s8777_s9 = smov %s6740_s10 }
 0x2c5   : > { %s8778_s10 = smov %s6744_s11  ;;  %s8779_s11 = smov %s6803_s18 }
 0x2c6   : > { %s8780_s12 = smov %s6792_s15  ;;  %14 = sbr.rel (!%p12_p3) target bundleno = 3 (0x3), region = 73 }
 0x2cd   :  { %5437 = vsyncpa [#allocation4], 1 }
 0x2ce   :  { %5439 = vsyncpa [#allocation4 + $0x1], 1 }

</bundles_post_ra>
